<compile_context>
chip_gen: v7x
topology: tpu7x:2x2x1
jax: 0.10.0
libtpu: 0.0.40
codegen_flags: <defaults>
</compile_context>

<pallas_src>
import functools

import jax
import jax.numpy as jnp
from jax.experimental import pallas as pl
from jax.experimental.pallas import tpu as pltpu


def _round_up(x, m):
    return (x + m - 1) // m * m


# --------------------------------------------------------------------------- kernels
def _lane_tile(v, reps):
    """(1, C) -> (1, C*reps) by concatenation (column order = group*C + c)."""
    if reps == 1:
        return v
    return jnp.concatenate([v] * reps, axis=1)


def _lane_pad(v, width):
    pad = width - v.shape[1]
    if pad <= 0:
        return v
    return jnp.concatenate([v, jnp.zeros((v.shape[0], pad), v.dtype)], axis=1)


def _group_sum(v, groups, c):
    """(1, groups*C) -> (1, C): sum the `groups` column groups."""
    acc = v[:, 0:c]
    for g in range(1, groups):
        acc = acc + v[:, g * c:(g + 1) * c]
    return acc


def _matmul_bn_relu_kernel(a_ref, b_ref, gamma_ref, beta_ref, o_ref, *, groups, c, eps):
    """out = relu(BatchNorm(A @ B)); batch statistics computed in-kernel.

    Columns of (A @ B) are ordered (group, channel); BN statistics are per
    channel, reduced over all rows and all `groups` column groups.
    """
    y = jnp.dot(a_ref[...], b_ref[...], preferred_element_type=jnp.float32)  # (M, Npad)
    m, npad = y.shape
    gc = groups * c
    count = float(m * groups)

    col_sum = jnp.sum(y, axis=0, keepdims=True)                     # (1, Npad)
    mean_c = _group_sum(col_sum[:, :gc], groups, c) / count         # (1, C)
    mean_full = _lane_pad(_lane_tile(mean_c, groups), npad)         # (1, Npad)

    d = y - mean_full                                               # centered
    col_sq = jnp.sum(d * d, axis=0, keepdims=True)                  # (1, Npad)
    var_c = _group_sum(col_sq[:, :gc], groups, c) / count           # (1, C)

    scale_c = gamma_ref[...] * jax.lax.rsqrt(var_c + eps)           # (1, C)
    scale_full = _lane_pad(_lane_tile(scale_c, groups), npad)
    beta_full = _lane_pad(_lane_tile(beta_ref[...], groups), npad)

    o_ref[...] = jnp.maximum(d * scale_full + beta_full, 0.0)


def _matmul_tanh_kernel(a_ref, b_ref, o_ref):
    y = jnp.dot(a_ref[...], b_ref[...], preferred_element_type=jnp.float32)
    o_ref[...] = jnp.tanh(y)


def pallas_conv_bn_relu(a, b, gamma, beta, groups, eps=1e-5):
    """Single-grid-step fused (A @ B) + BatchNorm(batch stats) + ReLU."""
    m, k = a.shape
    _, npad = b.shape
    c = gamma.shape[-1]
    kern = functools.partial(_matmul_bn_relu_kernel, groups=groups, c=c, eps=eps)
    return pl.pallas_call(
        kern,
        out_shape=jax.ShapeDtypeStruct((m, npad), jnp.float32),
        grid=(1,),
        in_specs=[
            pl.BlockSpec((m, k), lambda i: (0, 0)),
            pl.BlockSpec((k, npad), lambda i: (0, 0)),
            pl.BlockSpec((1, c), lambda i: (0, 0)),
            pl.BlockSpec((1, c), lambda i: (0, 0)),
        ],
        out_specs=pl.BlockSpec((m, npad), lambda i: (0, 0)),
        compiler_params=pltpu.CompilerParams(dimension_semantics=("arbitrary",)),
    )(a, b, gamma.reshape(1, c), beta.reshape(1, c))


def pallas_conv_tanh(a, b):
    """(A @ B) + tanh; 2-way parallel M grid (v7x megacore) when divisible."""
    m, k = a.shape
    _, npad = b.shape
    gm = 2 if (m % 16 == 0 and m >= 512) else 1
    tm = m // gm
    return pl.pallas_call(
        _matmul_tanh_kernel,
        out_shape=jax.ShapeDtypeStruct((m, npad), jnp.float32),
        grid=(gm,),
        in_specs=[
            pl.BlockSpec((tm, k), lambda i: (i, 0)),
            pl.BlockSpec((k, npad), lambda i: (0, 0)),
        ],
        out_specs=pl.BlockSpec((tm, npad), lambda i: (i, 0)),
        compiler_params=pltpu.CompilerParams(dimension_semantics=("parallel",)),
    )(a, b)


# ------------------------------------------------------------------ layer construction
def _phase_weight_matrix(w):
    """ConvTranspose2d(k=4, s=2, p=1) weight -> (9*C_in, 4*C_out) sub-pixel matrix.

    Row index = (dy, dx, c_in) over the 3x3 patch of the unit-padded input,
    column index = (py, px, c_out) over the 2x2 output phases:
        out[2m+py, 2n+px] += x[m-1+dy, n-1+dx] * W[:, :, ky, kx]
    with ky = py - 2*dy + 3, kx = px - 2*dx + 3 (zero when outside [0, 4)).
    """
    c_in, c_out = w.shape[0], w.shape[1]
    blk = jnp.zeros((3, 3, c_in, 2, 2, c_out), w.dtype)
    for dy in range(3):
        for dx in range(3):
            for py in range(2):
                for px in range(2):
                    ky = py - 2 * dy + 3
                    kx = px - 2 * dx + 3
                    if 0 <= ky < 4 and 0 <= kx < 4:
                        blk = blk.at[dy, dx, :, py, px, :].set(w[:, :, ky, kx])
    return blk.reshape(9 * c_in, 4 * c_out)


def _layer_matmul_operands(x_nhwc, layer):
    """Return (A, B, groups, OH, OW) such that ConvT(x) == (A @ B) re-interleaved."""
    w = layer["weight"]                                 # (C_in, C_out, 4, 4)
    c_in, c_out = w.shape[0], w.shape[1]
    n = x_nhwc.shape[0]
    if layer["stride"] == 1:
        # 1x1 spatial input, stride 1, padding 0: ConvT is a plain matmul.
        assert x_nhwc.shape[1] == 1 and x_nhwc.shape[2] == 1
        a = x_nhwc.reshape(n, c_in)
        b = jnp.transpose(w, (0, 2, 3, 1)).reshape(c_in, 16 * c_out)
        return a, b, 16, 4, 4
    # stride 2, padding 1, kernel 4: sub-pixel (4-phase) decomposition.
    h, wd = x_nhwc.shape[1], x_nhwc.shape[2]
    xp = jnp.pad(x_nhwc, ((0, 0), (1, 1), (1, 1), (0, 0)))
    patches = jnp.stack(
        [xp[:, dy:dy + h, dx:dx + wd, :] for dy in range(3) for dx in range(3)],
        axis=3)                                          # (N, H, W, 9, C_in)
    a = patches.reshape(n * h * wd, 9 * c_in)
    b = _phase_weight_matrix(w)                          # (9*C_in, 4*C_out)
    return a, b, 4, 2 * h, 2 * wd


def generator_forward(z_nchw, layers):
    """DCGAN Generator forward.  z_nchw: (N, latent_dim, 1, 1) -> (N, nc, 64, 64)."""
    x = jnp.transpose(z_nchw, (0, 2, 3, 1)).astype(jnp.float32)     # NHWC
    for layer in layers:
        c_out = layer["weight"].shape[1]
        n = x.shape[0]
        a, b, groups, oh, ow = _layer_matmul_operands(x, layer)
        gc = groups * c_out
        npad = _round_up(gc, 128)
        if npad > gc:
            b = jnp.concatenate(
                [b, jnp.zeros((b.shape[0], npad - gc), b.dtype)], axis=1)
        a16 = a.astype(jnp.bfloat16)
        b16 = b.astype(jnp.bfloat16)
        if layer["bn"]:
            y = pallas_conv_bn_relu(a16, b16, layer["gamma"], layer["beta"], groups)
        else:
            y = pallas_conv_tanh(a16, b16)
        y = y[:, :gc]
        if layer["stride"] == 1:
            x = y.reshape(n, oh, ow, c_out)
        else:
            h, wd = oh // 2, ow // 2
            x = (y.reshape(n, h, wd, 2, 2, c_out)
                   .transpose(0, 1, 3, 2, 4, 5)
                   .reshape(n, oh, ow, c_out))
    return jnp.transpose(x, (0, 3, 1, 2))                           # back to NCHW


# ------------------------------------------------------------------------ reference
def reference_forward(z_nchw, layers, eps=1e-5):
    """Pure-JAX (XLA) f32 reference of the PyTorch module for validation."""
    x = z_nchw
    for layer in layers:
        w = layer["weight"]                                         # (C_in, C_out, 4, 4)
        wf = jnp.transpose(w[:, :, ::-1, ::-1], (1, 0, 2, 3))       # (C_out, C_in, 4, 4)
        p = 3 - layer["padding"]
        x = jax.lax.conv_general_dilated(
            x, wf, window_strides=(1, 1), padding=[(p, p), (p, p)],
            lhs_dilation=(layer["stride"], layer["stride"]),
            dimension_numbers=("NCHW", "OIHW", "NCHW"))
        if layer["bn"]:
            mean = jnp.mean(x, axis=(0, 2, 3), keepdims=True)
            var = jnp.mean(jnp.square(x - mean), axis=(0, 2, 3), keepdims=True)
            g = layer["gamma"].reshape(1, -1, 1, 1)
            bta = layer["beta"].reshape(1, -1, 1, 1)
            x = jnp.maximum((x - mean) * jax.lax.rsqrt(var + eps) * g + bta, 0.0)
        else:
            x = jnp.tanh(x)
    return x


# --------------------------------------------------------------------------- params
def init_generator_params(key, latent_dim, nc, ngf):
    """Deterministic parameter init matching the module's architecture/shapes."""
    chans = [latent_dim, 8 * ngf, 4 * ngf, 2 * ngf, ngf, nc]
    strides = [1, 2, 2, 2, 2]
    paddings = [0, 1, 1, 1, 1]
    layers = []
    for li in range(5):
        key, wk, gk, bk = jax.random.split(key, 4)
        c_in, c_out = chans[li], chans[li + 1]
        w = 0.02 * jax.random.normal(wk, (c_in, c_out, 4, 4), jnp.float32)
        has_bn = li < 4  # last layer: ConvTranspose2d + Tanh only
        layers.append(dict(
            weight=w, stride=strides[li], padding=paddings[li], bn=has_bn,
            gamma=(1.0 + 0.1 * jax.random.normal(gk, (c_out,), jnp.float32))
            if has_bn else None,
            beta=(0.1 * jax.random.normal(bk, (c_out,), jnp.float32))
            if has_bn else None,
        ))
    return layers


# ----------------------------------------------------------------------------- main
if __name__ == "__main__":
    latent_dim = 8
    nc, ngf = 3, 4          # img_shape = (nc, ngf, ...)
    batch = 2

    key = jax.random.PRNGKey(0)
    key, zk = jax.random.split(key)
    z = jax.random.normal(zk, (batch, latent_dim, 1, 1), jnp.float32)  # NCHW latent

    layers = init_generator_params(key, latent_dim, nc, ngf)

    fwd = jax.jit(lambda zz: generator_forward(zz, layers))
    out = jax.block_until_ready(fwd(z))
    ref = jax.block_until_ready(reference_forward(z, layers))

    assert out.shape == (batch, nc, 64, 64), out.shape
    assert bool(jnp.all(jnp.isfinite(out)))
    assert bool(jnp.all(jnp.abs(out) <= 1.0))  # tanh output range
    max_err = float(jnp.max(jnp.abs(out - ref)))
    mean_err = float(jnp.mean(jnp.abs(out - ref)))
    # Tolerances cover bf16 MXU inputs through 5 layers; a structural bug would
    # show up orders of magnitude larger.
    assert max_err < 0.15 and mean_err < 0.02, (max_err, mean_err)
    print("KERNEL_OK")
</pallas_src>

<mosaic_0001>
module attributes {stable_mosaic.version = 11 : i64} {
  func.func @_matmul_bn_relu_kernel(%arg0: i32, %arg1: memref<2x8xbf16, #tpu.memory_space<vmem>>, %arg2: memref<8x512xbf16, #tpu.memory_space<vmem>>, %arg3: memref<1x32xf32, #tpu.memory_space<vmem>>, %arg4: memref<1x32xf32, #tpu.memory_space<vmem>>, %arg5: memref<2x512xf32, #tpu.memory_space<vmem>>) attributes {dimension_semantics = [#tpu.dimension_semantics<arbitrary>], iteration_bounds = array<i64: 1>, scalar_prefetch = 0 : i64, scratch_operands = 0 : i64, tpu.core_type = #tpu.core_type<tc>, window_params = [{pipeline_mode = #tpu.pipeline_mode<synchronous>, transform_indices = @transform_0, window_bounds = array<i64: 2, 8>}, {pipeline_mode = #tpu.pipeline_mode<synchronous>, transform_indices = @transform_1, window_bounds = array<i64: 8, 512>}, {pipeline_mode = #tpu.pipeline_mode<synchronous>, transform_indices = @transform_2, window_bounds = array<i64: 1, 32>}, {pipeline_mode = #tpu.pipeline_mode<synchronous>, transform_indices = @transform_3, window_bounds = array<i64: 1, 32>}, {pipeline_mode = #tpu.pipeline_mode<synchronous>, transform_indices = @transform_4, window_bounds = array<i64: 2, 512>}]} {
    %c0 = arith.constant 0 : index
    %c0_0 = arith.constant 0 : index
    %0 = vector.load %arg1[%c0, %c0_0] : memref<2x8xbf16, #tpu.memory_space<vmem>>, vector<2x8xbf16>
    %c0_1 = arith.constant 0 : index
    %c0_2 = arith.constant 0 : index
    %1 = vector.load %arg2[%c0_1, %c0_2] : memref<8x512xbf16, #tpu.memory_space<vmem>>, vector<8x512xbf16>
    %cst = arith.constant dense<0.000000e+00> : vector<2x512xf32>
    %2 = tpu.matmul %0, %1, %cst {dimension_numbers = #tpu.dot_dimension_numbers<[1], [0], [0], [1], [0, 0, 1, 1], [], []>} : vector<2x8xbf16>, vector<8x512xbf16>, vector<2x512xf32> -> vector<2x512xf32>
    %cst_3 = arith.constant dense<0.000000e+00> : vector<512xf32>
    %3 = vector.multi_reduction <add>, %2, %cst_3 [0] : vector<2x512xf32> to vector<512xf32>
    %4 = vector.shape_cast %3 : vector<512xf32> to vector<1x512xf32>
    %5 = vector.extract_strided_slice %4 {offsets = [0, 0], sizes = [1, 32], strides = [1, 1]} : vector<1x512xf32> to vector<1x32xf32>
    %6 = vector.extract_strided_slice %4 {offsets = [0, 32], sizes = [1, 32], strides = [1, 1]} : vector<1x512xf32> to vector<1x32xf32>
    %7 = arith.addf %5, %6 : vector<1x32xf32>
    %8 = vector.extract_strided_slice %4 {offsets = [0, 64], sizes = [1, 32], strides = [1, 1]} : vector<1x512xf32> to vector<1x32xf32>
    %9 = arith.addf %7, %8 : vector<1x32xf32>
    %10 = vector.extract_strided_slice %4 {offsets = [0, 96], sizes = [1, 32], strides = [1, 1]} : vector<1x512xf32> to vector<1x32xf32>
    %11 = arith.addf %9, %10 : vector<1x32xf32>
    %12 = vector.extract_strided_slice %4 {offsets = [0, 128], sizes = [1, 32], strides = [1, 1]} : vector<1x512xf32> to vector<1x32xf32>
    %13 = arith.addf %11, %12 : vector<1x32xf32>
    %14 = vector.extract_strided_slice %4 {offsets = [0, 160], sizes = [1, 32], strides = [1, 1]} : vector<1x512xf32> to vector<1x32xf32>
    %15 = arith.addf %13, %14 : vector<1x32xf32>
    %16 = vector.extract_strided_slice %4 {offsets = [0, 192], sizes = [1, 32], strides = [1, 1]} : vector<1x512xf32> to vector<1x32xf32>
    %17 = arith.addf %15, %16 : vector<1x32xf32>
    %18 = vector.extract_strided_slice %4 {offsets = [0, 224], sizes = [1, 32], strides = [1, 1]} : vector<1x512xf32> to vector<1x32xf32>
    %19 = arith.addf %17, %18 : vector<1x32xf32>
    %20 = vector.extract_strided_slice %4 {offsets = [0, 256], sizes = [1, 32], strides = [1, 1]} : vector<1x512xf32> to vector<1x32xf32>
    %21 = arith.addf %19, %20 : vector<1x32xf32>
    %22 = vector.extract_strided_slice %4 {offsets = [0, 288], sizes = [1, 32], strides = [1, 1]} : vector<1x512xf32> to vector<1x32xf32>
    %23 = arith.addf %21, %22 : vector<1x32xf32>
    %24 = vector.extract_strided_slice %4 {offsets = [0, 320], sizes = [1, 32], strides = [1, 1]} : vector<1x512xf32> to vector<1x32xf32>
    %25 = arith.addf %23, %24 : vector<1x32xf32>
    %26 = vector.extract_strided_slice %4 {offsets = [0, 352], sizes = [1, 32], strides = [1, 1]} : vector<1x512xf32> to vector<1x32xf32>
    %27 = arith.addf %25, %26 : vector<1x32xf32>
    %28 = vector.extract_strided_slice %4 {offsets = [0, 384], sizes = [1, 32], strides = [1, 1]} : vector<1x512xf32> to vector<1x32xf32>
    %29 = arith.addf %27, %28 : vector<1x32xf32>
    %30 = vector.extract_strided_slice %4 {offsets = [0, 416], sizes = [1, 32], strides = [1, 1]} : vector<1x512xf32> to vector<1x32xf32>
    %31 = arith.addf %29, %30 : vector<1x32xf32>
    %32 = vector.extract_strided_slice %4 {offsets = [0, 448], sizes = [1, 32], strides = [1, 1]} : vector<1x512xf32> to vector<1x32xf32>
    %33 = arith.addf %31, %32 : vector<1x32xf32>
    %34 = vector.extract_strided_slice %4 {offsets = [0, 480], sizes = [1, 32], strides = [1, 1]} : vector<1x512xf32> to vector<1x32xf32>
    %35 = arith.addf %33, %34 : vector<1x32xf32>
    %cst_4 = arith.constant 3.200000e+01 : f32
    %36 = vector.broadcast %cst_4 : f32 to vector<1x32xf32>
    %37 = arith.divf %35, %36 : vector<1x32xf32>
    %38 = tpu.concatenate %37, %37, %37, %37, %37, %37, %37, %37, %37, %37, %37, %37, %37, %37, %37, %37 in 1 : vector<1x32xf32>, vector<1x32xf32>, vector<1x32xf32>, vector<1x32xf32>, vector<1x32xf32>, vector<1x32xf32>, vector<1x32xf32>, vector<1x32xf32>, vector<1x32xf32>, vector<1x32xf32>, vector<1x32xf32>, vector<1x32xf32>, vector<1x32xf32>, vector<1x32xf32>, vector<1x32xf32>, vector<1x32xf32> -> vector<1x512xf32>
    %39 = vector.broadcast %38 : vector<1x512xf32> to vector<2x512xf32>
    %40 = arith.subf %2, %39 : vector<2x512xf32>
    %41 = arith.mulf %40, %40 : vector<2x512xf32>
    %cst_5 = arith.constant dense<0.000000e+00> : vector<512xf32>
    %42 = vector.multi_reduction <add>, %41, %cst_5 [0] : vector<2x512xf32> to vector<512xf32>
    %43 = vector.shape_cast %42 : vector<512xf32> to vector<1x512xf32>
    %44 = vector.extract_strided_slice %43 {offsets = [0, 0], sizes = [1, 32], strides = [1, 1]} : vector<1x512xf32> to vector<1x32xf32>
    %45 = vector.extract_strided_slice %43 {offsets = [0, 32], sizes = [1, 32], strides = [1, 1]} : vector<1x512xf32> to vector<1x32xf32>
    %46 = arith.addf %44, %45 : vector<1x32xf32>
    %47 = vector.extract_strided_slice %43 {offsets = [0, 64], sizes = [1, 32], strides = [1, 1]} : vector<1x512xf32> to vector<1x32xf32>
    %48 = arith.addf %46, %47 : vector<1x32xf32>
    %49 = vector.extract_strided_slice %43 {offsets = [0, 96], sizes = [1, 32], strides = [1, 1]} : vector<1x512xf32> to vector<1x32xf32>
    %50 = arith.addf %48, %49 : vector<1x32xf32>
    %51 = vector.extract_strided_slice %43 {offsets = [0, 128], sizes = [1, 32], strides = [1, 1]} : vector<1x512xf32> to vector<1x32xf32>
    %52 = arith.addf %50, %51 : vector<1x32xf32>
    %53 = vector.extract_strided_slice %43 {offsets = [0, 160], sizes = [1, 32], strides = [1, 1]} : vector<1x512xf32> to vector<1x32xf32>
    %54 = arith.addf %52, %53 : vector<1x32xf32>
    %55 = vector.extract_strided_slice %43 {offsets = [0, 192], sizes = [1, 32], strides = [1, 1]} : vector<1x512xf32> to vector<1x32xf32>
    %56 = arith.addf %54, %55 : vector<1x32xf32>
    %57 = vector.extract_strided_slice %43 {offsets = [0, 224], sizes = [1, 32], strides = [1, 1]} : vector<1x512xf32> to vector<1x32xf32>
    %58 = arith.addf %56, %57 : vector<1x32xf32>
    %59 = vector.extract_strided_slice %43 {offsets = [0, 256], sizes = [1, 32], strides = [1, 1]} : vector<1x512xf32> to vector<1x32xf32>
    %60 = arith.addf %58, %59 : vector<1x32xf32>
    %61 = vector.extract_strided_slice %43 {offsets = [0, 288], sizes = [1, 32], strides = [1, 1]} : vector<1x512xf32> to vector<1x32xf32>
    %62 = arith.addf %60, %61 : vector<1x32xf32>
    %63 = vector.extract_strided_slice %43 {offsets = [0, 320], sizes = [1, 32], strides = [1, 1]} : vector<1x512xf32> to vector<1x32xf32>
    %64 = arith.addf %62, %63 : vector<1x32xf32>
    %65 = vector.extract_strided_slice %43 {offsets = [0, 352], sizes = [1, 32], strides = [1, 1]} : vector<1x512xf32> to vector<1x32xf32>
    %66 = arith.addf %64, %65 : vector<1x32xf32>
    %67 = vector.extract_strided_slice %43 {offsets = [0, 384], sizes = [1, 32], strides = [1, 1]} : vector<1x512xf32> to vector<1x32xf32>
    %68 = arith.addf %66, %67 : vector<1x32xf32>
    %69 = vector.extract_strided_slice %43 {offsets = [0, 416], sizes = [1, 32], strides = [1, 1]} : vector<1x512xf32> to vector<1x32xf32>
    %70 = arith.addf %68, %69 : vector<1x32xf32>
    %71 = vector.extract_strided_slice %43 {offsets = [0, 448], sizes = [1, 32], strides = [1, 1]} : vector<1x512xf32> to vector<1x32xf32>
    %72 = arith.addf %70, %71 : vector<1x32xf32>
    %73 = vector.extract_strided_slice %43 {offsets = [0, 480], sizes = [1, 32], strides = [1, 1]} : vector<1x512xf32> to vector<1x32xf32>
    %74 = arith.addf %72, %73 : vector<1x32xf32>
    %cst_6 = arith.constant 3.200000e+01 : f32
    %75 = vector.broadcast %cst_6 : f32 to vector<1x32xf32>
    %76 = arith.divf %74, %75 : vector<1x32xf32>
    %c0_7 = arith.constant 0 : index
    %c0_8 = arith.constant 0 : index
    %77 = vector.load %arg3[%c0_7, %c0_8] : memref<1x32xf32, #tpu.memory_space<vmem>>, vector<1x32xf32>
    %cst_9 = arith.constant 9.99999974E-6 : f32
    %78 = vector.broadcast %cst_9 : f32 to vector<1x32xf32>
    %79 = arith.addf %76, %78 : vector<1x32xf32>
    %80 = math.rsqrt %79 : vector<1x32xf32>
    %81 = arith.mulf %77, %80 : vector<1x32xf32>
    %82 = tpu.concatenate %81, %81, %81, %81, %81, %81, %81, %81, %81, %81, %81, %81, %81, %81, %81, %81 in 1 : vector<1x32xf32>, vector<1x32xf32>, vector<1x32xf32>, vector<1x32xf32>, vector<1x32xf32>, vector<1x32xf32>, vector<1x32xf32>, vector<1x32xf32>, vector<1x32xf32>, vector<1x32xf32>, vector<1x32xf32>, vector<1x32xf32>, vector<1x32xf32>, vector<1x32xf32>, vector<1x32xf32>, vector<1x32xf32> -> vector<1x512xf32>
    %c0_10 = arith.constant 0 : index
    %c0_11 = arith.constant 0 : index
    %83 = vector.load %arg4[%c0_10, %c0_11] : memref<1x32xf32, #tpu.memory_space<vmem>>, vector<1x32xf32>
    %84 = tpu.concatenate %83, %83, %83, %83, %83, %83, %83, %83, %83, %83, %83, %83, %83, %83, %83, %83 in 1 : vector<1x32xf32>, vector<1x32xf32>, vector<1x32xf32>, vector<1x32xf32>, vector<1x32xf32>, vector<1x32xf32>, vector<1x32xf32>, vector<1x32xf32>, vector<1x32xf32>, vector<1x32xf32>, vector<1x32xf32>, vector<1x32xf32>, vector<1x32xf32>, vector<1x32xf32>, vector<1x32xf32>, vector<1x32xf32> -> vector<1x512xf32>
    %85 = vector.broadcast %82 : vector<1x512xf32> to vector<2x512xf32>
    %86 = arith.mulf %40, %85 : vector<2x512xf32>
    %87 = vector.broadcast %84 : vector<1x512xf32> to vector<2x512xf32>
    %88 = arith.addf %86, %87 : vector<2x512xf32>
    %cst_12 = arith.constant 0.000000e+00 : f32
    %89 = vector.broadcast %cst_12 : f32 to vector<2x512xf32>
    %90 = arith.maximumf %88, %89 : vector<2x512xf32>
    %c0_13 = arith.constant 0 : index
    %c0_14 = arith.constant 0 : index
    %91 = vector.load %arg5[%c0_13, %c0_14] : memref<2x512xf32, #tpu.memory_space<vmem>>, vector<2x512xf32>
    tpu.vector_store %arg5[%c0_13, %c0_14], %90 {strides = array<i32>} : memref<2x512xf32, #tpu.memory_space<vmem>>, vector<2x512xf32>,
    return
  }
  func.func @transform_0(%arg0: i32) -> (i32, i32) {
    %c0_i32 = arith.constant 0 : i32
    %c0_i32_0 = arith.constant 0 : i32
    %c0_i32_1 = arith.constant 0 : i32
    return %c0_i32, %c0_i32_0 : i32, i32
  }
  func.func @transform_1(%arg0: i32) -> (i32, i32) {
    %c0_i32 = arith.constant 0 : i32
    %c0_i32_0 = arith.constant 0 : i32
    %c0_i32_1 = arith.constant 0 : i32
    return %c0_i32, %c0_i32_0 : i32, i32
  }
  func.func @transform_2(%arg0: i32) -> (i32, i32) {
    %c0_i32 = arith.constant 0 : i32
    %c0_i32_0 = arith.constant 0 : i32
    %c0_i32_1 = arith.constant 0 : i32
    return %c0_i32, %c0_i32_0 : i32, i32
  }
  func.func @transform_3(%arg0: i32) -> (i32, i32) {
    %c0_i32 = arith.constant 0 : i32
    %c0_i32_0 = arith.constant 0 : i32
    %c0_i32_1 = arith.constant 0 : i32
    return %c0_i32, %c0_i32_0 : i32, i32
  }
  func.func @transform_4(%arg0: i32) -> (i32, i32) {
    %c0_i32 = arith.constant 0 : i32
    %c0_i32_0 = arith.constant 0 : i32
    %c0_i32_1 = arith.constant 0 : i32
    return %c0_i32, %c0_i32_0 : i32, i32
  }
}

module attributes {stable_mosaic.version = 11 : i64} {
  func.func @_matmul_bn_relu_kernel(%arg0: i32, %arg1: memref<32x288xbf16, #tpu.memory_space<vmem>>, %arg2: memref<288x128xbf16, #tpu.memory_space<vmem>>, %arg3: memref<1x16xf32, #tpu.memory_space<vmem>>, %arg4: memref<1x16xf32, #tpu.memory_space<vmem>>, %arg5: memref<32x128xf32, #tpu.memory_space<vmem>>) attributes {dimension_semantics = [#tpu.dimension_semantics<arbitrary>], iteration_bounds = array<i64: 1>, scalar_prefetch = 0 : i64, scratch_operands = 0 : i64, tpu.core_type = #tpu.core_type<tc>, window_params = [{pipeline_mode = #tpu.pipeline_mode<synchronous>, transform_indices = @transform_0, window_bounds = array<i64: 32, 288>}, {pipeline_mode = #tpu.pipeline_mode<synchronous>, transform_indices = @transform_1, window_bounds = array<i64: 288, 128>}, {pipeline_mode = #tpu.pipeline_mode<synchronous>, transform_indices = @transform_2, window_bounds = array<i64: 1, 16>}, {pipeline_mode = #tpu.pipeline_mode<synchronous>, transform_indices = @transform_3, window_bounds = array<i64: 1, 16>}, {pipeline_mode = #tpu.pipeline_mode<synchronous>, transform_indices = @transform_4, window_bounds = array<i64: 32, 128>}]} {
    %c0 = arith.constant 0 : index
    %c0_0 = arith.constant 0 : index
    %0 = vector.load %arg1[%c0, %c0_0] : memref<32x288xbf16, #tpu.memory_space<vmem>>, vector<32x288xbf16>
    %c0_1 = arith.constant 0 : index
    %c0_2 = arith.constant 0 : index
    %1 = vector.load %arg2[%c0_1, %c0_2] : memref<288x128xbf16, #tpu.memory_space<vmem>>, vector<288x128xbf16>
    %cst = arith.constant dense<0.000000e+00> : vector<32x128xf32>
    %2 = tpu.matmul %0, %1, %cst {dimension_numbers = #tpu.dot_dimension_numbers<[1], [0], [0], [1], [0, 0, 1, 1], [], []>} : vector<32x288xbf16>, vector<288x128xbf16>, vector<32x128xf32> -> vector<32x128xf32>
    %cst_3 = arith.constant dense<0.000000e+00> : vector<128xf32>
    %3 = vector.multi_reduction <add>, %2, %cst_3 [0] : vector<32x128xf32> to vector<128xf32>
    %4 = vector.shape_cast %3 : vector<128xf32> to vector<1x128xf32>
    %5 = vector.extract_strided_slice %4 {offsets = [0, 0], sizes = [1, 64], strides = [1, 1]} : vector<1x128xf32> to vector<1x64xf32>
    %6 = vector.extract_strided_slice %5 {offsets = [0, 0], sizes = [1, 16], strides = [1, 1]} : vector<1x64xf32> to vector<1x16xf32>
    %7 = vector.extract_strided_slice %5 {offsets = [0, 16], sizes = [1, 16], strides = [1, 1]} : vector<1x64xf32> to vector<1x16xf32>
    %8 = arith.addf %6, %7 : vector<1x16xf32>
    %9 = vector.extract_strided_slice %5 {offsets = [0, 32], sizes = [1, 16], strides = [1, 1]} : vector<1x64xf32> to vector<1x16xf32>
    %10 = arith.addf %8, %9 : vector<1x16xf32>
    %11 = vector.extract_strided_slice %5 {offsets = [0, 48], sizes = [1, 16], strides = [1, 1]} : vector<1x64xf32> to vector<1x16xf32>
    %12 = arith.addf %10, %11 : vector<1x16xf32>
    %cst_4 = arith.constant 1.280000e+02 : f32
    %13 = vector.broadcast %cst_4 : f32 to vector<1x16xf32>
    %14 = arith.divf %12, %13 : vector<1x16xf32>
    %15 = tpu.concatenate %14, %14, %14, %14 in 1 : vector<1x16xf32>, vector<1x16xf32>, vector<1x16xf32>, vector<1x16xf32> -> vector<1x64xf32>
    %cst_5 = arith.constant 0.000000e+00 : f32
    %16 = vector.broadcast %cst_5 : f32 to vector<1x64xf32>
    %17 = tpu.concatenate %15, %16 in 1 : vector<1x64xf32>, vector<1x64xf32> -> vector<1x128xf32>
    %18 = vector.broadcast %17 : vector<1x128xf32> to vector<32x128xf32>
    %19 = arith.subf %2, %18 : vector<32x128xf32>
    %20 = arith.mulf %19, %19 : vector<32x128xf32>
    %cst_6 = arith.constant dense<0.000000e+00> : vector<128xf32>
    %21 = vector.multi_reduction <add>, %20, %cst_6 [0] : vector<32x128xf32> to vector<128xf32>
    %22 = vector.shape_cast %21 : vector<128xf32> to vector<1x128xf32>
    %23 = vector.extract_strided_slice %22 {offsets = [0, 0], sizes = [1, 64], strides = [1, 1]} : vector<1x128xf32> to vector<1x64xf32>
    %24 = vector.extract_strided_slice %23 {offsets = [0, 0], sizes = [1, 16], strides = [1, 1]} : vector<1x64xf32> to vector<1x16xf32>
    %25 = vector.extract_strided_slice %23 {offsets = [0, 16], sizes = [1, 16], strides = [1, 1]} : vector<1x64xf32> to vector<1x16xf32>
    %26 = arith.addf %24, %25 : vector<1x16xf32>
    %27 = vector.extract_strided_slice %23 {offsets = [0, 32], sizes = [1, 16], strides = [1, 1]} : vector<1x64xf32> to vector<1x16xf32>
    %28 = arith.addf %26, %27 : vector<1x16xf32>
    %29 = vector.extract_strided_slice %23 {offsets = [0, 48], sizes = [1, 16], strides = [1, 1]} : vector<1x64xf32> to vector<1x16xf32>
    %30 = arith.addf %28, %29 : vector<1x16xf32>
    %cst_7 = arith.constant 1.280000e+02 : f32
    %31 = vector.broadcast %cst_7 : f32 to vector<1x16xf32>
    %32 = arith.divf %30, %31 : vector<1x16xf32>
    %c0_8 = arith.constant 0 : index
    %c0_9 = arith.constant 0 : index
    %33 = vector.load %arg3[%c0_8, %c0_9] : memref<1x16xf32, #tpu.memory_space<vmem>>, vector<1x16xf32>
    %cst_10 = arith.constant 9.99999974E-6 : f32
    %34 = vector.broadcast %cst_10 : f32 to vector<1x16xf32>
    %35 = arith.addf %32, %34 : vector<1x16xf32>
    %36 = math.rsqrt %35 : vector<1x16xf32>
    %37 = arith.mulf %33, %36 : vector<1x16xf32>
    %38 = tpu.concatenate %37, %37, %37, %37 in 1 : vector<1x16xf32>, vector<1x16xf32>, vector<1x16xf32>, vector<1x16xf32> -> vector<1x64xf32>
    %cst_11 = arith.constant 0.000000e+00 : f32
    %39 = vector.broadcast %cst_11 : f32 to vector<1x64xf32>
    %40 = tpu.concatenate %38, %39 in 1 : vector<1x64xf32>, vector<1x64xf32> -> vector<1x128xf32>
    %c0_12 = arith.constant 0 : index
    %c0_13 = arith.constant 0 : index
    %41 = vector.load %arg4[%c0_12, %c0_13] : memref<1x16xf32, #tpu.memory_space<vmem>>, vector<1x16xf32>
    %42 = tpu.concatenate %41, %41, %41, %41 in 1 : vector<1x16xf32>, vector<1x16xf32>, vector<1x16xf32>, vector<1x16xf32> -> vector<1x64xf32>
    %cst_14 = arith.constant 0.000000e+00 : f32
    %43 = vector.broadcast %cst_14 : f32 to vector<1x64xf32>
    %44 = tpu.concatenate %42, %43 in 1 : vector<1x64xf32>, vector<1x64xf32> -> vector<1x128xf32>
    %45 = vector.broadcast %40 : vector<1x128xf32> to vector<32x128xf32>
    %46 = arith.mulf %19, %45 : vector<32x128xf32>
    %47 = vector.broadcast %44 : vector<1x128xf32> to vector<32x128xf32>
    %48 = arith.addf %46, %47 : vector<32x128xf32>
    %cst_15 = arith.constant 0.000000e+00 : f32
    %49 = vector.broadcast %cst_15 : f32 to vector<32x128xf32>
    %50 = arith.maximumf %48, %49 : vector<32x128xf32>
    %c0_16 = arith.constant 0 : index
    %c0_17 = arith.constant 0 : index
    %51 = vector.load %arg5[%c0_16, %c0_17] : memref<32x128xf32, #tpu.memory_space<vmem>>, vector<32x128xf32>
    tpu.vector_store %arg5[%c0_16, %c0_17], %50 {strides = array<i32>} : memref<32x128xf32, #tpu.memory_space<vmem>>, vector<32x128xf32>,
    return
  }
  func.func @transform_0(%arg0: i32) -> (i32, i32) {
    %c0_i32 = arith.constant 0 : i32
    %c0_i32_0 = arith.constant 0 : i32
    %c0_i32_1 = arith.constant 0 : i32
    return %c0_i32, %c0_i32_0 : i32, i32
  }
  func.func @transform_1(%arg0: i32) -> (i32, i32) {
    %c0_i32 = arith.constant 0 : i32
    %c0_i32_0 = arith.constant 0 : i32
    %c0_i32_1 = arith.constant 0 : i32
    return %c0_i32, %c0_i32_0 : i32, i32
  }
  func.func @transform_2(%arg0: i32) -> (i32, i32) {
    %c0_i32 = arith.constant 0 : i32
    %c0_i32_0 = arith.constant 0 : i32
    %c0_i32_1 = arith.constant 0 : i32
    return %c0_i32, %c0_i32_0 : i32, i32
  }
  func.func @transform_3(%arg0: i32) -> (i32, i32) {
    %c0_i32 = arith.constant 0 : i32
    %c0_i32_0 = arith.constant 0 : i32
    %c0_i32_1 = arith.constant 0 : i32
    return %c0_i32, %c0_i32_0 : i32, i32
  }
  func.func @transform_4(%arg0: i32) -> (i32, i32) {
    %c0_i32 = arith.constant 0 : i32
    %c0_i32_0 = arith.constant 0 : i32
    %c0_i32_1 = arith.constant 0 : i32
    return %c0_i32, %c0_i32_0 : i32, i32
  }
}

module attributes {stable_mosaic.version = 11 : i64} {
  func.func @_matmul_bn_relu_kernel(%arg0: i32, %arg1: memref<128x144xbf16, #tpu.memory_space<vmem>>, %arg2: memref<144x128xbf16, #tpu.memory_space<vmem>>, %arg3: memref<1x8xf32, #tpu.memory_space<vmem>>, %arg4: memref<1x8xf32, #tpu.memory_space<vmem>>, %arg5: memref<128x128xf32, #tpu.memory_space<vmem>>) attributes {dimension_semantics = [#tpu.dimension_semantics<arbitrary>], iteration_bounds = array<i64: 1>, scalar_prefetch = 0 : i64, scratch_operands = 0 : i64, tpu.core_type = #tpu.core_type<tc>, window_params = [{pipeline_mode = #tpu.pipeline_mode<synchronous>, transform_indices = @transform_0, window_bounds = array<i64: 128, 144>}, {pipeline_mode = #tpu.pipeline_mode<synchronous>, transform_indices = @transform_1, window_bounds = array<i64: 144, 128>}, {pipeline_mode = #tpu.pipeline_mode<synchronous>, transform_indices = @transform_2, window_bounds = array<i64: 1, 8>}, {pipeline_mode = #tpu.pipeline_mode<synchronous>, transform_indices = @transform_3, window_bounds = array<i64: 1, 8>}, {pipeline_mode = #tpu.pipeline_mode<synchronous>, transform_indices = @transform_4, window_bounds = array<i64: 128, 128>}]} {
    %c0 = arith.constant 0 : index
    %c0_0 = arith.constant 0 : index
    %0 = vector.load %arg1[%c0, %c0_0] : memref<128x144xbf16, #tpu.memory_space<vmem>>, vector<128x144xbf16>
    %c0_1 = arith.constant 0 : index
    %c0_2 = arith.constant 0 : index
    %1 = vector.load %arg2[%c0_1, %c0_2] : memref<144x128xbf16, #tpu.memory_space<vmem>>, vector<144x128xbf16>
    %cst = arith.constant dense<0.000000e+00> : vector<128x128xf32>
    %2 = tpu.matmul %0, %1, %cst {dimension_numbers = #tpu.dot_dimension_numbers<[1], [0], [0], [1], [0, 0, 1, 1], [], []>} : vector<128x144xbf16>, vector<144x128xbf16>, vector<128x128xf32> -> vector<128x128xf32>
    %cst_3 = arith.constant dense<0.000000e+00> : vector<128xf32>
    %3 = vector.multi_reduction <add>, %2, %cst_3 [0] : vector<128x128xf32> to vector<128xf32>
    %4 = vector.shape_cast %3 : vector<128xf32> to vector<1x128xf32>
    %5 = vector.extract_strided_slice %4 {offsets = [0, 0], sizes = [1, 32], strides = [1, 1]} : vector<1x128xf32> to vector<1x32xf32>
    %6 = vector.extract_strided_slice %5 {offsets = [0, 0], sizes = [1, 8], strides = [1, 1]} : vector<1x32xf32> to vector<1x8xf32>
    %7 = vector.extract_strided_slice %5 {offsets = [0, 8], sizes = [1, 8], strides = [1, 1]} : vector<1x32xf32> to vector<1x8xf32>
    %8 = arith.addf %6, %7 : vector<1x8xf32>
    %9 = vector.extract_strided_slice %5 {offsets = [0, 16], sizes = [1, 8], strides = [1, 1]} : vector<1x32xf32> to vector<1x8xf32>
    %10 = arith.addf %8, %9 : vector<1x8xf32>
    %11 = vector.extract_strided_slice %5 {offsets = [0, 24], sizes = [1, 8], strides = [1, 1]} : vector<1x32xf32> to vector<1x8xf32>
    %12 = arith.addf %10, %11 : vector<1x8xf32>
    %cst_4 = arith.constant 5.120000e+02 : f32
    %13 = vector.broadcast %cst_4 : f32 to vector<1x8xf32>
    %14 = arith.divf %12, %13 : vector<1x8xf32>
    %15 = tpu.concatenate %14, %14, %14, %14 in 1 : vector<1x8xf32>, vector<1x8xf32>, vector<1x8xf32>, vector<1x8xf32> -> vector<1x32xf32>
    %cst_5 = arith.constant 0.000000e+00 : f32
    %16 = vector.broadcast %cst_5 : f32 to vector<1x96xf32>
    %17 = tpu.concatenate %15, %16 in 1 : vector<1x32xf32>, vector<1x96xf32> -> vector<1x128xf32>
    %18 = vector.broadcast %17 : vector<1x128xf32> to vector<128x128xf32>
    %19 = arith.subf %2, %18 : vector<128x128xf32>
    %20 = arith.mulf %19, %19 : vector<128x128xf32>
    %cst_6 = arith.constant dense<0.000000e+00> : vector<128xf32>
    %21 = vector.multi_reduction <add>, %20, %cst_6 [0] : vector<128x128xf32> to vector<128xf32>
    %22 = vector.shape_cast %21 : vector<128xf32> to vector<1x128xf32>
    %23 = vector.extract_strided_slice %22 {offsets = [0, 0], sizes = [1, 32], strides = [1, 1]} : vector<1x128xf32> to vector<1x32xf32>
    %24 = vector.extract_strided_slice %23 {offsets = [0, 0], sizes = [1, 8], strides = [1, 1]} : vector<1x32xf32> to vector<1x8xf32>
    %25 = vector.extract_strided_slice %23 {offsets = [0, 8], sizes = [1, 8], strides = [1, 1]} : vector<1x32xf32> to vector<1x8xf32>
    %26 = arith.addf %24, %25 : vector<1x8xf32>
    %27 = vector.extract_strided_slice %23 {offsets = [0, 16], sizes = [1, 8], strides = [1, 1]} : vector<1x32xf32> to vector<1x8xf32>
    %28 = arith.addf %26, %27 : vector<1x8xf32>
    %29 = vector.extract_strided_slice %23 {offsets = [0, 24], sizes = [1, 8], strides = [1, 1]} : vector<1x32xf32> to vector<1x8xf32>
    %30 = arith.addf %28, %29 : vector<1x8xf32>
    %cst_7 = arith.constant 5.120000e+02 : f32
    %31 = vector.broadcast %cst_7 : f32 to vector<1x8xf32>
    %32 = arith.divf %30, %31 : vector<1x8xf32>
    %c0_8 = arith.constant 0 : index
    %c0_9 = arith.constant 0 : index
    %33 = vector.load %arg3[%c0_8, %c0_9] : memref<1x8xf32, #tpu.memory_space<vmem>>, vector<1x8xf32>
    %cst_10 = arith.constant 9.99999974E-6 : f32
    %34 = vector.broadcast %cst_10 : f32 to vector<1x8xf32>
    %35 = arith.addf %32, %34 : vector<1x8xf32>
    %36 = math.rsqrt %35 : vector<1x8xf32>
    %37 = arith.mulf %33, %36 : vector<1x8xf32>
    %38 = tpu.concatenate %37, %37, %37, %37 in 1 : vector<1x8xf32>, vector<1x8xf32>, vector<1x8xf32>, vector<1x8xf32> -> vector<1x32xf32>
    %cst_11 = arith.constant 0.000000e+00 : f32
    %39 = vector.broadcast %cst_11 : f32 to vector<1x96xf32>
    %40 = tpu.concatenate %38, %39 in 1 : vector<1x32xf32>, vector<1x96xf32> -> vector<1x128xf32>
    %c0_12 = arith.constant 0 : index
    %c0_13 = arith.constant 0 : index
    %41 = vector.load %arg4[%c0_12, %c0_13] : memref<1x8xf32, #tpu.memory_space<vmem>>, vector<1x8xf32>
    %42 = tpu.concatenate %41, %41, %41, %41 in 1 : vector<1x8xf32>, vector<1x8xf32>, vector<1x8xf32>, vector<1x8xf32> -> vector<1x32xf32>
    %cst_14 = arith.constant 0.000000e+00 : f32
    %43 = vector.broadcast %cst_14 : f32 to vector<1x96xf32>
    %44 = tpu.concatenate %42, %43 in 1 : vector<1x32xf32>, vector<1x96xf32> -> vector<1x128xf32>
    %45 = vector.broadcast %40 : vector<1x128xf32> to vector<128x128xf32>
    %46 = arith.mulf %19, %45 : vector<128x128xf32>
    %47 = vector.broadcast %44 : vector<1x128xf32> to vector<128x128xf32>
    %48 = arith.addf %46, %47 : vector<128x128xf32>
    %cst_15 = arith.constant 0.000000e+00 : f32
    %49 = vector.broadcast %cst_15 : f32 to vector<128x128xf32>
    %50 = arith.maximumf %48, %49 : vector<128x128xf32>
    %c0_16 = arith.constant 0 : index
    %c0_17 = arith.constant 0 : index
    %51 = vector.load %arg5[%c0_16, %c0_17] : memref<128x128xf32, #tpu.memory_space<vmem>>, vector<128x128xf32>
    tpu.vector_store %arg5[%c0_16, %c0_17], %50 {strides = array<i32>} : memref<128x128xf32, #tpu.memory_space<vmem>>, vector<128x128xf32>,
    return
  }
  func.func @transform_0(%arg0: i32) -> (i32, i32) {
    %c0_i32 = arith.constant 0 : i32
    %c0_i32_0 = arith.constant 0 : i32
    %c0_i32_1 = arith.constant 0 : i32
    return %c0_i32, %c0_i32_0 : i32, i32
  }
  func.func @transform_1(%arg0: i32) -> (i32, i32) {
    %c0_i32 = arith.constant 0 : i32
    %c0_i32_0 = arith.constant 0 : i32
    %c0_i32_1 = arith.constant 0 : i32
    return %c0_i32, %c0_i32_0 : i32, i32
  }
  func.func @transform_2(%arg0: i32) -> (i32, i32) {
    %c0_i32 = arith.constant 0 : i32
    %c0_i32_0 = arith.constant 0 : i32
    %c0_i32_1 = arith.constant 0 : i32
    return %c0_i32, %c0_i32_0 : i32, i32
  }
  func.func @transform_3(%arg0: i32) -> (i32, i32) {
    %c0_i32 = arith.constant 0 : i32
    %c0_i32_0 = arith.constant 0 : i32
    %c0_i32_1 = arith.constant 0 : i32
    return %c0_i32, %c0_i32_0 : i32, i32
  }
  func.func @transform_4(%arg0: i32) -> (i32, i32) {
    %c0_i32 = arith.constant 0 : i32
    %c0_i32_0 = arith.constant 0 : i32
    %c0_i32_1 = arith.constant 0 : i32
    return %c0_i32, %c0_i32_0 : i32, i32
  }
}

module attributes {stable_mosaic.version = 11 : i64} {
  func.func @_matmul_bn_relu_kernel(%arg0: i32, %arg1: memref<512x72xbf16, #tpu.memory_space<vmem>>, %arg2: memref<72x128xbf16, #tpu.memory_space<vmem>>, %arg3: memref<1x4xf32, #tpu.memory_space<vmem>>, %arg4: memref<1x4xf32, #tpu.memory_space<vmem>>, %arg5: memref<512x128xf32, #tpu.memory_space<vmem>>) attributes {dimension_semantics = [#tpu.dimension_semantics<arbitrary>], iteration_bounds = array<i64: 1>, scalar_prefetch = 0 : i64, scratch_operands = 0 : i64, tpu.core_type = #tpu.core_type<tc>, window_params = [{pipeline_mode = #tpu.pipeline_mode<synchronous>, transform_indices = @transform_0, window_bounds = array<i64: 512, 72>}, {pipeline_mode = #tpu.pipeline_mode<synchronous>, transform_indices = @transform_1, window_bounds = array<i64: 72, 128>}, {pipeline_mode = #tpu.pipeline_mode<synchronous>, transform_indices = @transform_2, window_bounds = array<i64: 1, 4>}, {pipeline_mode = #tpu.pipeline_mode<synchronous>, transform_indices = @transform_3, window_bounds = array<i64: 1, 4>}, {pipeline_mode = #tpu.pipeline_mode<synchronous>, transform_indices = @transform_4, window_bounds = array<i64: 512, 128>}]} {
    %c0 = arith.constant 0 : index
    %c0_0 = arith.constant 0 : index
    %0 = vector.load %arg1[%c0, %c0_0] : memref<512x72xbf16, #tpu.memory_space<vmem>>, vector<512x72xbf16>
    %c0_1 = arith.constant 0 : index
    %c0_2 = arith.constant 0 : index
    %1 = vector.load %arg2[%c0_1, %c0_2] : memref<72x128xbf16, #tpu.memory_space<vmem>>, vector<72x128xbf16>
    %cst = arith.constant dense<0.000000e+00> : vector<512x128xf32>
    %2 = tpu.matmul %0, %1, %cst {dimension_numbers = #tpu.dot_dimension_numbers<[1], [0], [0], [1], [0, 0, 1, 1], [], []>} : vector<512x72xbf16>, vector<72x128xbf16>, vector<512x128xf32> -> vector<512x128xf32>
    %cst_3 = arith.constant dense<0.000000e+00> : vector<128xf32>
    %3 = vector.multi_reduction <add>, %2, %cst_3 [0] : vector<512x128xf32> to vector<128xf32>
    %4 = vector.shape_cast %3 : vector<128xf32> to vector<1x128xf32>
    %5 = vector.extract_strided_slice %4 {offsets = [0, 0], sizes = [1, 16], strides = [1, 1]} : vector<1x128xf32> to vector<1x16xf32>
    %6 = vector.extract_strided_slice %5 {offsets = [0, 0], sizes = [1, 4], strides = [1, 1]} : vector<1x16xf32> to vector<1x4xf32>
    %7 = vector.extract_strided_slice %5 {offsets = [0, 4], sizes = [1, 4], strides = [1, 1]} : vector<1x16xf32> to vector<1x4xf32>
    %8 = arith.addf %6, %7 : vector<1x4xf32>
    %9 = vector.extract_strided_slice %5 {offsets = [0, 8], sizes = [1, 4], strides = [1, 1]} : vector<1x16xf32> to vector<1x4xf32>
    %10 = arith.addf %8, %9 : vector<1x4xf32>
    %11 = vector.extract_strided_slice %5 {offsets = [0, 12], sizes = [1, 4], strides = [1, 1]} : vector<1x16xf32> to vector<1x4xf32>
    %12 = arith.addf %10, %11 : vector<1x4xf32>
    %cst_4 = arith.constant 2.048000e+03 : f32
    %13 = vector.broadcast %cst_4 : f32 to vector<1x4xf32>
    %14 = arith.divf %12, %13 : vector<1x4xf32>
    %15 = tpu.concatenate %14, %14, %14, %14 in 1 : vector<1x4xf32>, vector<1x4xf32>, vector<1x4xf32>, vector<1x4xf32> -> vector<1x16xf32>
    %cst_5 = arith.constant 0.000000e+00 : f32
    %16 = vector.broadcast %cst_5 : f32 to vector<1x112xf32>
    %17 = tpu.concatenate %15, %16 in 1 : vector<1x16xf32>, vector<1x112xf32> -> vector<1x128xf32>
    %18 = vector.broadcast %17 : vector<1x128xf32> to vector<512x128xf32>
    %19 = arith.subf %2, %18 : vector<512x128xf32>
    %20 = arith.mulf %19, %19 : vector<512x128xf32>
    %cst_6 = arith.constant dense<0.000000e+00> : vector<128xf32>
    %21 = vector.multi_reduction <add>, %20, %cst_6 [0] : vector<512x128xf32> to vector<128xf32>
    %22 = vector.shape_cast %21 : vector<128xf32> to vector<1x128xf32>
    %23 = vector.extract_strided_slice %22 {offsets = [0, 0], sizes = [1, 16], strides = [1, 1]} : vector<1x128xf32> to vector<1x16xf32>
    %24 = vector.extract_strided_slice %23 {offsets = [0, 0], sizes = [1, 4], strides = [1, 1]} : vector<1x16xf32> to vector<1x4xf32>
    %25 = vector.extract_strided_slice %23 {offsets = [0, 4], sizes = [1, 4], strides = [1, 1]} : vector<1x16xf32> to vector<1x4xf32>
    %26 = arith.addf %24, %25 : vector<1x4xf32>
    %27 = vector.extract_strided_slice %23 {offsets = [0, 8], sizes = [1, 4], strides = [1, 1]} : vector<1x16xf32> to vector<1x4xf32>
    %28 = arith.addf %26, %27 : vector<1x4xf32>
    %29 = vector.extract_strided_slice %23 {offsets = [0, 12], sizes = [1, 4], strides = [1, 1]} : vector<1x16xf32> to vector<1x4xf32>
    %30 = arith.addf %28, %29 : vector<1x4xf32>
    %cst_7 = arith.constant 2.048000e+03 : f32
    %31 = vector.broadcast %cst_7 : f32 to vector<1x4xf32>
    %32 = arith.divf %30, %31 : vector<1x4xf32>
    %c0_8 = arith.constant 0 : index
    %c0_9 = arith.constant 0 : index
    %33 = vector.load %arg3[%c0_8, %c0_9] : memref<1x4xf32, #tpu.memory_space<vmem>>, vector<1x4xf32>
    %cst_10 = arith.constant 9.99999974E-6 : f32
    %34 = vector.broadcast %cst_10 : f32 to vector<1x4xf32>
    %35 = arith.addf %32, %34 : vector<1x4xf32>
    %36 = math.rsqrt %35 : vector<1x4xf32>
    %37 = arith.mulf %33, %36 : vector<1x4xf32>
    %38 = tpu.concatenate %37, %37, %37, %37 in 1 : vector<1x4xf32>, vector<1x4xf32>, vector<1x4xf32>, vector<1x4xf32> -> vector<1x16xf32>
    %cst_11 = arith.constant 0.000000e+00 : f32
    %39 = vector.broadcast %cst_11 : f32 to vector<1x112xf32>
    %40 = tpu.concatenate %38, %39 in 1 : vector<1x16xf32>, vector<1x112xf32> -> vector<1x128xf32>
    %c0_12 = arith.constant 0 : index
    %c0_13 = arith.constant 0 : index
    %41 = vector.load %arg4[%c0_12, %c0_13] : memref<1x4xf32, #tpu.memory_space<vmem>>, vector<1x4xf32>
    %42 = tpu.concatenate %41, %41, %41, %41 in 1 : vector<1x4xf32>, vector<1x4xf32>, vector<1x4xf32>, vector<1x4xf32> -> vector<1x16xf32>
    %cst_14 = arith.constant 0.000000e+00 : f32
    %43 = vector.broadcast %cst_14 : f32 to vector<1x112xf32>
    %44 = tpu.concatenate %42, %43 in 1 : vector<1x16xf32>, vector<1x112xf32> -> vector<1x128xf32>
    %45 = vector.broadcast %40 : vector<1x128xf32> to vector<512x128xf32>
    %46 = arith.mulf %19, %45 : vector<512x128xf32>
    %47 = vector.broadcast %44 : vector<1x128xf32> to vector<512x128xf32>
    %48 = arith.addf %46, %47 : vector<512x128xf32>
    %cst_15 = arith.constant 0.000000e+00 : f32
    %49 = vector.broadcast %cst_15 : f32 to vector<512x128xf32>
    %50 = arith.maximumf %48, %49 : vector<512x128xf32>
    %c0_16 = arith.constant 0 : index
    %c0_17 = arith.constant 0 : index
    %51 = vector.load %arg5[%c0_16, %c0_17] : memref<512x128xf32, #tpu.memory_space<vmem>>, vector<512x128xf32>
    tpu.vector_store %arg5[%c0_16, %c0_17], %50 {strides = array<i32>} : memref<512x128xf32, #tpu.memory_space<vmem>>, vector<512x128xf32>,
    return
  }
  func.func @transform_0(%arg0: i32) -> (i32, i32) {
    %c0_i32 = arith.constant 0 : i32
    %c0_i32_0 = arith.constant 0 : i32
    %c0_i32_1 = arith.constant 0 : i32
    return %c0_i32, %c0_i32_0 : i32, i32
  }
  func.func @transform_1(%arg0: i32) -> (i32, i32) {
    %c0_i32 = arith.constant 0 : i32
    %c0_i32_0 = arith.constant 0 : i32
    %c0_i32_1 = arith.constant 0 : i32
    return %c0_i32, %c0_i32_0 : i32, i32
  }
  func.func @transform_2(%arg0: i32) -> (i32, i32) {
    %c0_i32 = arith.constant 0 : i32
    %c0_i32_0 = arith.constant 0 : i32
    %c0_i32_1 = arith.constant 0 : i32
    return %c0_i32, %c0_i32_0 : i32, i32
  }
  func.func @transform_3(%arg0: i32) -> (i32, i32) {
    %c0_i32 = arith.constant 0 : i32
    %c0_i32_0 = arith.constant 0 : i32
    %c0_i32_1 = arith.constant 0 : i32
    return %c0_i32, %c0_i32_0 : i32, i32
  }
  func.func @transform_4(%arg0: i32) -> (i32, i32) {
    %c0_i32 = arith.constant 0 : i32
    %c0_i32_0 = arith.constant 0 : i32
    %c0_i32_1 = arith.constant 0 : i32
    return %c0_i32, %c0_i32_0 : i32, i32
  }
}

module attributes {stable_mosaic.version = 11 : i64} {
  func.func @_matmul_tanh_kernel(%arg0: i32, %arg1: memref<1024x36xbf16, #tpu.memory_space<vmem>>, %arg2: memref<36x128xbf16, #tpu.memory_space<vmem>>, %arg3: memref<1024x128xf32, #tpu.memory_space<vmem>>) attributes {dimension_semantics = [#tpu.dimension_semantics<parallel>], iteration_bounds = array<i64: 2>, scalar_prefetch = 0 : i64, scratch_operands = 0 : i64, tpu.core_type = #tpu.core_type<tc>, window_params = [{transform_indices = @transform_0, window_bounds = array<i64: 1024, 36>}, {pipeline_mode = #tpu.pipeline_mode<synchronous>, transform_indices = @transform_1, window_bounds = array<i64: 36, 128>}, {transform_indices = @transform_2, window_bounds = array<i64: 1024, 128>}]} {
    %c0 = arith.constant 0 : index
    %c0_0 = arith.constant 0 : index
    %0 = vector.load %arg1[%c0, %c0_0] : memref<1024x36xbf16, #tpu.memory_space<vmem>>, vector<1024x36xbf16>
    %c0_1 = arith.constant 0 : index
    %c0_2 = arith.constant 0 : index
    %1 = vector.load %arg2[%c0_1, %c0_2] : memref<36x128xbf16, #tpu.memory_space<vmem>>, vector<36x128xbf16>
    %cst = arith.constant dense<0.000000e+00> : vector<1024x128xf32>
    %2 = tpu.matmul %0, %1, %cst {dimension_numbers = #tpu.dot_dimension_numbers<[1], [0], [0], [1], [0, 0, 1, 1], [], []>} : vector<1024x36xbf16>, vector<36x128xbf16>, vector<1024x128xf32> -> vector<1024x128xf32>
    %3 = math.tanh %2 : vector<1024x128xf32>
    %c0_3 = arith.constant 0 : index
    %c0_4 = arith.constant 0 : index
    %4 = vector.load %arg3[%c0_3, %c0_4] : memref<1024x128xf32, #tpu.memory_space<vmem>>, vector<1024x128xf32>
    tpu.vector_store %arg3[%c0_3, %c0_4], %3 {strides = array<i32>} : memref<1024x128xf32, #tpu.memory_space<vmem>>, vector<1024x128xf32>,
    return
  }
  func.func @transform_0(%arg0: i32) -> (i32, i32) {
    %c0_i32 = arith.constant 0 : i32
    %c0_i32_0 = arith.constant 0 : i32
    return %arg0, %c0_i32 : i32, i32
  }
  func.func @transform_1(%arg0: i32) -> (i32, i32) {
    %c0_i32 = arith.constant 0 : i32
    %c0_i32_0 = arith.constant 0 : i32
    %c0_i32_1 = arith.constant 0 : i32
    return %c0_i32, %c0_i32_0 : i32, i32
  }
  func.func @transform_2(%arg0: i32) -> (i32, i32) {
    %c0_i32 = arith.constant 0 : i32
    %c0_i32_0 = arith.constant 0 : i32
    return %arg0, %c0_i32 : i32, i32
  }
}

</mosaic_0001>

<bundles_post_ra>
// kernel: _lambda_.5
= control target key start
LH: loop header
LB: loop body
LE: loop exit
PB: predicated region body
PF: predicated region fallthrough
CT: control target
= control target key end

     0   :  { %9 = vsyncpa [#allocation3], 0  ;;  %s715_s0 = inlined_call_operand.vmem [shape: bf16[2,8], index: 0, kind: input, shape index: {}]   ;;  %s716_s1 = inlined_call_operand.hbm [shape: bf16[8,512], index: 1, kind: input, shape index: {}]   ;;  %s717_s2 = inlined_call_operand.hbm [shape: f32[1,32], index: 2, kind: input, shape index: {}]   ;;  %s718_s3 = inlined_call_operand.hbm [shape: f32[1,32], index: 3, kind: input, shape index: {}]   ;;  %s719_s4 = inlined_call_operand.vmem [shape: f32[2,512], index: 4, kind: output, shape index: {}]  }
   0x1   :  { %10 = vsyncpa [#allocation5], 0  ;;  %s543_s15 = smov [#allocation4]   ;;  %s544_s17 = smov [#allocation2]  }
   0x2   :  { %s29_s16 = sshll.u32 %s543_s15, 4  ;;  %s19_s18 = sshll.u32 %s544_s17, 4  ;;  %s30_s16 = int_to_ptr.vmem [resolvable:$true] %s29_s16  ;;  %s20_s18 = int_to_ptr.vmem [resolvable:$true] %s19_s18 }
   0x3   :  { %s473_s21 = scalar_lea.hbm %s717_s2, 16 }
   0x4   :  { %p474_p0 = scmp.ne.s32.totalorder %s717_s2, %s473_s21  ;;  %p477_p1 = scmp.lt.u32.totalorder %s473_s21, %s717_s2 }
   0x6   :  { %p479_p2 = pnand %p477_p1, %p474_p0 }
   0x8   :  { %482 = shalt.err (!%p479_p2)
}
   0x9   :  { %s483_s26 = scalar_lea.vmem %s30_s16, 16  ;;  %s487_s27 = scalar_lea.vmem %s30_s16, 32 }
   0xa   :  { %p484_p3 = scmp.ne.s32.totalorder %s30_s16, %s483_s26  ;;  %p488_p4 = scmp.lt.s32.totalorder %s30_s16, %s30_s16 }
   0xb   :  { %p489_p5 = scmp.lt.s32.totalorder %s487_s27, %s483_s26 }
   0xd   :  { %p490_p6 = por %p489_p5, %p488_p4 }
   0xf   :  { %p491_p7 = pnand %p490_p6, %p484_p3 }
  0x11   :  { %494 = shalt.err (!%p491_p7)
}
  0x12   :  { %32 = dma.hbm_to_vmem [thread:$0]  %s717_s2, 16, %s30_s16, [#allocation5]  }
  0x13   :  { %s495_s6 = scalar_lea.hbm %s716_s1, 256 }
  0x14   :  { %p496_p8 = scmp.ne.s32.totalorder %s716_s1, %s495_s6  ;;  %p499_p9 = scmp.lt.u32.totalorder %s495_s6, %s716_s1 }
  0x16   :  { %p501_p10 = pnand %p499_p9, %p496_p8 }
  0x18   :  { %504 = shalt.err (!%p501_p10)
}
  0x19   :  { %s505_s11 = scalar_lea.vmem %s20_s18, 256  ;;  %p510_p12 = scmp.lt.s32.totalorder %s20_s18, %s20_s18 }
  0x1a   :  { %p506_p11 = scmp.ne.s32.totalorder %s20_s18, %s505_s11  ;;  %p511_p13 = scmp.lt.s32.totalorder %s505_s11, %s505_s11 }
  0x1c   :  { %p512_p0 = por %p511_p13, %p510_p12 }
  0x1e   :  { %p513_p1 = pnand %p512_p0, %p506_p11 }
  0x20   :  { %516 = shalt.err (!%p513_p1)
}
  0x21   :  { %22 = dma.hbm_to_vmem [thread:$0]  %s716_s1, 256, %s20_s18, [#allocation3]  }
  0x22   :  { %s545_s13 = smov [#allocation6]   ;;  %s517_s17 = scalar_lea.hbm %s718_s3, 16 }
  0x23   :  { %s39_s14 = sshll.u32 %s545_s13, 4  ;;  %p518_p2 = scmp.ne.s32.totalorder %s718_s3, %s517_s17  ;;  %s40_s14 = int_to_ptr.vmem [resolvable:$true] %s39_s14 }
  0x24   :  { %p521_p3 = scmp.lt.u32.totalorder %s517_s17, %s718_s3 }
  0x26   :  { %p523_p4 = pnand %p521_p3, %p518_p2 }
  0x28   :  { %526 = shalt.err (!%p523_p4)
}
  0x29   :  { %s527_s23 = scalar_lea.vmem %s40_s14, 16  ;;  %s531_s1 = scalar_lea.vmem %s40_s14, 32 }
  0x2a   :  { %p528_p5 = scmp.ne.s32.totalorder %s40_s14, %s527_s23  ;;  %p532_p6 = scmp.lt.s32.totalorder %s40_s14, %s40_s14 }
  0x2b   :  { %p533_p7 = scmp.lt.s32.totalorder %s531_s1, %s527_s23 }
  0x2d   :  { %p534_p8 = por %p533_p7, %p532_p6 }
  0x2f   :  { %p535_p9 = pnand %p534_p8, %p528_p5 }
  0x31   :  { %538 = shalt.err (!%p535_p9)
}
  0x32   :  { %42 = dma.hbm_to_vmem [thread:$0]  %s718_s3, 16, %s40_s14, [#allocation5]  }
  0x33   :  { %539 = dma.done.wait [#allocation3], 256  }
  0x34   :  { %540 = vsyncadd [#allocation3], 4294967040 }
  0x35   :  { %541 = dma.done.wait [#allocation5], 32  }
  0x36   :  { %542 = vsyncadd [#allocation5], 4294967264  ;;  %v546_v0 = vmov 0   ;;  %v54_v1 = vld [vmem:[#allocation2] sm:$0xff]  ;;  %vm70_vm0 = vcmask 1043456   ;;  %v55_v2 = vld [vmem:[#allocation2 + $0x8] sm:$0xff] }
  0x37   :  { %115 = vmatprep.mubr.bf16.mxu0 %v546_v0  ;;  %156 = vmatprep.mubr.bf16.mxu1 %v546_v0  ;;  %v452_v3 = vcombine.high %v54_v1, %v54_v1  ;;  %v451_v4 = vcombine.low %v54_v1, %v54_v1  ;;  %v454_v5 = vcombine.high %v55_v2, %v55_v2  ;;  %v53_v9 = vld [vmem:[%s715_s0] sm:$0x1]  ;;  %vm66_vm1 = vcmask 64512   ;;  %s547_s0 = smov 32   ;;  %s548_s26 = smov 96  }
  0x38   :  { %v453_v6 = vcombine.low %v55_v2, %v55_v2  ;;  %vm165_vm2 = vcmask 1041408   ;;  %s549_s27 = smov 64   ;;  %vm261_vm3 = vcmask 261120   ;;  %vm263_vm4 = vcmask 523264  }
  0x39   :  { %455 = vmatprep.subr.msk.bf16.mxu0 %vm70_vm0, %v452_v3  ;;  %v72_v7 = vsel %vm70_vm0, %v451_v4, 0  ;;  %457 = vmatprep.subr.msk.bf16.mxu1 %vm70_vm0, %v454_v5  ;;  %vm265_vm5 = vcmask 785408  }
  0x3a   :  { %v78_v8 = vsel %vm70_vm0, %v453_v6, 0  ;;  %84 = vmatpush1.bf16.msra.mxu0 %v72_v7 }
  0x3b   :  { %125 = vmatpush1.bf16.msra.mxu1 %v78_v8 }
  0x3d   :  { %456 = vmatmul.mubr.msk.bf16.vlgmr.msra.gmra.mrb[0].mxu0 %vm66_vm1, %v53_v9 }
  0x3e   :  { %458 = vmatmul.mubr.msk.bf16.vlgmr.msra.gmra.mrb[0].mxu1 %vm66_vm1, %v53_v9 }
 0x110   :  { %v615_v10 = vpop.f32.mrb[0].mxu0 }
 0x111   :  { %v617_v11 = vpop.f32.mrb[0].mxu1  ;;  %v166_v12 = vsel %vm165_vm2, %v615_v10, 0.0  ;;  %v621_v13 = vpop.f32.mrb[1].mxu0 }
 0x112   :  { %v180_v14 = vsel %vm165_vm2, %v617_v11, 0.0  ;;  %v625_v15 = vpop.f32.mrb[1].mxu1  ;;  %v167_v16 = vrot.slane %v166_v12, 4  ;;  %v173_v17 = vsel %vm165_vm2, %v621_v13, 0.0  ;;  %v121_v18 = vpop.f32.mrb[2].mxu0 }
 0x113   :  { %v181_v19 = vrot.slane %v180_v14, 4  ;;  %v162_v20 = vpop.f32.mrb[2].mxu1  ;;  %v174_v21 = vrot.slane %v173_v17, 4  ;;  %v122_v22 = vpop.f32.mrb[3].mxu0  ;;  %v187_v26 = vsel %vm165_vm2, %v625_v15, 0.0 }
 0x114   :  { %v163_v23 = vpop.f32.mrb[3].mxu1  ;;  %v168_v24 = vadd.f32 %v167_v16, %v166_v12  ;;  %v188_v31 = vrot.slane %v187_v26, 4  ;;  %v267_v12 = vlaneseq }
 0x115   :  { %v175_v25 = vadd.f32 %v174_v21, %v173_v17  ;;  %v182_v28 = vadd.f32 %v181_v19, %v180_v14 }
 0x116   :  { %v169_v27 = vrot.slane %v168_v24, 2  ;;  %v189_v37 = vadd.f32 %v188_v31, %v187_v26  ;;  %v646_v14 = vshrl.u32 %v267_v12, 7 }
 0x117   :  { %v176_v29 = vrot.slane %v175_v25, 2  ;;  %v183_v34 = vrot.slane %v182_v28, 2 }
 0x118   :  { %v170_v30 = vadd.f32 %v169_v27, %v168_v24  ;;  %v190_v40 = vrot.slane %v189_v37, 2  ;;  %v650_v19 = vsub.s32 0, %v646_v14 }
 0x119   :  { %v177_v32 = vadd.f32 %v176_v29, %v175_v25  ;;  %v184_v38 = vadd.f32 %v183_v34, %v182_v28 }
 0x11a   :  { %v171_v33 = vrot.slane %v170_v30, 1  ;;  %v191_v42 = vadd.f32 %v190_v40, %v189_v37 }
 0x11b   :  { %v178_v36 = vrot.slane %v177_v32, 1  ;;  %v185_v41 = vrot.slane %v184_v38, 1 }
 0x11c   :  { %v172_v35 = vadd.f32 %v171_v33, %v170_v30  ;;  %v192_v44 = vrot.slane %v191_v42, 1 }
 0x11d   :  { %v179_v39 = vadd.f32 %v178_v36, %v177_v32  ;;  %v186_v43 = vadd.f32 %v185_v41, %v184_v38 }
 0x11e   :  { %203 = vrot.lane.b32.xlu1 %v172_v35, %s547_s0  ;;  %195 = vrot.lane.b32.xlu0 %v172_v35, %s548_s26  ;;  %v193_v45 = vadd.f32 %v192_v44, %v191_v42 }
 0x122   :  { %199 = vrot.lane.b32.xlu0 %v172_v35, %s549_s27  ;;  %209 = vrot.lane.b32.xlu1 %v179_v39, %s548_s26 }
 0x126   :  { %213 = vrot.lane.b32.xlu0 %v179_v39, %s549_s27  ;;  %217 = vrot.lane.b32.xlu1 %v179_v39, %s547_s0 }
 0x12a   :  { %223 = vrot.lane.b32.xlu0 %v186_v43, %s548_s26  ;;  %227 = vrot.lane.b32.xlu1 %v186_v43, %s549_s27 }
 0x12e   :  { %231 = vrot.lane.b32.xlu0 %v186_v43, %s547_s0  ;;  %237 = vrot.lane.b32.xlu1 %v193_v45, %s548_s26 }
 0x132   :  { %241 = vrot.lane.b32.xlu0 %v193_v45, %s549_s27  ;;  %245 = vrot.lane.b32.xlu1 %v193_v45, %s547_s0 }
 0x190   :  { %v204_v46 = vpop.permute.xlu1 %203  ;;  %v196_v47 = vpop.permute.xlu0 %195 }
 0x191   :  { %v198_v48 = vadd.f32 %v196_v47, %v172_v35 }
 0x194   :  { %v200_v49 = vpop.permute.xlu0 %199  ;;  %v210_v51 = vpop.permute.xlu1 %209 }
 0x195   :  { %v202_v50 = vadd.f32 %v200_v49, %v198_v48 }
 0x197   :  { %v206_v52 = vadd.f32 %v204_v46, %v202_v50 }
 0x198   :  { %v214_v54 = vpop.permute.xlu0 %213  ;;  %v218_v56 = vpop.permute.xlu1 %217 }
 0x199   :  { %v207_v53 = vadd.f32 %v206_v52, %v179_v39 }
 0x19b   :  { %v212_v55 = vadd.f32 %v210_v51, %v207_v53 }
 0x19c   :  { %v224_v59 = vpop.permute.xlu0 %223  ;;  %v228_v61 = vpop.permute.xlu1 %227 }
 0x19d   :  { %v216_v57 = vadd.f32 %v214_v54, %v212_v55 }
 0x19f   :  { %v220_v58 = vadd.f32 %v218_v56, %v216_v57  ;;  %v384_v56 = vld [vmem:[#allocation6] sm:$0x1] }
 0x1a0   :  { %v232_v0 = vpop.permute.xlu0 %231  ;;  %v238_v2 = vpop.permute.xlu1 %237  ;;  %v389_v57 = vrot.slane %v384_v56, %v650_v19 }
 0x1a1   :  { %v221_v60 = vadd.f32 %v220_v58, %v186_v43 }
 0x1a3   :  { %v226_v62 = vadd.f32 %v224_v59, %v221_v60 }
 0x1a4   :  { %v242_v5 = vpop.permute.xlu0 %241  ;;  %v246_v7 = vpop.permute.xlu1 %245 }
 0x1a5   :  { %v230_v63 = vadd.f32 %v228_v61, %v226_v62 }
 0x1a7   :  { %v234_v1 = vadd.f32 %v232_v0, %v230_v63 }
 0x1a9   :  { %v235_v3 = vadd.f32 %v234_v1, %v193_v45 }
 0x1ab   :  { %v240_v4 = vadd.f32 %v238_v2, %v235_v3 }
 0x1ad   :  { %v244_v6 = vadd.f32 %v242_v5, %v240_v4 }
 0x1af   :  { %v248_v8 = vadd.f32 %v246_v7, %v244_v6 }
 0x1b1   :  { %v250_v9 = vmul.f32 0.03125, %v248_v8 }
 0x1b3   :  { %255 = vrot.lane.b32.xlu1 %v250_v9, %s549_s27  ;;  %252 = vrot.lane.b32.xlu0 %v250_v9, %s547_s0 }
 0x1b7   :  { %258 = vrot.lane.b32.xlu0 %v250_v9, %s548_s26 }
 0x225   :  { %v253_v16 = vpop.permute.xlu0 %252  ;;  %v256_v17 = vpop.permute.xlu1 %255 }
 0x226   :  { %v262_v18 = vsel %vm261_vm3, %v250_v9, %v253_v16 }
 0x227   :  { %v264_v20 = vsel %vm263_vm4, %v262_v18, %v256_v17 }
 0x229   :  { %v259_v21 = vpop.permute.xlu0 %258 }
 0x22a   :  { %v266_v22 = vsel %vm265_vm5, %v264_v20, %v259_v21 }
 0x22b   :  { %v270_v23 = vrot.slane %v266_v22, %v650_v19 }
 0x22d   :  { %v656_v24 = vsub.f32 %v615_v10, %v270_v23  ;;  %v659_v25 = vsub.f32 %v621_v13, %v270_v23  ;;  %v662_v26 = vsub.f32 %v617_v11, %v270_v23  ;;  %v665_v27 = vsub.f32 %v625_v15, %v270_v23 }
 0x22f   :  { %v275_v28 = vmul.f32 %v656_v24, %v656_v24  ;;  %v276_v29 = vmul.f32 %v659_v25, %v659_v25  ;;  %v277_v30 = vmul.f32 %v662_v26, %v662_v26  ;;  %v278_v10 = vmul.f32 %v665_v27, %v665_v27 }
 0x231   :  { %v279_v13 = vsel %vm165_vm2, %v275_v28, 0.0  ;;  %v286_v11 = vsel %vm165_vm2, %v276_v29, 0.0  ;;  %v293_v31 = vsel %vm165_vm2, %v277_v30, 0.0  ;;  %v300_v36 = vsel %vm165_vm2, %v278_v10, 0.0 }
 0x232   :  { %v280_v15 = vrot.slane %v279_v13, 4  ;;  %v287_v32 = vrot.slane %v286_v11, 4  ;;  %v294_v35 = vrot.slane %v293_v31, 4  ;;  %v301_v42 = vrot.slane %v300_v36, 4 }
 0x234   :  { %v281_v33 = vadd.f32 %v280_v15, %v279_v13  ;;  %v288_v34 = vadd.f32 %v287_v32, %v286_v11  ;;  %v295_v41 = vadd.f32 %v294_v35, %v293_v31  ;;  %v302_v47 = vadd.f32 %v301_v42, %v300_v36  ;;  %v363_v11 = vld [vmem:[#allocation4] sm:$0x1] }
 0x236   :  { %v282_v37 = vrot.slane %v281_v33, 2  ;;  %v289_v38 = vrot.slane %v288_v34, 2  ;;  %v296_v46 = vrot.slane %v295_v41, 2  ;;  %v303_v50 = vrot.slane %v302_v47, 2 }
 0x238   :  { %v283_v39 = vadd.f32 %v282_v37, %v281_v33  ;;  %v290_v40 = vadd.f32 %v289_v38, %v288_v34  ;;  %v297_v49 = vadd.f32 %v296_v46, %v295_v41  ;;  %v304_v52 = vadd.f32 %v303_v50, %v302_v47 }
 0x239   :  { %v550_v41 = vmov 1983009808  }
 0x23a   :  { %v284_v43 = vrot.slane %v283_v39, 1  ;;  %v291_v45 = vrot.slane %v290_v40, 1  ;;  %v298_v51 = vrot.slane %v297_v49, 1  ;;  %v305_v54 = vrot.slane %v304_v52, 1 }
 0x23b   :  { %v429_v42 = vunpack.c.l.s4 %v550_v41 }
 0x23c   :  { %v285_v44 = vadd.f32 %v284_v43, %v283_v39  ;;  %v292_v48 = vadd.f32 %v291_v45, %v290_v40  ;;  %v299_v53 = vadd.f32 %v298_v51, %v297_v49  ;;  %v306_v55 = vadd.f32 %v305_v54, %v304_v52 }
 0x23e   :  { %312 = vrot.lane.b32.xlu0 %v285_v44, %s549_s27  ;;  %308 = vrot.lane.b32.xlu1 %v285_v44, %s548_s26 }
 0x242   :  { %322 = vrot.lane.b32.xlu0 %v292_v48, %s548_s26  ;;  %316 = vrot.lane.b32.xlu1 %v285_v44, %s547_s0 }
 0x246   :  { %330 = vrot.lane.b32.xlu0 %v292_v48, %s547_s0  ;;  %326 = vrot.lane.b32.xlu1 %v292_v48, %s549_s27 }
 0x24a   :  { %340 = vrot.lane.b32.xlu0 %v299_v53, %s549_s27  ;;  %336 = vrot.lane.b32.xlu1 %v299_v53, %s548_s26 }
 0x24e   :  { %350 = vrot.lane.b32.xlu0 %v306_v55, %s548_s26  ;;  %344 = vrot.lane.b32.xlu1 %v299_v53, %s547_s0 }
 0x252   :  { %358 = vrot.lane.b32.xlu0 %v306_v55, %s547_s0  ;;  %354 = vrot.lane.b32.xlu1 %v306_v55, %s549_s27 }
 0x256   :  { %390 = vrot.lane.b32.xlu0 %v389_v57, %s547_s0 }
 0x2b0   :  { %v313_v58 = vpop.permute.xlu0 %312  ;;  %v309_v59 = vpop.permute.xlu1 %308 }
 0x2b1   :  { %v311_v60 = vadd.f32 %v309_v59, %v285_v44 }
 0x2b3   :  { %v315_v61 = vadd.f32 %v313_v58, %v311_v60 }
 0x2b4   :  { %v323_v62 = vpop.permute.xlu0 %322  ;;  %v317_v63 = vpop.permute.xlu1 %316 }
 0x2b5   :  { %v319_v0 = vadd.f32 %v317_v63, %v315_v61 }
 0x2b7   :  { %v320_v1 = vadd.f32 %v319_v0, %v292_v48  ;;  %v430_v48 = vunpack.c.0.s8 %v429_v42 }
 0x2b8   :  { %v327_v2 = vpop.permute.xlu1 %326  ;;  %v331_v4 = vpop.permute.xlu0 %330 }
 0x2b9   :  { %v325_v3 = vadd.f32 %v323_v62, %v320_v1  ;;  %v433_v58 = vsub.s32 %v430_v48, %v646_v14 }
 0x2bb   :  { %v329_v5 = vadd.f32 %v327_v2, %v325_v3 }
 0x2bc   :  { %v337_v7 = vpop.permute.xlu1 %336  ;;  %v341_v9 = vpop.permute.xlu0 %340 }
 0x2bd   :  { %v333_v6 = vadd.f32 %v331_v4, %v329_v5 }
 0x2bf   :  { %v334_v8 = vadd.f32 %v333_v6, %v299_v53 }
 0x2c0   :  { %v345_v17 = vpop.permute.xlu1 %344  ;;  %v351_v20 = vpop.permute.xlu0 %350 }
 0x2c1   :  { %v339_v12 = vadd.f32 %v337_v7, %v334_v8 }
 0x2c3   :  { %v343_v16 = vadd.f32 %v341_v9, %v339_v12 }
 0x2c4   :  { %v355_v23 = vpop.permute.xlu1 %354  ;;  %v359_v29 = vpop.permute.xlu0 %358 }
 0x2c5   :  { %v347_v18 = vadd.f32 %v345_v17, %v343_v16 }
 0x2c7   :  { %v348_v21 = vadd.f32 %v347_v18, %v306_v55 }
 0x2c8   :  { %v391_v33 = vpop.permute.xlu0 %390 }
 0x2c9   :  { %v353_v22 = vadd.f32 %v351_v20, %v348_v21  ;;  %v399_v44 = vsel %vm261_vm3, %v384_v56, %v391_v33 }
 0x2cb   :  { %v357_v28 = vadd.f32 %v355_v23, %v353_v22 }
 0x2cd   :  { %v361_v30 = vadd.f32 %v359_v29, %v357_v28 }
 0x2cf   :  { %v362_v10 = vmul.f32 0.03125, %v361_v30 }
 0x2d1   :  { %v364_v13 = vadd.f32 1e-05, %v362_v10 }
 0x2d3   :  { %471 = vrsqrt.f32 %v364_v13 }
 0x2dd   :  { %v472_v31 = vpop.eup %471 }
 0x2de   :  { %v366_v15 = vmul.f32 %v472_v31, %v363_v11 }
 0x2e0   :  { %v371_v32 = vrot.slane %v366_v15, %v650_v19 }
 0x2e2   :  { %375 = vrot.lane.b32.xlu0 %v371_v32, %s549_s27  ;;  %372 = vrot.lane.b32.xlu1 %v371_v32, %s547_s0 }
 0x2e6   :  { %378 = vrot.lane.b32.xlu1 %v371_v32, %s548_s26  ;;  %396 = vrot.lane.b32.xlu0 %v389_v57, %s548_s26 }
 0x2ea   :  { %393 = vrot.lane.b32.xlu1 %v389_v57, %s549_s27 }
 0x354   :  { %v373_v34 = vpop.permute.xlu1 %372  ;;  %v376_v35 = vpop.permute.xlu0 %375 }
 0x355   :  { %v381_v36 = vsel %vm261_vm3, %v366_v15, %v373_v34 }
 0x356   :  { %v382_v37 = vsel %vm263_vm4, %v381_v36, %v376_v35 }
 0x358   :  { %v379_v38 = vpop.permute.xlu1 %378  ;;  %v397_v43 = vpop.permute.xlu0 %396 }
 0x359   :  { %v383_v39 = vsel %vm265_vm5, %v382_v37, %v379_v38 }
 0x35a   :  { %v405_v40 = vrot.slane %v383_v39, %v650_v19 }
 0x35c   :  { %v394_v45 = vpop.permute.xlu1 %393  ;;  %v406_v47 = vmul.f32 %v405_v40, %v656_v24  ;;  %v407_v50 = vmul.f32 %v405_v40, %v659_v25  ;;  %v408_v51 = vmul.f32 %v405_v40, %v662_v26  ;;  %v409_v52 = vmul.f32 %v405_v40, %v665_v27 }
 0x35d   :  { %v400_v46 = vsel %vm263_vm4, %v399_v44, %v394_v45 }
 0x35e   :  { %v401_v49 = vsel %vm265_vm5, %v400_v46, %v397_v43 }
 0x35f   :  { %v413_v53 = vrot.slane %v401_v49, %v650_v19 }
 0x361   :  { %v414_v54 = vadd.f32 %v413_v53, %v406_v47  ;;  %v415_v55 = vadd.f32 %v413_v53, %v407_v50  ;;  %v416_v57 = vadd.f32 %v413_v53, %v408_v51  ;;  %v417_v56 = vadd.f32 %v413_v53, %v409_v52 }
 0x363   :  { %v418_v59 = vmax.f32 %v414_v54, 0.0  ;;  %v419_v60 = vmax.f32 %v415_v55, 0.0  ;;  %v420_v24 = vmax.f32 %v416_v57, 0.0  ;;  %v421_v61 = vmax.f32 %v417_v56, 0.0 }
 0x365   :  { %v426_v62 = vcombine.low %v418_v59, %v419_v60  ;;  %v427_v63 = vcombine.low %v420_v24, %v421_v61 }
 0x367   :  { %v434_v0 = vrot.slane %v426_v62, %v433_v58  ;;  %v441_v25 = vrot.slane %v427_v63, %v433_v58 }
 0x369   :  { %v442_v1 = vcombine.low %v434_v0, %v441_v25 }
 0x36b   :  { %444 = vst [vmem:[%s719_s4] sm:$0xff] %v442_v1 }
 0x36c   :  { %449 = vsyncpa [#allocation3], 1 }
 0x36d   :  { %450 = vsyncpa [#allocation5], 1 }

// kernel: _lambda_.6
= control target key start
LH: loop header
LB: loop body
LE: loop exit
PB: predicated region body
PF: predicated region fallthrough
CT: control target
= control target key end

     0   :  { %9 = vsyncpa [#allocation3], 0  ;;  %s809_s0 = inlined_call_operand.vmem [shape: bf16[32,288], index: 0, kind: input, shape index: {}]   ;;  %s810_s1 = inlined_call_operand.hbm [shape: bf16[288,128], index: 1, kind: input, shape index: {}]   ;;  %s811_s2 = inlined_call_operand.hbm [shape: f32[1,16], index: 2, kind: input, shape index: {}]   ;;  %s812_s3 = inlined_call_operand.hbm [shape: f32[1,16], index: 3, kind: input, shape index: {}]   ;;  %s813_s4 = inlined_call_operand.vmem [shape: f32[32,128], index: 4, kind: output, shape index: {}]  }
   0x1   :  { %10 = vsyncpa [#allocation5], 0  ;;  %s664_s15 = smov [#allocation4]   ;;  %s665_s17 = smov [#allocation2]  }
   0x2   :  { %s31_s16 = sshll.u32 %s664_s15, 4  ;;  %s18_s18 = sshll.u32 %s665_s17, 4  ;;  %s32_s16 = int_to_ptr.vmem [resolvable:$true] %s31_s16  ;;  %s700_s18 = int_to_ptr.vmem [resolvable:$true] %s18_s18 }
   0x3   :  { %s594_s21 = scalar_lea.hbm %s811_s2, 16 }
   0x4   :  { %p595_p0 = scmp.ne.s32.totalorder %s811_s2, %s594_s21  ;;  %p598_p1 = scmp.lt.u32.totalorder %s594_s21, %s811_s2 }
   0x6   :  { %p600_p2 = pnand %p598_p1, %p595_p0 }
   0x8   :  { %603 = shalt.err (!%p600_p2)
}
   0x9   :  { %s604_s26 = scalar_lea.vmem %s32_s16, 16  ;;  %s608_s27 = scalar_lea.vmem %s32_s16, 32 }
   0xa   :  { %p605_p3 = scmp.ne.s32.totalorder %s32_s16, %s604_s26  ;;  %p609_p4 = scmp.lt.s32.totalorder %s32_s16, %s32_s16 }
   0xb   :  { %p610_p5 = scmp.lt.s32.totalorder %s608_s27, %s604_s26 }
   0xd   :  { %p611_p6 = por %p610_p5, %p609_p4 }
   0xf   :  { %p612_p7 = pnand %p611_p6, %p605_p3 }
  0x11   :  { %615 = shalt.err (!%p612_p7)
}
  0x12   :  { %34 = dma.hbm_to_vmem [thread:$0]  %s811_s2, 16, %s32_s16, [#allocation5]  }
  0x13   :  { %s616_s6 = scalar_lea.hbm %s810_s1, 2304 }
  0x14   :  { %p617_p8 = scmp.ne.s32.totalorder %s810_s1, %s616_s6  ;;  %p620_p9 = scmp.lt.u32.totalorder %s616_s6, %s810_s1 }
  0x16   :  { %p622_p10 = pnand %p620_p9, %p617_p8 }
  0x18   :  { %625 = shalt.err (!%p622_p10)
}
  0x19   :  { %s626_s11 = scalar_lea.vmem %s700_s18, 2304  ;;  %p631_p12 = scmp.lt.s32.totalorder %s700_s18, %s700_s18 }
  0x1a   :  { %p627_p11 = scmp.ne.s32.totalorder %s700_s18, %s626_s11  ;;  %p632_p13 = scmp.lt.s32.totalorder %s626_s11, %s626_s11 }
  0x1c   :  { %p633_p0 = por %p632_p13, %p631_p12 }
  0x1e   :  { %p634_p1 = pnand %p633_p0, %p627_p11 }
  0x20   :  { %637 = shalt.err (!%p634_p1)
}
  0x21   :  { %s666_s2 = smov 64   ;;  %s667_s12 = smov 4  }
  0x22   :  { %24 = dma.hbm_to_vmem [thread:$0]  %s810_s1, 2304, %s700_s18, [#allocation3], %s666_s2, %s666_s2, %s667_s12  }
  0x23   :  { %s668_s15 = smov [#allocation6]   ;;  %s638_s20 = scalar_lea.hbm %s812_s3, 16 }
  0x24   :  { %s41_s16 = sshll.u32 %s668_s15, 4  ;;  %p639_p2 = scmp.ne.s32.totalorder %s812_s3, %s638_s20  ;;  %s42_s16 = int_to_ptr.vmem [resolvable:$true] %s41_s16 }
  0x25   :  { %p642_p3 = scmp.lt.u32.totalorder %s638_s20, %s812_s3 }
  0x27   :  { %p644_p4 = pnand %p642_p3, %p639_p2 }
  0x29   :  { %647 = shalt.err (!%p644_p4)
}
  0x2a   :  { %s648_s25 = scalar_lea.vmem %s42_s16, 16  ;;  %s652_s1 = scalar_lea.vmem %s42_s16, 32 }
  0x2b   :  { %p649_p5 = scmp.ne.s32.totalorder %s42_s16, %s648_s25  ;;  %p653_p6 = scmp.lt.s32.totalorder %s42_s16, %s42_s16 }
  0x2c   :  { %p654_p7 = scmp.lt.s32.totalorder %s652_s1, %s648_s25 }
  0x2e   :  { %p655_p8 = por %p654_p7, %p653_p6 }
  0x30   :  { %p656_p9 = pnand %p655_p8, %p649_p5 }
  0x32   :  { %659 = shalt.err (!%p656_p9)
}
  0x33   :  { %44 = dma.hbm_to_vmem [thread:$0]  %s812_s3, 16, %s42_s16, [#allocation5]  }
  0x34   :  { %660 = dma.done.wait [#allocation3], 2304  }
  0x35   :  { %661 = vsyncadd [#allocation3], 4294964992 }
  0x36   :  { %662 = dma.done.wait [#allocation5], 32  }
  0x37   :  { %663 = vsyncadd [#allocation5], 4294967264  ;;  %v566_v0 = vld [vmem:[#allocation2 + $0x40] sm:$0xff]   ;;  %v568_v2 = vld [vmem:[#allocation2 + $0x48] sm:$0xff]   ;;  %vm237_vm0 = vcmask 261120   ;;  %s670_s2 = smov 112   ;;  %v383_v60 = vlaneseq }
  0x38   :  { %v567_v1 = vld [vmem:[#allocation2] sm:$0xff]   ;;  %515 = vmatprep.subr.bf16.mxu0 %v566_v0  ;;  %v569_v3 = vld [vmem:[#allocation2 + $0x8] sm:$0xff]   ;;  %v570_v4 = vld [vmem:[#allocation2 + $0x50] sm:$0xff]   ;;  %s671_s12 = smov 96   ;;  %s672_s13 = smov 32   ;;  %vm376_vm1 = vcmask 130048  }
  0x39   :  { %516 = vmatpush3.bf16.msra.mxu0 %v567_v1  ;;  %v571_v5 = vld [vmem:[#allocation2 + $0x10] sm:$0xff]   ;;  %v572_v6 = vld [vmem:[#allocation2 + $0x58] sm:$0xff]   ;;  %v574_v8 = vld [vmem:[#allocation2 + $0x60] sm:$0xff]   ;;  %s673_s14 = smov 16   ;;  %s674_s15 = smov 48   ;;  %v384_v61 = vshrl.u32 %v383_v60, 7 }
  0x3a   :  { %517 = vmatprep.subr.bf16.mxu0 %v568_v2  ;;  %v573_v7 = vld [vmem:[#allocation2 + $0x18] sm:$0xff]   ;;  %v580_v9 = vld [vmem:[#allocation2 + $0x80] sm:$0xff]   ;;  %v576_v11 = vld [vmem:[#allocation2 + $0x68] sm:$0xff]   ;;  %vm379_vm2 = vcmask 392192   ;;  %vm381_vm3 = vcmask 523264  }
  0x3b   :  { %v575_v10 = vld [vmem:[#allocation2 + $0x20] sm:$0xff]   ;;  %547 = vmatprep.subr.bf16.mxu1 %v580_v9  ;;  %v577_v12 = vld [vmem:[#allocation2 + $0x28] sm:$0xff]   ;;  %v578_v14 = vld [vmem:[#allocation2 + $0x70] sm:$0xff]   ;;  %v770_v1 = vsub.s32 0, %v384_v61 }
  0x3c   :  { %548 = vmatpush3.bf16.msra.mxu1 %v580_v9  ;;  %v583_v13 = vld [vmem:[#allocation2 + $0x88] sm:$0xff]   ;;  %v586_v15 = vld [vmem:[%s809_s0 + $0x4] ss:$12 sps:$4 sm:$0xff]   ;;  %v581_v19 = vld [vmem:[#allocation2 + $0x78] sm:$0xff]  }
  0x3d   :  { %518 = vmatpush3.bf16.msra.mxu0 %v569_v3  ;;  %549 = vmatprep.subr.bf16.mxu1 %v583_v13  ;;  %v587_v16 = vld [vmem:[%s809_s0 + $0x8] ss:$12 sps:$4 sm:$0xff]   ;;  %v588_v17 = vld [vmem:[%s809_s0 + $0x20] ss:$12 sps:$4 sm:$0xff]   ;;  %v582_v20 = vld [vmem:[#allocation2 + $0x38] sm:$0xff]  }
  0x3e   :  { %519 = vmatprep.subr.bf16.mxu0 %v570_v4  ;;  %276 = vmatprep.mubr.bf16.mxu0 %v586_v15  ;;  %v579_v18 = vld [vmem:[#allocation2 + $0x30] sm:$0xff]   ;;  %v584_v21 = vld [vmem:[%s809_s0] ss:$12 sps:$4 sm:$0xff]   ;;  %v589_v22 = vld [vmem:[%s809_s0 + $0x1c] ss:$12 sps:$4 sm:$0xff]  }
  0x3f   :  { %551 = vmatprep.mubr.msk.bf16.mxu1 %vm237_vm0, %v587_v16  ;;  %v591_v23 = vld [vmem:[%s809_s0 + $0x18] ss:$12 sps:$4 sm:$0xff]   ;;  %s669_s0 = smov 80  }
  0x40   :  { %550 = vmatpush3.bf16.msra.mxu1 %v583_v13 }
  0x41   :  { %520 = vmatpush3.bf16.msra.mxu0 %v571_v5 }
  0x42   :  { %521 = vmatprep.subr.bf16.mxu0 %v572_v6 }
  0x43   :  { %552 = vmatmul.mubr.msk.bf16.vlgmr.msra.gmra.mrb[0].mxu1 %vm237_vm0, %v588_v17 }
  0x45   :  { %522 = vmatpush3.bf16.msra.mxu0 %v573_v7 }
  0x46   :  { %523 = vmatprep.subr.bf16.mxu0 %v574_v8 }
  0x49   :  { %524 = vmatpush3.bf16.msra.mxu0 %v575_v10 }
  0x4a   :  { %525 = vmatprep.subr.bf16.mxu0 %v576_v11 }
  0x4d   :  { %526 = vmatpush3.bf16.msra.mxu0 %v577_v12 }
  0x4e   :  { %527 = vmatprep.subr.bf16.mxu0 %v578_v14 }
  0x51   :  { %528 = vmatpush3.bf16.msra.mxu0 %v579_v18 }
  0x52   :  { %529 = vmatprep.subr.bf16.mxu0 %v581_v19 }
  0x55   :  { %530 = vmatpush3.bf16.msra.mxu0 %v582_v20 }
  0x58   :  { %277 = vmatmul.mubr.bf16.vlgmr.msra.gmra.mrb[0].mxu0 %v584_v21 }
  0x59   :  { %284 = vmatprep.mubr.bf16.mxu0 %v589_v22 }
  0x60   :  { %285 = vmatmul.mubr.bf16.gmra.mrb[4].mxu0 %v591_v23 }
 0x116   :  { %v553_v24 = vpop.f32.mrb[0].mxu1 }
 0x117   :  { %v327_v25 = vpop.f32.mrb[1].mxu1 }
 0x118   :  { %v554_v26 = vpop.f32.mrb[2].mxu1 }
 0x119   :  { %v330_v27 = vpop.f32.mrb[3].mxu1 }
 0x12b   :  { %v531_v28 = vpop.f32.mrb[0].mxu0 }
 0x12c   :  { %v532_v29 = vpop.f32.mrb[1].mxu0 }
 0x12d   :  { %v533_v30 = vadd.f32 %v532_v29, %v531_v28  ;;  %v534_v31 = vpop.f32.mrb[2].mxu0 }
 0x12e   :  { %v535_v32 = vpop.f32.mrb[3].mxu0 }
 0x12f   :  { %v536_v33 = vadd.f32 %v535_v32, %v534_v31  ;;  %v328_v34 = vadd.f32 %v533_v30, %v327_v25 }
 0x131   :  { %v331_v35 = vadd.f32 %v536_v33, %v330_v27 }
 0x133   :  { %v537_v36 = vpop.f32.mrb[4].mxu0  ;;  %v342_v41 = vadd.f32 %v331_v35, %v328_v34 }
 0x134   :  { %v538_v37 = vpop.f32.mrb[5].mxu0 }
 0x135   :  { %v539_v38 = vadd.f32 %v538_v37, %v537_v36  ;;  %v540_v39 = vpop.f32.mrb[6].mxu0 }
 0x136   :  { %v541_v40 = vpop.f32.mrb[7].mxu0 }
 0x137   :  { %v336_v42 = vadd.f32 %v553_v24, %v539_v38  ;;  %v542_v43 = vadd.f32 %v541_v40, %v540_v39  ;;  %v440_v24 = vld [vmem:[#allocation6] sm:$0x1] }
 0x138   :  { %v445_v25 = vrot.slane %v440_v24, %v770_v1 }
 0x139   :  { %v343_v44 = vadd.f32 %v342_v41, %v336_v42  ;;  %v339_v45 = vadd.f32 %v554_v26, %v542_v43 }
 0x13b   :  { %v344_v46 = vadd.f32 %v343_v44, %v339_v45 }
 0x13d   :  { %v345_v47 = vrot.slane %v344_v46, 4 }
 0x13f   :  { %v346_v48 = vadd.f32 %v345_v47, %v344_v46 }
 0x141   :  { %v347_v49 = vrot.slane %v346_v48, 2 }
 0x143   :  { %v348_v50 = vadd.f32 %v347_v49, %v346_v48 }
 0x145   :  { %v349_v51 = vrot.slane %v348_v50, 1 }
 0x147   :  { %v350_v52 = vadd.f32 %v349_v51, %v348_v50 }
 0x149   :  { %360 = vrot.lane.b32.xlu1 %v350_v52, %s669_s0  ;;  %352 = vrot.lane.b32.xlu0 %v350_v52, %s670_s2 }
 0x14d   :  { %356 = vrot.lane.b32.xlu0 %v350_v52, %s671_s12 }
 0x1bb   :  { %v353_v53 = vpop.permute.xlu0 %352  ;;  %v361_v57 = vpop.permute.xlu1 %360 }
 0x1bc   :  { %v355_v54 = vadd.f32 %v353_v53, %v350_v52 }
 0x1bf   :  { %v357_v55 = vpop.permute.xlu0 %356 }
 0x1c0   :  { %v359_v56 = vadd.f32 %v357_v55, %v355_v54 }
 0x1c2   :  { %v363_v58 = vadd.f32 %v361_v57, %v359_v56 }
 0x1c4   :  { %v365_v59 = vmul.f32 0.0078125, %v363_v58 }
 0x1c6   :  { %370 = vrot.lane.b32.xlu0 %v365_v59, %s672_s13  ;;  %367 = vrot.lane.b32.xlu1 %v365_v59, %s673_s14 }
 0x1ca   :  { %373 = vrot.lane.b32.xlu1 %v365_v59, %s674_s15 }
 0x238   :  { %v368_v62 = vpop.permute.xlu1 %367  ;;  %v371_v63 = vpop.permute.xlu0 %370 }
 0x239   :  { %v377_v0 = vsel %vm376_vm1, %v365_v59, %v368_v62 }
 0x23a   :  { %v378_v2 = vsel %vm237_vm0, %v377_v0, %v371_v63 }
 0x23c   :  { %v374_v3 = vpop.permute.xlu1 %373 }
 0x23d   :  { %v380_v4 = vsel %vm379_vm2, %v378_v2, %v374_v3 }
 0x23e   :  { %v382_v5 = vsel %vm381_vm3, %v380_v4, 0.0 }
 0x23f   :  { %v386_v6 = vrot.slane %v382_v5, %v770_v1 }
 0x241   :  { %v387_v7 = vsub.f32 %v328_v34, %v386_v6  ;;  %v388_v8 = vsub.f32 %v331_v35, %v386_v6  ;;  %v389_v9 = vsub.f32 %v336_v42, %v386_v6  ;;  %v390_v10 = vsub.f32 %v339_v45, %v386_v6  ;;  %v418_v34 = vld [vmem:[#allocation4] sm:$0x1] }
 0x243   :  { %v391_v11 = vmul.f32 %v387_v7, %v387_v7  ;;  %v392_v12 = vmul.f32 %v388_v8, %v388_v8  ;;  %v393_v13 = vmul.f32 %v389_v9, %v389_v9  ;;  %v394_v15 = vmul.f32 %v390_v10, %v390_v10 }
 0x245   :  { %v395_v14 = vadd.f32 %v392_v12, %v391_v11 }
 0x247   :  { %v396_v16 = vadd.f32 %v395_v14, %v393_v13 }
 0x249   :  { %v397_v17 = vadd.f32 %v396_v16, %v394_v15 }
 0x24b   :  { %v398_v18 = vrot.slane %v397_v17, 4 }
 0x24d   :  { %v399_v19 = vadd.f32 %v398_v18, %v397_v17 }
 0x24f   :  { %v400_v20 = vrot.slane %v399_v19, 2 }
 0x251   :  { %v401_v21 = vadd.f32 %v400_v20, %v399_v19 }
 0x253   :  { %v402_v22 = vrot.slane %v401_v21, 1 }
 0x255   :  { %v403_v23 = vadd.f32 %v402_v22, %v401_v21 }
 0x257   :  { %409 = vrot.lane.b32.xlu1 %v403_v23, %s671_s12  ;;  %405 = vrot.lane.b32.xlu0 %v403_v23, %s670_s2 }
 0x25b   :  { %413 = vrot.lane.b32.xlu0 %v403_v23, %s669_s0 }
 0x25f   :  { %446 = vrot.lane.b32.xlu0 %v445_v25, %s673_s14 }
 0x2c9   :  { %v406_v26 = vpop.permute.xlu0 %405  ;;  %v410_v28 = vpop.permute.xlu1 %409 }
 0x2ca   :  { %v408_v27 = vadd.f32 %v406_v26, %v403_v23 }
 0x2cc   :  { %v412_v29 = vadd.f32 %v410_v28, %v408_v27 }
 0x2cd   :  { %v414_v30 = vpop.permute.xlu0 %413 }
 0x2ce   :  { %v416_v31 = vadd.f32 %v414_v30, %v412_v29 }
 0x2d0   :  { %v417_v32 = vmul.f32 0.0078125, %v416_v31 }
 0x2d1   :  { %v447_v38 = vpop.permute.xlu0 %446 }
 0x2d2   :  { %v419_v33 = vadd.f32 1e-05, %v417_v32  ;;  %v455_v49 = vsel %vm376_vm1, %v440_v24, %v447_v38 }
 0x2d4   :  { %592 = vrsqrt.f32 %v419_v33 }
 0x2de   :  { %v593_v35 = vpop.eup %592 }
 0x2df   :  { %v421_v36 = vmul.f32 %v593_v35, %v418_v34 }
 0x2e1   :  { %v426_v37 = vrot.slane %v421_v36, %v770_v1 }
 0x2e3   :  { %430 = vrot.lane.b32.xlu0 %v426_v37, %s672_s13  ;;  %427 = vrot.lane.b32.xlu1 %v426_v37, %s673_s14 }
 0x2e7   :  { %433 = vrot.lane.b32.xlu1 %v426_v37, %s674_s15  ;;  %452 = vrot.lane.b32.xlu0 %v445_v25, %s674_s15 }
 0x2eb   :  { %449 = vrot.lane.b32.xlu1 %v445_v25, %s672_s13 }
 0x355   :  { %v428_v39 = vpop.permute.xlu1 %427  ;;  %v431_v41 = vpop.permute.xlu0 %430 }
 0x356   :  { %v436_v40 = vsel %vm376_vm1, %v421_v36, %v428_v39 }
 0x357   :  { %v437_v42 = vsel %vm237_vm0, %v436_v40, %v431_v41 }
 0x359   :  { %v434_v43 = vpop.permute.xlu1 %433  ;;  %v453_v48 = vpop.permute.xlu0 %452 }
 0x35a   :  { %v438_v44 = vsel %vm379_vm2, %v437_v42, %v434_v43 }
 0x35b   :  { %v439_v45 = vsel %vm381_vm3, %v438_v44, 0.0 }
 0x35c   :  { %v462_v46 = vrot.slane %v439_v45, %v770_v1 }
 0x35d   :  { %v450_v47 = vpop.permute.xlu1 %449 }
 0x35e   :  { %v456_v50 = vsel %vm237_vm0, %v455_v49, %v450_v47  ;;  %v463_v52 = vmul.f32 %v462_v46, %v387_v7  ;;  %v464_v54 = vmul.f32 %v462_v46, %v388_v8  ;;  %v465_v55 = vmul.f32 %v462_v46, %v389_v9 }
 0x35f   :  { %v457_v51 = vsel %vm379_vm2, %v456_v50, %v453_v48  ;;  %v466_v56 = vmul.f32 %v462_v46, %v390_v10 }
 0x360   :  { %v458_v53 = vsel %vm381_vm3, %v457_v51, 0.0 }
 0x361   :  { %v470_v57 = vrot.slane %v458_v53, %v770_v1 }
 0x363   :  { %v471_v58 = vadd.f32 %v470_v57, %v463_v52  ;;  %v472_v59 = vadd.f32 %v470_v57, %v464_v54  ;;  %v473_v60 = vadd.f32 %v470_v57, %v465_v55  ;;  %v474_v61 = vadd.f32 %v470_v57, %v466_v56 }
 0x365   :  { %v475_v62 = vmax.f32 %v471_v58, 0.0  ;;  %v476_v63 = vmax.f32 %v472_v59, 0.0  ;;  %v477_v0 = vmax.f32 %v473_v60, 0.0  ;;  %v478_v2 = vmax.f32 %v474_v61, 0.0 }
 0x367   :  { %479 = vst [vmem:[%s813_s4] sm:$0xff] %v475_v62  ;;  %480 = vst [vmem:[%s813_s4 + $0x8] sm:$0xff] %v476_v63 }
 0x368   :  { %481 = vst [vmem:[%s813_s4 + $0x10] sm:$0xff] %v477_v0  ;;  %482 = vst [vmem:[%s813_s4 + $0x18] sm:$0xff] %v478_v2 }
 0x369   :  { %487 = vsyncpa [#allocation3], 1 }
 0x36a   :  { %488 = vsyncpa [#allocation5], 1 }

// kernel: _lambda_.7
= control target key start
LH: loop header
LB: loop body
LE: loop exit
PB: predicated region body
PF: predicated region fallthrough
CT: control target
= control target key end

     0   :  { %9 = vsyncpa [#allocation3], 0  ;;  %s1110_s0 = inlined_call_operand.vmem [shape: bf16[128,144], index: 0, kind: input, shape index: {}]   ;;  %s1111_s1 = inlined_call_operand.hbm [shape: bf16[144,128], index: 1, kind: input, shape index: {}]   ;;  %s1112_s2 = inlined_call_operand.hbm [shape: f32[1,8], index: 2, kind: input, shape index: {}]   ;;  %s1113_s3 = inlined_call_operand.hbm [shape: f32[1,8], index: 3, kind: input, shape index: {}]   ;;  %s1114_s4 = inlined_call_operand.vmem [shape: f32[128,128], index: 4, kind: output, shape index: {}]  }
   0x1   :  { %10 = vsyncpa [#allocation5], 0  ;;  %s748_s15 = smov [#allocation4]   ;;  %s749_s17 = smov [#allocation2]  }
   0x2   :  { %s31_s16 = sshll.u32 %s748_s15, 4  ;;  %s18_s18 = sshll.u32 %s749_s17, 4  ;;  %s32_s16 = int_to_ptr.vmem [resolvable:$true] %s31_s16  ;;  %s785_s18 = int_to_ptr.vmem [resolvable:$true] %s18_s18 }
   0x3   :  { %s678_s21 = scalar_lea.hbm %s1112_s2, 16 }
   0x4   :  { %p679_p0 = scmp.ne.s32.totalorder %s1112_s2, %s678_s21  ;;  %p682_p1 = scmp.lt.u32.totalorder %s678_s21, %s1112_s2 }
   0x6   :  { %p684_p2 = pnand %p682_p1, %p679_p0 }
   0x8   :  { %687 = shalt.err (!%p684_p2)
}
   0x9   :  { %s688_s26 = scalar_lea.vmem %s32_s16, 16  ;;  %s692_s27 = scalar_lea.vmem %s32_s16, 32 }
   0xa   :  { %p689_p3 = scmp.ne.s32.totalorder %s32_s16, %s688_s26  ;;  %p693_p4 = scmp.lt.s32.totalorder %s32_s16, %s32_s16 }
   0xb   :  { %p694_p5 = scmp.lt.s32.totalorder %s692_s27, %s688_s26 }
   0xd   :  { %p695_p6 = por %p694_p5, %p693_p4 }
   0xf   :  { %p696_p7 = pnand %p695_p6, %p689_p3 }
  0x11   :  { %699 = shalt.err (!%p696_p7)
}
  0x12   :  { %34 = dma.hbm_to_vmem [thread:$0]  %s1112_s2, 16, %s32_s16, [#allocation5]  }
  0x13   :  { %s700_s6 = scalar_lea.hbm %s1111_s1, 1152 }
  0x14   :  { %p701_p8 = scmp.ne.s32.totalorder %s1111_s1, %s700_s6  ;;  %p704_p9 = scmp.lt.u32.totalorder %s700_s6, %s1111_s1 }
  0x16   :  { %p706_p10 = pnand %p704_p9, %p701_p8 }
  0x18   :  { %709 = shalt.err (!%p706_p10)
}
  0x19   :  { %s710_s11 = scalar_lea.vmem %s785_s18, 1152  ;;  %p715_p12 = scmp.lt.s32.totalorder %s785_s18, %s785_s18 }
  0x1a   :  { %p711_p11 = scmp.ne.s32.totalorder %s785_s18, %s710_s11  ;;  %p716_p13 = scmp.lt.s32.totalorder %s710_s11, %s710_s11 }
  0x1c   :  { %p717_p0 = por %p716_p13, %p715_p12 }
  0x1e   :  { %p718_p1 = pnand %p717_p0, %p711_p11 }
  0x20   :  { %721 = shalt.err (!%p718_p1)
}
  0x21   :  { %s750_s2 = smov 64   ;;  %s751_s12 = smov 4  }
  0x22   :  { %24 = dma.hbm_to_vmem [thread:$0]  %s1111_s1, 1152, %s785_s18, [#allocation3], %s750_s2, %s750_s2, %s751_s12  }
  0x23   :  { %s752_s15 = smov [#allocation6]   ;;  %s722_s20 = scalar_lea.hbm %s1113_s3, 16 }
  0x24   :  { %s41_s16 = sshll.u32 %s752_s15, 4  ;;  %p723_p2 = scmp.ne.s32.totalorder %s1113_s3, %s722_s20  ;;  %s42_s16 = int_to_ptr.vmem [resolvable:$true] %s41_s16 }
  0x25   :  { %p726_p3 = scmp.lt.u32.totalorder %s722_s20, %s1113_s3 }
  0x27   :  { %p728_p4 = pnand %p726_p3, %p723_p2 }
  0x29   :  { %731 = shalt.err (!%p728_p4)
}
  0x2a   :  { %s732_s25 = scalar_lea.vmem %s42_s16, 16  ;;  %s736_s1 = scalar_lea.vmem %s42_s16, 32 }
  0x2b   :  { %p733_p5 = scmp.ne.s32.totalorder %s42_s16, %s732_s25  ;;  %p737_p6 = scmp.lt.s32.totalorder %s42_s16, %s42_s16 }
  0x2c   :  { %p738_p7 = scmp.lt.s32.totalorder %s736_s1, %s732_s25 }
  0x2e   :  { %p739_p8 = por %p738_p7, %p737_p6 }
  0x30   :  { %p740_p9 = pnand %p739_p8, %p733_p5 }
  0x32   :  { %743 = shalt.err (!%p740_p9)
}
  0x33   :  { %44 = dma.hbm_to_vmem [thread:$0]  %s1113_s3, 16, %s42_s16, [#allocation5]  }
  0x34   :  { %744 = dma.done.wait [#allocation3], 1152  }
  0x35   :  { %745 = vsyncadd [#allocation3], 4294966144 }
  0x36   :  { %746 = dma.done.wait [#allocation5], 32  }
  0x37   :  { %747 = vsyncadd [#allocation5], 4294967264  ;;  %v753_v0 = vmov 0   ;;  %v643_v1 = vld [vmem:[#allocation2] sm:$0xff]   ;;  %v644_v2 = vld [vmem:[#allocation2 + $0x8] sm:$0xff]   ;;  %vm215_vm0 = vcmask 130048  }
  0x38   :  { %240 = vmatprep.subr.bf16.mxu0 %v753_v0  ;;  %613 = vmatprep.subr.bf16.mxu1 %v753_v0  ;;  %v645_v3 = vld [vmem:[#allocation2 + $0x10] sm:$0xff]   ;;  %v646_v4 = vld [vmem:[#allocation2 + $0x18] sm:$0xff]   ;;  %v654_v5 = vld [vmem:[%s1110_s0 + $0x4] ss:$8 sps:$4 sm:$0xff]   ;;  %s755_s29 = smov 120   ;;  %s756_s30 = smov 112  }
  0x39   :  { %241 = vmatpush1.bf16.msra.mxu0 %v643_v1  ;;  %622 = vmatpush1.bf16.msra.mxu1 %v643_v1  ;;  %v660_v6 = vld [vmem:[%s1110_s0 + $0x44] ss:$8 sps:$4 sm:$0xff]   ;;  %v649_v9 = vld [vmem:[#allocation2 + $0x30] sm:$0xff]   ;;  %v650_v10 = vld [vmem:[#allocation2 + $0x38] sm:$0xff]   ;;  %s757_s5 = smov 16   ;;  %s758_s6 = smov 8  }
  0x3a   :  { %242 = vmatprep.subr.bf16.mxu0 %v753_v0  ;;  %614 = vmatprep.subr.bf16.mxu1 %v753_v0  ;;  %v647_v7 = vld [vmem:[#allocation2 + $0x20] sm:$0xff]   ;;  %v648_v8 = vld [vmem:[#allocation2 + $0x28] sm:$0xff]   ;;  %v655_v14 = vld [vmem:[%s1110_s0 + $0x14] ss:$8 sps:$4 sm:$0xff]   ;;  %s759_s7 = smov 24   ;;  %vm383_vm1 = vcmask 64512  }
  0x3b   :  { %605 = vmatprep.mubr.msk.bf16.mxu0 %vm215_vm0, %v654_v5  ;;  %609 = vmatprep.mubr.msk.bf16.mxu1 %vm215_vm0, %v660_v6  ;;  %v651_v11 = vld [vmem:[#allocation2 + $0x40] sm:$0xff]   ;;  %v664_v15 = vld [vmem:[%s1110_s0 + $0x54] ss:$8 sps:$4 sm:$0xff]   ;;  %v657_v16 = vld [vmem:[%s1110_s0 + $0x10] ss:$8 sps:$4 sm:$0xff]   ;;  %vm386_vm2 = vcmask 195584  }
  0x3c   :  { %v652_v12 = vld [vmem:[%s1110_s0] ss:$8 sps:$4 sm:$0xff]   ;;  %v666_v17 = vld [vmem:[%s1110_s0 + $0x50] ss:$8 sps:$4 sm:$0xff]   ;;  %v661_v18 = vld [vmem:[%s1110_s0 + $0x24] ss:$8 sps:$4 sm:$0xff]  }
  0x3d   :  { %243 = vmatpush1.bf16.msra.mxu0 %v644_v2  ;;  %623 = vmatpush1.bf16.msra.mxu1 %v644_v2  ;;  %v658_v13 = vld [vmem:[%s1110_s0 + $0x40] ss:$8 sps:$4 sm:$0xff]   ;;  %v670_v19 = vld [vmem:[%s1110_s0 + $0x64] ss:$8 sps:$4 sm:$0xff]   ;;  %v667_v22 = vld [vmem:[%s1110_s0 + $0x34] ss:$8 sps:$4 sm:$0xff]  }
  0x3e   :  { %244 = vmatprep.subr.bf16.mxu0 %v753_v0  ;;  %615 = vmatprep.subr.bf16.mxu1 %v753_v0  ;;  %v663_v20 = vld [vmem:[%s1110_s0 + $0x20] ss:$8 sps:$4 sm:$0xff]   ;;  %v673_v23 = vld [vmem:[%s1110_s0 + $0x74] ss:$8 sps:$4 sm:$0xff]   ;;  %v669_v24 = vld [vmem:[%s1110_s0 + $0x30] ss:$8 sps:$4 sm:$0xff]  }
  0x3f   :  { %v672_v21 = vld [vmem:[%s1110_s0 + $0x60] ss:$8 sps:$4 sm:$0xff]   ;;  %v675_v25 = vld [vmem:[%s1110_s0 + $0x70] ss:$8 sps:$4 sm:$0xff]   ;;  %s754_s0 = smov 104   ;;  %vm388_vm3 = vcmask 261120  }
  0x41   :  { %245 = vmatpush1.bf16.msra.mxu0 %v645_v3  ;;  %624 = vmatpush1.bf16.msra.mxu1 %v645_v3 }
  0x42   :  { %246 = vmatprep.subr.bf16.mxu0 %v753_v0  ;;  %616 = vmatprep.subr.bf16.mxu1 %v753_v0 }
  0x45   :  { %247 = vmatpush1.bf16.msra.mxu0 %v646_v4  ;;  %625 = vmatpush1.bf16.msra.mxu1 %v646_v4 }
  0x46   :  { %248 = vmatprep.subr.bf16.mxu0 %v753_v0  ;;  %617 = vmatprep.subr.bf16.mxu1 %v753_v0 }
  0x49   :  { %249 = vmatpush1.bf16.msra.mxu0 %v647_v7  ;;  %626 = vmatpush1.bf16.msra.mxu1 %v647_v7 }
  0x4a   :  { %250 = vmatprep.subr.bf16.mxu0 %v753_v0  ;;  %618 = vmatprep.subr.bf16.mxu1 %v753_v0 }
  0x4d   :  { %251 = vmatpush1.bf16.msra.mxu0 %v648_v8  ;;  %627 = vmatpush1.bf16.msra.mxu1 %v648_v8 }
  0x4e   :  { %252 = vmatprep.subr.bf16.mxu0 %v753_v0  ;;  %619 = vmatprep.subr.bf16.mxu1 %v753_v0 }
  0x51   :  { %253 = vmatpush1.bf16.msra.mxu0 %v649_v9  ;;  %628 = vmatpush1.bf16.msra.mxu1 %v649_v9 }
  0x52   :  { %254 = vmatprep.subr.bf16.mxu0 %v753_v0  ;;  %620 = vmatprep.subr.bf16.mxu1 %v753_v0 }
  0x55   :  { %255 = vmatpush1.bf16.msra.mxu0 %v650_v10  ;;  %629 = vmatpush1.bf16.msra.mxu1 %v650_v10 }
  0x56   :  { %256 = vmatprep.subr.bf16.mxu0 %v753_v0  ;;  %621 = vmatprep.subr.bf16.mxu1 %v753_v0 }
  0x59   :  { %257 = vmatpush1.bf16.msra.mxu0 %v651_v11  ;;  %630 = vmatpush1.bf16.msra.mxu1 %v651_v11 }
  0x5c   :  { %273 = vmatmul.mubr.bf16.vlgmr.msra.gmra.mrb[0].mxu0 %v652_v12  ;;  %305 = vmatmul.mubr.bf16.vlgmr.msra.gmra.mrb[0].mxu1 %v658_v13 }
  0x5d   :  { %606 = vmatprep.mubr.msk.bf16.mxu0 %vm215_vm0, %v655_v14  ;;  %610 = vmatprep.mubr.msk.bf16.mxu1 %vm215_vm0, %v664_v15 }
  0x64   :  { %281 = vmatmul.mubr.bf16.gmra.mrb[4].mxu0 %v657_v16  ;;  %313 = vmatmul.mubr.bf16.gmra.mrb[4].mxu1 %v666_v17 }
  0x65   :  { %607 = vmatprep.mubr.msk.bf16.mxu0 %vm215_vm0, %v661_v18  ;;  %611 = vmatprep.mubr.msk.bf16.mxu1 %vm215_vm0, %v670_v19 }
  0x6c   :  { %289 = vmatmul.mubr.bf16.gmra.mrb[8].mxu0 %v663_v20  ;;  %321 = vmatmul.mubr.bf16.gmra.mrb[8].mxu1 %v672_v21 }
  0x6d   :  { %608 = vmatprep.mubr.msk.bf16.mxu0 %vm215_vm0, %v667_v22  ;;  %612 = vmatprep.mubr.msk.bf16.mxu1 %vm215_vm0, %v673_v23  ;;  %v390_v22 = vlaneseq }
  0x6f   :  { %v391_v23 = vshrl.u32 %v390_v22, 7  ;;  %v483_v22 = vld [vmem:[#allocation6] sm:$0x1] }
  0x74   :  { %297 = vmatmul.mubr.bf16.gmra.mrb[12].mxu0 %v669_v24  ;;  %329 = vmatmul.mubr.bf16.gmra.mrb[12].mxu1 %v675_v25 }
 0x12f   :  { %v884_v26 = vpop.f32.mrb[0].mxu0  ;;  %v886_v27 = vpop.f32.mrb[0].mxu1 }
 0x130   :  { %v276_v28 = vpop.f32.mrb[1].mxu0  ;;  %v308_v29 = vpop.f32.mrb[1].mxu1 }
 0x131   :  { %v888_v30 = vpop.f32.mrb[2].mxu0  ;;  %v890_v31 = vpop.f32.mrb[2].mxu1  ;;  %v939_v29 = vsub.s32 0, %v391_v23 }
 0x132   :  { %v337_v32 = vadd.f32 %v888_v30, %v884_v26  ;;  %v279_v33 = vpop.f32.mrb[3].mxu0  ;;  %v311_v34 = vpop.f32.mrb[3].mxu1 }
 0x133   :  { %v488_v23 = vrot.slane %v483_v22, %v939_v29 }
 0x137   :  { %v894_v35 = vpop.f32.mrb[4].mxu0  ;;  %v896_v36 = vpop.f32.mrb[4].mxu1 }
 0x138   :  { %v338_v37 = vadd.f32 %v337_v32, %v894_v35  ;;  %v284_v38 = vpop.f32.mrb[5].mxu0  ;;  %v316_v39 = vpop.f32.mrb[5].mxu1 }
 0x139   :  { %v899_v40 = vpop.f32.mrb[6].mxu0  ;;  %v901_v41 = vpop.f32.mrb[6].mxu1 }
 0x13a   :  { %v339_v42 = vadd.f32 %v338_v37, %v899_v40  ;;  %v287_v43 = vpop.f32.mrb[7].mxu0  ;;  %v319_v44 = vpop.f32.mrb[7].mxu1 }
 0x13f   :  { %v904_v45 = vpop.f32.mrb[8].mxu0  ;;  %v906_v46 = vpop.f32.mrb[8].mxu1 }
 0x140   :  { %v340_v47 = vadd.f32 %v339_v42, %v904_v45  ;;  %v292_v48 = vpop.f32.mrb[9].mxu0  ;;  %v324_v49 = vpop.f32.mrb[9].mxu1 }
 0x141   :  { %v909_v50 = vpop.f32.mrb[10].mxu0  ;;  %v911_v51 = vpop.f32.mrb[10].mxu1 }
 0x142   :  { %v341_v52 = vadd.f32 %v340_v47, %v909_v50  ;;  %v295_v53 = vpop.f32.mrb[11].mxu0  ;;  %v327_v54 = vpop.f32.mrb[11].mxu1 }
 0x147   :  { %v914_v55 = vpop.f32.mrb[12].mxu0  ;;  %v916_v56 = vpop.f32.mrb[12].mxu1 }
 0x148   :  { %v342_v57 = vadd.f32 %v341_v52, %v914_v55  ;;  %v300_v58 = vpop.f32.mrb[13].mxu0  ;;  %v332_v59 = vpop.f32.mrb[13].mxu1 }
 0x149   :  { %v919_v60 = vpop.f32.mrb[14].mxu0  ;;  %v921_v61 = vpop.f32.mrb[14].mxu1 }
 0x14a   :  { %v343_v62 = vadd.f32 %v342_v57, %v919_v60  ;;  %v303_v63 = vpop.f32.mrb[15].mxu0  ;;  %v335_v0 = vpop.f32.mrb[15].mxu1 }
 0x14c   :  { %v344_v1 = vadd.f32 %v343_v62, %v886_v27 }
 0x14e   :  { %v345_v2 = vadd.f32 %v344_v1, %v890_v31 }
 0x150   :  { %v346_v3 = vadd.f32 %v345_v2, %v896_v36 }
 0x152   :  { %v347_v4 = vadd.f32 %v346_v3, %v901_v41 }
 0x154   :  { %v348_v5 = vadd.f32 %v347_v4, %v906_v46 }
 0x156   :  { %v349_v6 = vadd.f32 %v348_v5, %v911_v51 }
 0x158   :  { %v350_v7 = vadd.f32 %v349_v6, %v916_v56 }
 0x15a   :  { %v351_v8 = vadd.f32 %v350_v7, %v921_v61 }
 0x15c   :  { %v352_v9 = vrot.slane %v351_v8, 4 }
 0x15e   :  { %v353_v10 = vadd.f32 %v352_v9, %v351_v8 }
 0x160   :  { %v354_v11 = vrot.slane %v353_v10, 2 }
 0x162   :  { %v355_v12 = vadd.f32 %v354_v11, %v353_v10 }
 0x164   :  { %v356_v13 = vrot.slane %v355_v12, 1 }
 0x166   :  { %v357_v14 = vadd.f32 %v356_v13, %v355_v12 }
 0x168   :  { %367 = vrot.lane.b32.xlu1 %v357_v14, %s754_s0  ;;  %359 = vrot.lane.b32.xlu0 %v357_v14, %s755_s29 }
 0x16c   :  { %363 = vrot.lane.b32.xlu0 %v357_v14, %s756_s30 }
 0x1da   :  { %v360_v15 = vpop.permute.xlu0 %359  ;;  %v368_v19 = vpop.permute.xlu1 %367 }
 0x1db   :  { %v362_v16 = vadd.f32 %v360_v15, %v357_v14 }
 0x1de   :  { %v364_v17 = vpop.permute.xlu0 %363 }
 0x1df   :  { %v366_v18 = vadd.f32 %v364_v17, %v362_v16 }
 0x1e1   :  { %v370_v20 = vadd.f32 %v368_v19, %v366_v18 }
 0x1e3   :  { %v372_v21 = vmul.f32 0.001953125, %v370_v20 }
 0x1e5   :  { %377 = vrot.lane.b32.xlu0 %v372_v21, %s757_s5  ;;  %374 = vrot.lane.b32.xlu1 %v372_v21, %s758_s6 }
 0x1e9   :  { %380 = vrot.lane.b32.xlu1 %v372_v21, %s759_s7 }
 0x257   :  { %v375_v24 = vpop.permute.xlu1 %374  ;;  %v378_v25 = vpop.permute.xlu0 %377 }
 0x258   :  { %v384_v28 = vsel %vm383_vm1, %v372_v21, %v375_v24 }
 0x259   :  { %v385_v32 = vsel %vm215_vm0, %v384_v28, %v378_v25 }
 0x25b   :  { %v381_v33 = vpop.permute.xlu1 %380 }
 0x25c   :  { %v387_v34 = vsel %vm386_vm2, %v385_v32, %v381_v33 }
 0x25d   :  { %v389_v37 = vsel %vm388_vm3, %v387_v34, 0.0 }
 0x25e   :  { %v393_v38 = vrot.slane %v389_v37, %v939_v29 }
 0x260   :  { %v946_v39 = vsub.f32 %v884_v26, %v393_v38  ;;  %v949_v42 = vsub.f32 %v888_v30, %v393_v38  ;;  %v952_v43 = vsub.f32 %v894_v35, %v393_v38  ;;  %v959_v48 = vsub.f32 %v899_v40, %v393_v38 }
 0x261   :  { %v962_v49 = vsub.f32 %v904_v45, %v393_v38  ;;  %v967_v52 = vsub.f32 %v909_v50, %v393_v38  ;;  %v972_v54 = vsub.f32 %v914_v55, %v393_v38  ;;  %v977_v45 = vsub.f32 %v919_v60, %v393_v38 }
 0x262   :  { %v410_v44 = vmul.f32 %v946_v39, %v946_v39  ;;  %v411_v47 = vmul.f32 %v949_v42, %v949_v42  ;;  %v412_v26 = vmul.f32 %v952_v43, %v952_v43  ;;  %v413_v35 = vmul.f32 %v959_v48, %v959_v48 }
 0x263   :  { %v414_v40 = vmul.f32 %v962_v49, %v962_v49  ;;  %v415_v58 = vmul.f32 %v967_v52, %v967_v52  ;;  %v982_v50 = vsub.f32 %v886_v27, %v393_v38  ;;  %v416_v62 = vmul.f32 %v972_v54, %v972_v54 }
 0x264   :  { %v426_v30 = vadd.f32 %v411_v47, %v410_v44  ;;  %v987_v55 = vsub.f32 %v890_v31, %v393_v38  ;;  %v417_v0 = vmul.f32 %v977_v45, %v977_v45  ;;  %v992_v60 = vsub.f32 %v896_v36, %v393_v38  ;;  %v461_v44 = vld [vmem:[#allocation4] sm:$0x1] }
 0x265   :  { %v418_v2 = vmul.f32 %v982_v50, %v982_v50  ;;  %v997_v27 = vsub.f32 %v901_v41, %v393_v38  ;;  %v1002_v31 = vsub.f32 %v906_v46, %v393_v38  ;;  %v1007_v36 = vsub.f32 %v911_v51, %v393_v38 }
 0x266   :  { %v427_v53 = vadd.f32 %v426_v30, %v412_v26  ;;  %v419_v4 = vmul.f32 %v987_v55, %v987_v55  ;;  %v420_v6 = vmul.f32 %v992_v60, %v992_v60  ;;  %v1012_v41 = vsub.f32 %v916_v56, %v393_v38 }
 0x267   :  { %v421_v8 = vmul.f32 %v997_v27, %v997_v27  ;;  %v422_v10 = vmul.f32 %v1002_v31, %v1002_v31  ;;  %v1017_v46 = vsub.f32 %v921_v61, %v393_v38  ;;  %v423_v12 = vmul.f32 %v1007_v36, %v1007_v36 }
 0x268   :  { %v428_v57 = vadd.f32 %v427_v53, %v413_v35  ;;  %v424_v51 = vmul.f32 %v1012_v41, %v1012_v41 }
 0x269   :  { %v425_v15 = vmul.f32 %v1017_v46, %v1017_v46 }
 0x26a   :  { %v429_v59 = vadd.f32 %v428_v57, %v414_v40 }
 0x26c   :  { %v430_v63 = vadd.f32 %v429_v59, %v415_v58 }
 0x26e   :  { %v431_v1 = vadd.f32 %v430_v63, %v416_v62 }
 0x270   :  { %v432_v3 = vadd.f32 %v431_v1, %v417_v0 }
 0x272   :  { %v433_v5 = vadd.f32 %v432_v3, %v418_v2 }
 0x274   :  { %v434_v7 = vadd.f32 %v433_v5, %v419_v4 }
 0x276   :  { %v435_v9 = vadd.f32 %v434_v7, %v420_v6 }
 0x278   :  { %v436_v11 = vadd.f32 %v435_v9, %v421_v8 }
 0x27a   :  { %v437_v13 = vadd.f32 %v436_v11, %v422_v10 }
 0x27c   :  { %v438_v14 = vadd.f32 %v437_v13, %v423_v12 }
 0x27e   :  { %v439_v56 = vadd.f32 %v438_v14, %v424_v51 }
 0x280   :  { %v440_v16 = vadd.f32 %v439_v56, %v425_v15 }
 0x282   :  { %v441_v17 = vrot.slane %v440_v16, 4 }
 0x284   :  { %v442_v18 = vadd.f32 %v441_v17, %v440_v16 }
 0x286   :  { %v443_v19 = vrot.slane %v442_v18, 2 }
 0x288   :  { %v444_v20 = vadd.f32 %v443_v19, %v442_v18 }
 0x28a   :  { %v445_v21 = vrot.slane %v444_v20, 1 }
 0x28c   :  { %v446_v61 = vadd.f32 %v445_v21, %v444_v20 }
 0x28e   :  { %452 = vrot.lane.b32.xlu1 %v446_v61, %s756_s30  ;;  %448 = vrot.lane.b32.xlu0 %v446_v61, %s755_s29 }
 0x292   :  { %456 = vrot.lane.b32.xlu0 %v446_v61, %s754_s0 }
 0x296   :  { %489 = vrot.lane.b32.xlu0 %v488_v23, %s758_s6 }
 0x300   :  { %v449_v24 = vpop.permute.xlu0 %448  ;;  %v453_v28 = vpop.permute.xlu1 %452 }
 0x301   :  { %v451_v25 = vadd.f32 %v449_v24, %v446_v61 }
 0x303   :  { %v455_v32 = vadd.f32 %v453_v28, %v451_v25 }
 0x304   :  { %v457_v33 = vpop.permute.xlu0 %456 }
 0x305   :  { %v459_v34 = vadd.f32 %v457_v33, %v455_v32 }
 0x307   :  { %v460_v37 = vmul.f32 0.001953125, %v459_v34 }
 0x308   :  { %v490_v35 = vpop.permute.xlu0 %489 }
 0x309   :  { %v462_v38 = vadd.f32 1e-05, %v460_v37  ;;  %v498_v3 = vsel %vm383_vm1, %v483_v22, %v490_v35 }
 0x30b   :  { %676 = vrsqrt.f32 %v462_v38 }
 0x315   :  { %v677_v47 = vpop.eup %676 }
 0x316   :  { %v464_v26 = vmul.f32 %v677_v47, %v461_v44 }
 0x318   :  { %v469_v30 = vrot.slane %v464_v26, %v939_v29 }
 0x31a   :  { %473 = vrot.lane.b32.xlu0 %v469_v30, %s757_s5  ;;  %470 = vrot.lane.b32.xlu1 %v469_v30, %s758_s6 }
 0x31e   :  { %476 = vrot.lane.b32.xlu1 %v469_v30, %s759_s7  ;;  %495 = vrot.lane.b32.xlu0 %v488_v23, %s759_s7 }
 0x322   :  { %492 = vrot.lane.b32.xlu1 %v488_v23, %s757_s5 }
 0x38c   :  { %v471_v53 = vpop.permute.xlu1 %470  ;;  %v474_v57 = vpop.permute.xlu0 %473 }
 0x38d   :  { %v479_v40 = vsel %vm383_vm1, %v464_v26, %v471_v53 }
 0x38e   :  { %v480_v58 = vsel %vm215_vm0, %v479_v40, %v474_v57 }
 0x390   :  { %v477_v59 = vpop.permute.xlu1 %476  ;;  %v496_v2 = vpop.permute.xlu0 %495 }
 0x391   :  { %v481_v62 = vsel %vm386_vm2, %v480_v58, %v477_v59 }
 0x392   :  { %v482_v63 = vsel %vm388_vm3, %v481_v62, 0.0 }
 0x393   :  { %v505_v0 = vrot.slane %v482_v63, %v939_v29 }
 0x394   :  { %v493_v1 = vpop.permute.xlu1 %492 }
 0x395   :  { %v506_v4 = vmul.f32 %v505_v0, %v946_v39  ;;  %v507_v5 = vmul.f32 %v505_v0, %v949_v42  ;;  %v508_v6 = vmul.f32 %v505_v0, %v952_v43  ;;  %v499_v7 = vsel %vm215_vm0, %v498_v3, %v493_v1 }
 0x396   :  { %v509_v8 = vmul.f32 %v505_v0, %v959_v48  ;;  %v510_v9 = vmul.f32 %v505_v0, %v962_v49  ;;  %v511_v10 = vmul.f32 %v505_v0, %v967_v52  ;;  %v500_v11 = vsel %vm386_vm2, %v499_v7, %v496_v2 }
 0x397   :  { %v512_v12 = vmul.f32 %v505_v0, %v972_v54  ;;  %v513_v13 = vmul.f32 %v505_v0, %v977_v45  ;;  %v514_v39 = vmul.f32 %v505_v0, %v982_v50  ;;  %v501_v42 = vsel %vm388_vm3, %v500_v11, 0.0 }
 0x398   :  { %v515_v43 = vmul.f32 %v505_v0, %v987_v55  ;;  %v516_v51 = vmul.f32 %v505_v0, %v992_v60  ;;  %v517_v48 = vmul.f32 %v505_v0, %v997_v27  ;;  %v525_v49 = vrot.slane %v501_v42, %v939_v29 }
 0x399   :  { %v518_v52 = vmul.f32 %v505_v0, %v1002_v31  ;;  %v519_v14 = vmul.f32 %v505_v0, %v1007_v36  ;;  %v520_v54 = vmul.f32 %v505_v0, %v1012_v41  ;;  %v521_v45 = vmul.f32 %v505_v0, %v1017_v46 }
 0x39a   :  { %v526_v15 = vadd.f32 %v525_v49, %v506_v4  ;;  %v527_v50 = vadd.f32 %v525_v49, %v507_v5  ;;  %v528_v56 = vadd.f32 %v525_v49, %v508_v6  ;;  %v529_v16 = vadd.f32 %v525_v49, %v509_v8 }
 0x39b   :  { %v530_v17 = vadd.f32 %v525_v49, %v510_v9  ;;  %v531_v55 = vadd.f32 %v525_v49, %v511_v10  ;;  %v532_v18 = vadd.f32 %v525_v49, %v512_v12  ;;  %v533_v60 = vadd.f32 %v525_v49, %v513_v13 }
 0x39c   :  { %v534_v19 = vadd.f32 %v525_v49, %v514_v39  ;;  %v535_v27 = vadd.f32 %v525_v49, %v515_v43  ;;  %v536_v20 = vadd.f32 %v525_v49, %v516_v51  ;;  %v537_v29 = vadd.f32 %v525_v49, %v517_v48 }
 0x39d   :  { %v538_v21 = vadd.f32 %v525_v49, %v518_v52  ;;  %v539_v31 = vadd.f32 %v525_v49, %v519_v14  ;;  %v540_v61 = vadd.f32 %v525_v49, %v520_v54  ;;  %v541_v36 = vadd.f32 %v525_v49, %v521_v45 }
 0x39e   :  { %v542_v22 = vmax.f32 %v526_v15, 0.0  ;;  %v543_v41 = vmax.f32 %v527_v50, 0.0  ;;  %v544_v23 = vmax.f32 %v528_v56, 0.0  ;;  %v545_v46 = vmax.f32 %v529_v16, 0.0 }
 0x39f   :  { %v546_v24 = vmax.f32 %v530_v17, 0.0  ;;  %v547_v25 = vmax.f32 %v531_v55, 0.0  ;;  %v548_v28 = vmax.f32 %v532_v18, 0.0  ;;  %v549_v32 = vmax.f32 %v533_v60, 0.0 }
 0x3a0   :  { %v550_v33 = vmax.f32 %v534_v19, 0.0  ;;  %v551_v34 = vmax.f32 %v535_v27, 0.0  ;;  %v552_v37 = vmax.f32 %v536_v20, 0.0  ;;  %v553_v38 = vmax.f32 %v537_v29, 0.0  ;;  %558 = vst [vmem:[%s1114_s4] sm:$0xff] %v542_v22  ;;  %559 = vst [vmem:[%s1114_s4 + $0x8] sm:$0xff] %v543_v41 }
 0x3a1   :  { %560 = vst [vmem:[%s1114_s4 + $0x10] sm:$0xff] %v544_v23  ;;  %561 = vst [vmem:[%s1114_s4 + $0x18] sm:$0xff] %v545_v46  ;;  %v554_v44 = vmax.f32 %v538_v21, 0.0  ;;  %v555_v47 = vmax.f32 %v539_v31, 0.0  ;;  %v556_v26 = vmax.f32 %v540_v61, 0.0  ;;  %v557_v30 = vmax.f32 %v541_v36, 0.0 }
 0x3a2   :  { %562 = vst [vmem:[%s1114_s4 + $0x20] sm:$0xff] %v546_v24  ;;  %563 = vst [vmem:[%s1114_s4 + $0x28] sm:$0xff] %v547_v25 }
 0x3a3   :  { %564 = vst [vmem:[%s1114_s4 + $0x30] sm:$0xff] %v548_v28  ;;  %565 = vst [vmem:[%s1114_s4 + $0x38] sm:$0xff] %v549_v32 }
 0x3a4   :  { %566 = vst [vmem:[%s1114_s4 + $0x40] sm:$0xff] %v550_v33  ;;  %567 = vst [vmem:[%s1114_s4 + $0x48] sm:$0xff] %v551_v34 }
 0x3a5   :  { %568 = vst [vmem:[%s1114_s4 + $0x50] sm:$0xff] %v552_v37  ;;  %569 = vst [vmem:[%s1114_s4 + $0x58] sm:$0xff] %v553_v38 }
 0x3a6   :  { %570 = vst [vmem:[%s1114_s4 + $0x60] sm:$0xff] %v554_v44  ;;  %571 = vst [vmem:[%s1114_s4 + $0x68] sm:$0xff] %v555_v47 }
 0x3a7   :  { %572 = vst [vmem:[%s1114_s4 + $0x70] sm:$0xff] %v556_v26  ;;  %573 = vst [vmem:[%s1114_s4 + $0x78] sm:$0xff] %v557_v30 }
 0x3a8   :  { %578 = vsyncpa [#allocation3], 1 }
 0x3a9   :  { %579 = vsyncpa [#allocation5], 1 }

// kernel: _lambda_.8
= control target key start
LH: loop header
LB: loop body
LE: loop exit
PB: predicated region body
PF: predicated region fallthrough
CT: control target
= control target key end

     0   :  { %vm278_vm0 = vcmask 588800   ;;  %vm375_vm1 = vcmask 1043456   ;;  %s1532_s8 = smov 124   ;;  %s1533_s9 = smov 120   ;;  %vm762_vm2 = vcmask 31744   ;;  %vm764_vm3 = vcmask 64512   ;;  %s3095_s1 = inlined_call_operand.vmem [shape: bf16[72,128], index: 1, kind: input, shape index: {}]   ;;  %s3096_s0 = inlined_call_operand.vmem [shape: bf16[512,72], index: 0, kind: input, shape index: {}]   ;;  %s3097_s3 = inlined_call_operand.vmem [shape: f32[1,4], index: 3, kind: input, shape index: {}]   ;;  %s3098_s2 = inlined_call_operand.vmem [shape: f32[1,4], index: 2, kind: input, shape index: {}]   ;;  %s3099_s4 = inlined_call_operand.vmem [shape: f32[512,128], index: 4, kind: output, shape index: {}]  }
   0x1   :  { %v1492_v0 = vld [vmem:[%s3095_s1] sm:$0xff]   ;;  %v1493_v1 = vld [vmem:[%s3095_s1 + $0x8] sm:$0xff]   ;;  %v1494_v2 = vld [vmem:[%s3095_s1 + $0x10] sm:$0xff]   ;;  %s1534_s10 = smov 8   ;;  %s1535_s11 = smov 4   ;;  %vm766_vm4 = vcmask 97280  }
   0x2   :  { %1400 = vmatprep.subr.bf16.mxu0 %v1492_v0  ;;  %1474 = vmatprep.subr.bf16.mxu1 %v1492_v0  ;;  %v1497_v3 = vld [vmem:[%s3096_s0] sm:$0xff]   ;;  %v1495_v4 = vld [vmem:[%s3095_s1 + $0x18] sm:$0xff]   ;;  %v1498_v7 = vld [vmem:[%s3096_s0 + $0x8] sm:$0xff]   ;;  %s1536_s12 = smov 12   ;;  %vm768_vm5 = vcmask 130048  }
   0x3   :  { %1401 = vmatpush3.bf16.msra.mxu0 %v1492_v0  ;;  %1479 = vmatpush3.bf16.msra.mxu1 %v1492_v0  ;;  %v1496_v5 = vld [vmem:[%s3095_s1 + $0x20] ss:$0 sps:$4 sm:$0xff]   ;;  %v1499_v8 = vld [vmem:[%s3096_s0 + $0x10] sm:$0xff]   ;;  %v1514_v10 = vld [vmem:[%s3096_s0 + $0x88] sm:$0xff]  }
   0x4   :  { %1402 = vmatprep.subr.bf16.mxu0 %v1493_v1  ;;  %1475 = vmatprep.subr.bf16.mxu1 %v1493_v1  ;;  %v377_v6 = vsel %vm375_vm1, %v1496_v5, 0  ;;  %v1513_v9 = vld [vmem:[%s3096_s0 + $0x80] sm:$0xff]   ;;  %v1515_v11 = vld [vmem:[%s3096_s0 + $0x90] sm:$0xff]   ;;  %v1500_v12 = vld [vmem:[%s3096_s0 + $0x18] sm:$0xff]  }
   0x5   :  { %1410 = vmatprep.mubr.msk.bf16.mxu0 %vm278_vm0, %v1497_v3  ;;  %1442 = vmatprep.mubr.msk.bf16.mxu1 %vm278_vm0, %v1513_v9  ;;  %v1501_v13 = vld [vmem:[%s3096_s0 + $0x20] sm:$0xff]   ;;  %v1516_v14 = vld [vmem:[%s3096_s0 + $0x98] sm:$0xff]   ;;  %v1502_v16 = vld [vmem:[%s3096_s0 + $0x28] sm:$0xff]  }
   0x6   :  { %v1517_v15 = vld [vmem:[%s3096_s0 + $0xa0] sm:$0xff]   ;;  %v1503_v17 = vld [vmem:[%s3096_s0 + $0x30] sm:$0xff]   ;;  %v1518_v18 = vld [vmem:[%s3096_s0 + $0xa8] sm:$0xff]  }
   0x7   :  { %1403 = vmatpush3.bf16.msra.mxu0 %v1493_v1  ;;  %1480 = vmatpush3.bf16.msra.mxu1 %v1493_v1  ;;  %v1519_v19 = vld [vmem:[%s3096_s0 + $0xb0] sm:$0xff]   ;;  %v1504_v20 = vld [vmem:[%s3096_s0 + $0x38] sm:$0xff]   ;;  %v1505_v21 = vld [vmem:[%s3096_s0 + $0x40] sm:$0xff]  }
   0x8   :  { %1404 = vmatprep.subr.bf16.mxu0 %v1494_v2  ;;  %1476 = vmatprep.subr.bf16.mxu1 %v1494_v2  ;;  %v1520_v22 = vld [vmem:[%s3096_s0 + $0xb8] sm:$0xff]   ;;  %v1521_v23 = vld [vmem:[%s3096_s0 + $0xc0] sm:$0xff]   ;;  %v1506_v24 = vld [vmem:[%s3096_s0 + $0x48] sm:$0xff]  }
   0x9   :  { %v1507_v25 = vld [vmem:[%s3096_s0 + $0x50] sm:$0xff]   ;;  %v1522_v26 = vld [vmem:[%s3096_s0 + $0xc8] sm:$0xff]   ;;  %v1508_v28 = vld [vmem:[%s3096_s0 + $0x58] sm:$0xff]  }
   0xa   :  { %v1523_v27 = vld [vmem:[%s3096_s0 + $0xd0] sm:$0xff]   ;;  %v1509_v29 = vld [vmem:[%s3096_s0 + $0x60] sm:$0xff]   ;;  %v1524_v30 = vld [vmem:[%s3096_s0 + $0xd8] sm:$0xff]  }
   0xb   :  { %1405 = vmatpush3.bf16.msra.mxu0 %v1494_v2  ;;  %1481 = vmatpush3.bf16.msra.mxu1 %v1494_v2  ;;  %v1525_v31 = vld [vmem:[%s3096_s0 + $0xe0] sm:$0xff]   ;;  %v1510_v32 = vld [vmem:[%s3096_s0 + $0x68] sm:$0xff]   ;;  %v1511_v33 = vld [vmem:[%s3096_s0 + $0x70] sm:$0xff]  }
   0xc   :  { %1406 = vmatprep.subr.bf16.mxu0 %v1495_v4  ;;  %1477 = vmatprep.subr.bf16.mxu1 %v1495_v4  ;;  %v1526_v34 = vld [vmem:[%s3096_s0 + $0xe8] sm:$0xff]   ;;  %v1527_v35 = vld [vmem:[%s3096_s0 + $0xf0] sm:$0xff]   ;;  %v1512_v36 = vld [vmem:[%s3096_s0 + $0x78] sm:$0xff]  }
   0xd   :  { %v1528_v37 = vld [vmem:[%s3096_s0 + $0xf8] sm:$0xff]   ;;  %s1531_s0 = smov 116  }
   0xf   :  { %1407 = vmatpush3.bf16.msra.mxu0 %v1495_v4  ;;  %1482 = vmatpush3.bf16.msra.mxu1 %v1495_v4 }
  0x10   :  { %1484 = vmatprep.subr.msk.bf16.mxu0 %vm375_vm1, %v1496_v5  ;;  %1485 = vmatprep.subr.msk.bf16.mxu1 %vm375_vm1, %v1496_v5 }
  0x13   :  { %1409 = vmatpush3.bf16.msra.mxu0 %v377_v6  ;;  %1483 = vmatpush3.bf16.msra.mxu1 %v377_v6 }
  0x16   :  { %1411 = vmatmul.mubr.msk.bf16.vlgmr.msra.gmra.mrb[0].mxu0 %vm278_vm0, %v1498_v7  ;;  %1443 = vmatmul.mubr.msk.bf16.vlgmr.msra.gmra.mrb[0].mxu1 %vm278_vm0, %v1514_v10 }
  0x17   :  { %1414 = vmatprep.mubr.msk.bf16.mxu0 %vm278_vm0, %v1499_v8  ;;  %1446 = vmatprep.mubr.msk.bf16.mxu1 %vm278_vm0, %v1515_v11 }
  0x1e   :  { %1415 = vmatmul.mubr.msk.bf16.gmra.mrb[4].mxu0 %vm278_vm0, %v1500_v12  ;;  %1447 = vmatmul.mubr.msk.bf16.gmra.mrb[4].mxu1 %vm278_vm0, %v1516_v14 }
  0x1f   :  { %1418 = vmatprep.mubr.msk.bf16.mxu0 %vm278_vm0, %v1501_v13  ;;  %1450 = vmatprep.mubr.msk.bf16.mxu1 %vm278_vm0, %v1517_v15 }
  0x26   :  { %1419 = vmatmul.mubr.msk.bf16.gmra.mrb[8].mxu0 %vm278_vm0, %v1502_v16  ;;  %1451 = vmatmul.mubr.msk.bf16.gmra.mrb[8].mxu1 %vm278_vm0, %v1518_v18 }
  0x27   :  { %1422 = vmatprep.mubr.msk.bf16.mxu0 %vm278_vm0, %v1503_v17  ;;  %1454 = vmatprep.mubr.msk.bf16.mxu1 %vm278_vm0, %v1519_v19 }
  0x2e   :  { %1423 = vmatmul.mubr.msk.bf16.gmra.mrb[12].mxu0 %vm278_vm0, %v1504_v20  ;;  %1455 = vmatmul.mubr.msk.bf16.gmra.mrb[12].mxu1 %vm278_vm0, %v1520_v22 }
  0x2f   :  { %1426 = vmatprep.mubr.msk.bf16.mxu0 %vm278_vm0, %v1505_v21  ;;  %1458 = vmatprep.mubr.msk.bf16.mxu1 %vm278_vm0, %v1521_v23 }
  0x36   :  { %1427 = vmatmul.mubr.msk.bf16.gmra.mrb[16].mxu0 %vm278_vm0, %v1506_v24  ;;  %1459 = vmatmul.mubr.msk.bf16.gmra.mrb[16].mxu1 %vm278_vm0, %v1522_v26 }
  0x37   :  { %1430 = vmatprep.mubr.msk.bf16.mxu0 %vm278_vm0, %v1507_v25  ;;  %1462 = vmatprep.mubr.msk.bf16.mxu1 %vm278_vm0, %v1523_v27 }
  0x3e   :  { %1431 = vmatmul.mubr.msk.bf16.gmra.mrb[20].mxu0 %vm278_vm0, %v1508_v28  ;;  %1463 = vmatmul.mubr.msk.bf16.gmra.mrb[20].mxu1 %vm278_vm0, %v1524_v30 }
  0x3f   :  { %1434 = vmatprep.mubr.msk.bf16.mxu0 %vm278_vm0, %v1509_v29  ;;  %1466 = vmatprep.mubr.msk.bf16.mxu1 %vm278_vm0, %v1525_v31 }
  0x46   :  { %1435 = vmatmul.mubr.msk.bf16.gmra.mrb[24].mxu0 %vm278_vm0, %v1510_v32  ;;  %1467 = vmatmul.mubr.msk.bf16.gmra.mrb[24].mxu1 %vm278_vm0, %v1526_v34 }
  0x47   :  { %1438 = vmatprep.mubr.msk.bf16.mxu0 %vm278_vm0, %v1511_v33  ;;  %1470 = vmatprep.mubr.msk.bf16.mxu1 %vm278_vm0, %v1527_v35 }
  0x4e   :  { %1439 = vmatmul.mubr.msk.bf16.gmra.mrb[28].mxu0 %vm278_vm0, %v1512_v36  ;;  %1471 = vmatmul.mubr.msk.bf16.gmra.mrb[28].mxu1 %vm278_vm0, %v1528_v37 }
  0xe9   :  { %v1705_v38 = vpop.f32.mrb[0].mxu0  ;;  %v1711_v41 = vpop.f32.mrb[0].mxu1 }
  0xea   :  { %v1707_v39 = vpop.f32.mrb[1].mxu0  ;;  %v1715_v43 = vpop.f32.mrb[1].mxu1 }
  0xeb   :  { %v1709_v40 = vpop.f32.mrb[2].mxu0  ;;  %3132 = vst [vmem:[#allocation2_spill] sm:$0xff] %v1715_v43  ;;  %v1719_v45 = vpop.f32.mrb[2].mxu1 }
  0xec   :  { %v1713_v42 = vpop.f32.mrb[3].mxu0  ;;  %v1721_v46 = vpop.f32.mrb[3].mxu1 }
  0xed   :  { %v668_v44 = vadd.f32 %v1713_v42, %v1707_v39 }
  0xef   :  { %v669_v47 = vadd.f32 %v1705_v38, %v668_v44 }
  0xf1   :  { %v1724_v48 = vpop.f32.mrb[4].mxu0  ;;  %v670_v49 = vadd.f32 %v1709_v40, %v669_v47  ;;  %v1732_v53 = vpop.f32.mrb[4].mxu1 }
  0xf2   :  { %v1727_v50 = vpop.f32.mrb[5].mxu0  ;;  %v1736_v55 = vpop.f32.mrb[5].mxu1 }
  0xf3   :  { %v671_v51 = vadd.f32 %v670_v49, %v1727_v50  ;;  %v1730_v52 = vpop.f32.mrb[6].mxu0  ;;  %v1739_v57 = vpop.f32.mrb[6].mxu1 }
  0xf4   :  { %v1734_v54 = vpop.f32.mrb[7].mxu0  ;;  %v1741_v58 = vpop.f32.mrb[7].mxu1 }
  0xf5   :  { %v672_v56 = vadd.f32 %v671_v51, %v1734_v54 }
  0xf7   :  { %v673_v59 = vadd.f32 %v1724_v48, %v672_v56 }
  0xf9   :  { %v1744_v60 = vpop.f32.mrb[8].mxu0  ;;  %v674_v61 = vadd.f32 %v1730_v52, %v673_v59  ;;  %v1752_v1 = vpop.f32.mrb[8].mxu1 }
  0xfa   :  { %v1747_v62 = vpop.f32.mrb[9].mxu0  ;;  %v1756_v3 = vpop.f32.mrb[9].mxu1 }
  0xfb   :  { %v675_v63 = vadd.f32 %v674_v61, %v1747_v62  ;;  %v1750_v0 = vpop.f32.mrb[10].mxu0  ;;  %v1759_v5 = vpop.f32.mrb[10].mxu1 }
  0xfc   :  { %v1754_v2 = vpop.f32.mrb[11].mxu0  ;;  %v1761_v6 = vpop.f32.mrb[11].mxu1 }
  0xfd   :  { %v676_v4 = vadd.f32 %v675_v63, %v1754_v2 }
  0xff   :  { %v677_v7 = vadd.f32 %v1744_v60, %v676_v4 }
 0x101   :  { %v1764_v8 = vpop.f32.mrb[12].mxu0  ;;  %v678_v9 = vadd.f32 %v1750_v0, %v677_v7  ;;  %v1772_v13 = vpop.f32.mrb[12].mxu1 }
 0x102   :  { %v1767_v10 = vpop.f32.mrb[13].mxu0  ;;  %v1776_v15 = vpop.f32.mrb[13].mxu1 }
 0x103   :  { %v679_v11 = vadd.f32 %v678_v9, %v1767_v10  ;;  %v1770_v12 = vpop.f32.mrb[14].mxu0  ;;  %v1779_v17 = vpop.f32.mrb[14].mxu1 }
 0x104   :  { %v1774_v14 = vpop.f32.mrb[15].mxu0  ;;  %v1781_v18 = vpop.f32.mrb[15].mxu1 }
 0x105   :  { %v680_v16 = vadd.f32 %v679_v11, %v1774_v14 }
 0x107   :  { %v681_v19 = vadd.f32 %v1764_v8, %v680_v16 }
 0x109   :  { %v1784_v20 = vpop.f32.mrb[16].mxu0  ;;  %v682_v21 = vadd.f32 %v1770_v12, %v681_v19  ;;  %v1792_v25 = vpop.f32.mrb[16].mxu1 }
 0x10a   :  { %v1787_v22 = vpop.f32.mrb[17].mxu0  ;;  %v1796_v27 = vpop.f32.mrb[17].mxu1 }
 0x10b   :  { %v683_v23 = vadd.f32 %v682_v21, %v1787_v22  ;;  %v1790_v24 = vpop.f32.mrb[18].mxu0  ;;  %v1799_v29 = vpop.f32.mrb[18].mxu1 }
 0x10c   :  { %3133 = vst [vmem:[#allocation3_spill] sm:$0xff] %v1790_v24  ;;  %v1794_v26 = vpop.f32.mrb[19].mxu0  ;;  %v1801_v30 = vpop.f32.mrb[19].mxu1 }
 0x10d   :  { %v684_v28 = vadd.f32 %v683_v23, %v1794_v26 }
 0x10f   :  { %v685_v31 = vadd.f32 %v1784_v20, %v684_v28 }
 0x111   :  { %v1804_v32 = vpop.f32.mrb[20].mxu0  ;;  %v686_v33 = vadd.f32 %v1790_v24, %v685_v31  ;;  %v1812_v37 = vpop.f32.mrb[20].mxu1 }
 0x112   :  { %3134 = vst [vmem:[#allocation4_spill] sm:$0xff] %v1804_v32  ;;  %v1807_v34 = vpop.f32.mrb[21].mxu0  ;;  %v1816_v47 = vpop.f32.mrb[21].mxu1 }
 0x113   :  { %3135 = vst [vmem:[#allocation5_spill] sm:$0xff] %v1807_v34  ;;  %v687_v35 = vadd.f32 %v686_v33, %v1807_v34  ;;  %v1810_v36 = vpop.f32.mrb[22].mxu0  ;;  %v1819_v51 = vpop.f32.mrb[22].mxu1 }
 0x114   :  { %3136 = vst [vmem:[#allocation6_spill] sm:$0xff] %v1810_v36  ;;  %v1814_v44 = vpop.f32.mrb[23].mxu0  ;;  %v1821_v56 = vpop.f32.mrb[23].mxu1 }
 0x115   :  { %3137 = vst [vmem:[#allocation7_spill] sm:$0xff] %v1814_v44  ;;  %v688_v49 = vadd.f32 %v687_v35, %v1814_v44 }
 0x117   :  { %v689_v59 = vadd.f32 %v1804_v32, %v688_v49 }
 0x119   :  { %v1824_v61 = vpop.f32.mrb[24].mxu0  ;;  %v690_v63 = vadd.f32 %v1810_v36, %v689_v59  ;;  %v1832_v11 = vpop.f32.mrb[24].mxu1 }
 0x11a   :  { %3138 = vst [vmem:[#allocation8_spill] sm:$0xff] %v1824_v61  ;;  %v1827_v4 = vpop.f32.mrb[25].mxu0  ;;  %v1836_v19 = vpop.f32.mrb[25].mxu1 }
 0x11b   :  { %3139 = vst [vmem:[#allocation9_spill] sm:$0xff] %v1827_v4  ;;  %v691_v7 = vadd.f32 %v690_v63, %v1827_v4  ;;  %v1830_v9 = vpop.f32.mrb[26].mxu0  ;;  %v1839_v23 = vpop.f32.mrb[26].mxu1 }
 0x11c   :  { %3140 = vst [vmem:[#allocation10_spill] sm:$0xff] %v1830_v9  ;;  %v1834_v16 = vpop.f32.mrb[27].mxu0  ;;  %v1841_v28 = vpop.f32.mrb[27].mxu1 }
 0x11d   :  { %3141 = vst [vmem:[#allocation11_spill] sm:$0xff] %v1834_v16  ;;  %v692_v21 = vadd.f32 %v691_v7, %v1834_v16 }
 0x11f   :  { %v693_v31 = vadd.f32 %v1824_v61, %v692_v21 }
 0x121   :  { %v1844_v33 = vpop.f32.mrb[28].mxu0  ;;  %v694_v35 = vadd.f32 %v1830_v9, %v693_v31  ;;  %v1852_v4 = vpop.f32.mrb[28].mxu1 }
 0x122   :  { %3142 = vst [vmem:[#allocation12_spill] sm:$0xff] %v1844_v33  ;;  %v1847_v49 = vpop.f32.mrb[29].mxu0  ;;  %v1856_v7 = vpop.f32.mrb[29].mxu1 }
 0x123   :  { %3143 = vst [vmem:[#allocation13_spill] sm:$0xff] %v1847_v49  ;;  %v695_v59 = vadd.f32 %v694_v35, %v1847_v49  ;;  %v1850_v63 = vpop.f32.mrb[30].mxu0  ;;  %v1859_v32 = vpop.f32.mrb[30].mxu1 }
 0x124   :  { %3144 = vst [vmem:[#allocation14_spill] sm:$0xff] %v1850_v63  ;;  %v1854_v36 = vpop.f32.mrb[31].mxu0  ;;  %v1861_v21 = vpop.f32.mrb[31].mxu1 }
 0x125   :  { %3145 = vst [vmem:[#allocation15_spill] sm:$0xff] %v1854_v36  ;;  %v696_v16 = vadd.f32 %v695_v59, %v1854_v36 }
 0x127   :  { %v697_v31 = vadd.f32 %v1844_v33, %v696_v16 }
 0x129   :  { %v698_v9 = vadd.f32 %v1850_v63, %v697_v31 }
 0x12b   :  { %v699_v35 = vadd.f32 %v698_v9, %v1715_v43 }
 0x12d   :  { %v700_v49 = vadd.f32 %v699_v35, %v1721_v46 }
 0x12f   :  { %v701_v61 = vadd.f32 %v1711_v41, %v700_v49 }
 0x131   :  { %v702_v44 = vadd.f32 %v1719_v45, %v701_v61 }
 0x133   :  { %v703_v34 = vadd.f32 %v702_v44, %v1736_v55 }
 0x135   :  { %v704_v59 = vadd.f32 %v703_v34, %v1741_v58 }
 0x137   :  { %v705_v36 = vadd.f32 %v1732_v53, %v704_v59 }
 0x139   :  { %v706_v24 = vadd.f32 %v1739_v57, %v705_v36 }
 0x13b   :  { %v707_v16 = vadd.f32 %v706_v24, %v1756_v3 }
 0x13d   :  { %v708_v31 = vadd.f32 %v707_v16, %v1761_v6 }
 0x13f   :  { %v709_v9 = vadd.f32 %v1752_v1, %v708_v31 }
 0x141   :  { %v710_v35 = vadd.f32 %v1759_v5, %v709_v9 }
 0x143   :  { %v711_v49 = vadd.f32 %v710_v35, %v1776_v15 }
 0x145   :  { %v712_v61 = vadd.f32 %v711_v49, %v1781_v18 }
 0x147   :  { %v713_v44 = vadd.f32 %v1772_v13, %v712_v61 }
 0x149   :  { %v714_v34 = vadd.f32 %v1779_v17, %v713_v44 }
 0x14b   :  { %v715_v59 = vadd.f32 %v714_v34, %v1796_v27 }
 0x14d   :  { %v716_v36 = vadd.f32 %v715_v59, %v1801_v30 }
 0x14f   :  { %v717_v24 = vadd.f32 %v1792_v25, %v716_v36 }
 0x151   :  { %v718_v16 = vadd.f32 %v1799_v29, %v717_v24 }
 0x153   :  { %v719_v31 = vadd.f32 %v718_v16, %v1816_v47 }
 0x155   :  { %v720_v9 = vadd.f32 %v719_v31, %v1821_v56 }
 0x157   :  { %v721_v35 = vadd.f32 %v1812_v37, %v720_v9 }
 0x159   :  { %v722_v49 = vadd.f32 %v1819_v51, %v721_v35 }
 0x15b   :  { %v723_v61 = vadd.f32 %v722_v49, %v1836_v19 }
 0x15d   :  { %v724_v44 = vadd.f32 %v723_v61, %v1841_v28 }
 0x15f   :  { %v725_v34 = vadd.f32 %v1832_v11, %v724_v44 }
 0x161   :  { %v726_v59 = vadd.f32 %v1839_v23, %v725_v34 }
 0x163   :  { %v727_v36 = vadd.f32 %v726_v59, %v1856_v7 }
 0x165   :  { %v728_v24 = vadd.f32 %v727_v36, %v1861_v21 }
 0x167   :  { %v729_v16 = vadd.f32 %v1852_v4, %v728_v24 }
 0x169   :  { %v730_v31 = vadd.f32 %v1859_v32, %v729_v16 }
 0x16b   :  { %v731_v43 = vrot.slane %v730_v31, 4 }
 0x16d   :  { %v732_v9 = vadd.f32 %v731_v43, %v730_v31 }
 0x16f   :  { %v733_v63 = vrot.slane %v732_v9, 2 }
 0x171   :  { %v734_v35 = vadd.f32 %v733_v63, %v732_v9  ;;  %v770_v63 = vlaneseq }
 0x173   :  { %v735_v33 = vrot.slane %v734_v35, 1 }
 0x175   :  { %v736_v49 = vadd.f32 %v735_v33, %v734_v35  ;;  %v771_v35 = vshrl.u32 %v770_v63, 7 }
 0x177   :  { %746 = vrot.lane.b32.xlu1 %v736_v49, %s1531_s0  ;;  %738 = vrot.lane.b32.xlu0 %v736_v49, %s1532_s8 }
 0x17b   :  { %742 = vrot.lane.b32.xlu0 %v736_v49, %s1533_s9 }
 0x1e9   :  { %v739_v61 = vpop.permute.xlu0 %738  ;;  %v747_v36 = vpop.permute.xlu1 %746 }
 0x1ea   :  { %v741_v44 = vadd.f32 %v739_v61, %v736_v49 }
 0x1ed   :  { %v743_v34 = vpop.permute.xlu0 %742 }
 0x1ee   :  { %v745_v59 = vadd.f32 %v743_v34, %v741_v44  ;;  %v1906_v44 = vsub.s32 0, %v771_v35 }
 0x1f0   :  { %v749_v24 = vadd.f32 %v747_v36, %v745_v59 }
 0x1f2   :  { %v751_v43 = vmul.f32 0.00048828125, %v749_v24 }
 0x1f4   :  { %756 = vrot.lane.b32.xlu0 %v751_v43, %s1534_s10  ;;  %753 = vrot.lane.b32.xlu1 %v751_v43, %s1535_s11 }
 0x1f8   :  { %759 = vrot.lane.b32.xlu1 %v751_v43, %s1536_s12 }
 0x266   :  { %v754_v33 = vpop.permute.xlu1 %753  ;;  %v757_v16 = vpop.permute.xlu0 %756 }
 0x267   :  { %v763_v31 = vsel %vm762_vm2, %v751_v43, %v754_v33 }
 0x268   :  { %v765_v49 = vsel %vm764_vm3, %v763_v31, %v757_v16 }
 0x26a   :  { %v760_v9 = vpop.permute.xlu1 %759 }
 0x26b   :  { %v767_v61 = vsel %vm766_vm4, %v765_v49, %v760_v9 }
 0x26c   :  { %v769_v34 = vsel %vm768_vm5, %v767_v61, 0.0 }
 0x26d   :  { %v1910_v59 = vrot.slane %v769_v34, %v1906_v44 }
 0x26f   :  { %v1914_v36 = vsub.f32 %v1721_v46, %v1910_v59  ;;  %v1918_v24 = vsub.f32 %v1711_v41, %v1910_v59  ;;  %v1922_v43 = vsub.f32 %v1719_v45, %v1910_v59  ;;  %v1926_v33 = vsub.f32 %v1736_v55, %v1910_v59 }
 0x270   :  { %v1930_v63 = vsub.f32 %v1741_v58, %v1910_v59  ;;  %v1934_v46 = vsub.f32 %v1732_v53, %v1910_v59  ;;  %v1938_v41 = vsub.f32 %v1739_v57, %v1910_v59  ;;  %v1942_v45 = vsub.f32 %v1756_v3, %v1910_v59 }
 0x271   :  { %v1946_v55 = vsub.f32 %v1761_v6, %v1910_v59  ;;  %v1950_v58 = vsub.f32 %v1752_v1, %v1910_v59  ;;  %v1954_v53 = vsub.f32 %v1759_v5, %v1910_v59  ;;  %v1958_v57 = vsub.f32 %v1776_v15, %v1910_v59 }
 0x272   :  { %v1962_v3 = vsub.f32 %v1781_v18, %v1910_v59  ;;  %v1966_v6 = vsub.f32 %v1772_v13, %v1910_v59  ;;  %v1970_v1 = vsub.f32 %v1779_v17, %v1910_v59  ;;  %v1974_v5 = vsub.f32 %v1796_v27, %v1910_v59 }
 0x273   :  { %v1978_v15 = vsub.f32 %v1801_v30, %v1910_v59  ;;  %v1982_v18 = vsub.f32 %v1792_v25, %v1910_v59  ;;  %v1986_v13 = vsub.f32 %v1799_v29, %v1910_v59  ;;  %v1990_v17 = vsub.f32 %v1816_v47, %v1910_v59 }
 0x274   :  { %v1994_v27 = vsub.f32 %v1821_v56, %v1910_v59  ;;  %v1998_v30 = vsub.f32 %v1812_v37, %v1910_v59  ;;  %v2002_v25 = vsub.f32 %v1819_v51, %v1910_v59  ;;  %v2006_v29 = vsub.f32 %v1836_v19, %v1910_v59 }
 0x275   :  { %v2010_v47 = vsub.f32 %v1841_v28, %v1910_v59  ;;  %v2014_v56 = vsub.f32 %v1832_v11, %v1910_v59  ;;  %v2018_v37 = vsub.f32 %v1839_v23, %v1910_v59  ;;  %v2022_v51 = vsub.f32 %v1856_v7, %v1910_v59 }
 0x276   :  { %v2026_v19 = vsub.f32 %v1861_v21, %v1910_v59  ;;  %v2030_v28 = vsub.f32 %v1852_v4, %v1910_v59  ;;  %v2034_v11 = vsub.f32 %v1859_v32, %v1910_v59  ;;  %v2038_v23 = vsub.f32 %v1707_v39, %v1910_v59 }
 0x277   :  { %3146 = vst [vmem:[#allocation16_spill] sm:$0xff] %v2010_v47  ;;  %3147 = vst [vmem:[#allocation17_spill] sm:$0xff] %v2014_v56  ;;  %v2042_v7 = vsub.f32 %v1713_v42, %v1910_v59  ;;  %v2046_v21 = vsub.f32 %v1705_v38, %v1910_v59  ;;  %v2054_v32 = vsub.f32 %v1709_v40, %v1910_v59 }
 0x278   :  { %3148 = vst [vmem:[#allocation18_spill] sm:$0xff] %v2018_v37  ;;  %3149 = vst [vmem:[#allocation19_spill] sm:$0xff] %v2022_v51  ;;  %v838_v4 = vmul.f32 %v2038_v23, %v2038_v23  ;;  %v2058_v39 = vsub.f32 %v1727_v50, %v1910_v59  ;;  %v2064_v38 = vsub.f32 %v1734_v54, %v1910_v59 }
 0x279   :  { %v839_v16 = vmul.f32 %v2042_v7, %v2042_v7  ;;  %v840_v42 = vmul.f32 %v2046_v21, %v2046_v21  ;;  %v841_v9 = vmul.f32 %v2054_v32, %v2054_v32  ;;  %v2070_v40 = vsub.f32 %v1724_v48, %v1910_v59 }
 0x27a   :  { %v842_v50 = vmul.f32 %v2058_v39, %v2058_v39  ;;  %v2076_v61 = vsub.f32 %v1730_v52, %v1910_v59  ;;  %v843_v54 = vmul.f32 %v2064_v38, %v2064_v38 }
 0x27b   :  { %v902_v31 = vadd.f32 %v839_v16, %v838_v4  ;;  %v2082_v4 = vsub.f32 %v1747_v62, %v1910_v59  ;;  %v844_v48 = vmul.f32 %v2070_v40, %v2070_v40 }
 0x27c   :  { %v845_v52 = vmul.f32 %v2076_v61, %v2076_v61 }
 0x27d   :  { %v903_v35 = vadd.f32 %v902_v31, %v840_v42  ;;  %v2088_v42 = vsub.f32 %v1754_v2, %v1910_v59  ;;  %v846_v62 = vmul.f32 %v2082_v4, %v2082_v4 }
 0x27f   :  { %v904_v49 = vadd.f32 %v903_v35, %v841_v9  ;;  %v2094_v9 = vsub.f32 %v1744_v60, %v1910_v59  ;;  %v847_v2 = vmul.f32 %v2088_v42, %v2088_v42 }
 0x281   :  { %v905_v34 = vadd.f32 %v904_v49, %v842_v50  ;;  %v2100_v50 = vsub.f32 %v1750_v0, %v1910_v59  ;;  %v848_v60 = vmul.f32 %v2094_v9, %v2094_v9 }
 0x283   :  { %v906_v16 = vadd.f32 %v905_v34, %v843_v54  ;;  %v2106_v54 = vsub.f32 %v1767_v10, %v1910_v59  ;;  %v849_v0 = vmul.f32 %v2100_v50, %v2100_v50 }
 0x285   :  { %v907_v31 = vadd.f32 %v906_v16, %v844_v48  ;;  %v2112_v48 = vsub.f32 %v1774_v14, %v1910_v59  ;;  %v850_v10 = vmul.f32 %v2106_v54, %v2106_v54 }
 0x287   :  { %v908_v35 = vadd.f32 %v907_v31, %v845_v52  ;;  %v2118_v52 = vsub.f32 %v1764_v8, %v1910_v59  ;;  %v851_v14 = vmul.f32 %v2112_v48, %v2112_v48 }
 0x289   :  { %v909_v49 = vadd.f32 %v908_v35, %v846_v62  ;;  %v2124_v62 = vsub.f32 %v1770_v12, %v1910_v59  ;;  %v852_v8 = vmul.f32 %v2118_v52, %v2118_v52 }
 0x28b   :  { %v910_v34 = vadd.f32 %v909_v49, %v847_v2  ;;  %3150 = vst [vmem:[#allocation20_spill] sm:$0xff] %v2124_v62  ;;  %v2130_v2 = vsub.f32 %v1787_v22, %v1910_v59  ;;  %v853_v12 = vmul.f32 %v2124_v62, %v2124_v62 }
 0x28d   :  { %v911_v16 = vadd.f32 %v910_v34, %v848_v60  ;;  %3151 = vst [vmem:[#allocation21_spill] sm:$0xff] %v2130_v2  ;;  %v2136_v60 = vsub.f32 %v1794_v26, %v1910_v59  ;;  %v854_v22 = vmul.f32 %v2130_v2, %v2130_v2 }
 0x28f   :  { %v912_v31 = vadd.f32 %v911_v16, %v849_v0  ;;  %3152 = vst [vmem:[#allocation22_spill] sm:$0xff] %v2136_v60  ;;  %v2142_v0 = vsub.f32 %v1784_v20, %v1910_v59  ;;  %v855_v26 = vmul.f32 %v2136_v60, %v2136_v60 }
 0x291   :  { %v913_v35 = vadd.f32 %v912_v31, %v850_v10  ;;  %3153 = vst [vmem:[#allocation23_spill] sm:$0xff] %v2142_v0  ;;  %v3154_v10 = vld [vmem:[#allocation3_spill] sm:$0xff]  ;;  %v856_v20 = vmul.f32 %v2142_v0, %v2142_v0 }
 0x292   :  { %v2148_v31 = vsub.f32 %v3154_v10, %v1910_v59  ;;  %v3160_v10 = vld [vmem:[#allocation4_spill] sm:$0xff] }
 0x293   :  { %v914_v49 = vadd.f32 %v913_v35, %v851_v14  ;;  %v3156_v35 = vld [vmem:[#allocation5_spill] sm:$0xff]  ;;  %v2166_v60 = vsub.f32 %v3160_v10, %v1910_v59  ;;  %v3166_v10 = vld [vmem:[#allocation11_spill] sm:$0xff] }
 0x294   :  { %3155 = vst [vmem:[#allocation3_spill] sm:$0xff] %v2148_v31  ;;  %v2154_v62 = vsub.f32 %v3156_v35, %v1910_v59  ;;  %v3162_v35 = vld [vmem:[#allocation6_spill] sm:$0xff] }
 0x295   :  { %v915_v34 = vadd.f32 %v914_v49, %v852_v8  ;;  %v3158_v49 = vld [vmem:[#allocation7_spill] sm:$0xff]  ;;  %3161 = vst [vmem:[#allocation4_spill] sm:$0xff] %v2166_v60  ;;  %v2172_v0 = vsub.f32 %v3162_v35, %v1910_v59  ;;  %v3168_v35 = vld [vmem:[#allocation8_spill] sm:$0xff] }
 0x296   :  { %3157 = vst [vmem:[#allocation5_spill] sm:$0xff] %v2154_v62  ;;  %v2160_v2 = vsub.f32 %v3158_v49, %v1910_v59  ;;  %v3164_v49 = vld [vmem:[#allocation9_spill] sm:$0xff] }
 0x297   :  { %v916_v16 = vadd.f32 %v915_v34, %v853_v12  ;;  %v857_v12 = vmul.f32 %v2148_v31, %v2148_v31  ;;  %3163 = vst [vmem:[#allocation6_spill] sm:$0xff] %v2172_v0  ;;  %v2178_v31 = vsub.f32 %v3164_v49, %v1910_v59  ;;  %v3170_v49 = vld [vmem:[#allocation10_spill] sm:$0xff] }
 0x298   :  { %3159 = vst [vmem:[#allocation7_spill] sm:$0xff] %v2160_v2 }
 0x299   :  { %v917_v14 = vadd.f32 %v916_v16, %v854_v22  ;;  %v858_v22 = vmul.f32 %v2154_v62, %v2154_v62  ;;  %3165 = vst [vmem:[#allocation9_spill] sm:$0xff] %v2178_v31  ;;  %v2184_v62 = vsub.f32 %v3166_v10, %v1910_v59  ;;  %v3172_v10 = vld [vmem:[#allocation13_spill] sm:$0xff] }
 0x29b   :  { %v918_v8 = vadd.f32 %v917_v14, %v855_v26  ;;  %v859_v26 = vmul.f32 %v2160_v2, %v2160_v2  ;;  %3167 = vst [vmem:[#allocation11_spill] sm:$0xff] %v2184_v62  ;;  %v2190_v2 = vsub.f32 %v3168_v35, %v1910_v59  ;;  %v3173_v35 = vld [vmem:[#allocation15_spill] sm:$0xff] }
 0x29d   :  { %v919_v34 = vadd.f32 %v918_v8, %v856_v20  ;;  %v860_v20 = vmul.f32 %v2166_v60, %v2166_v60  ;;  %3169 = vst [vmem:[#allocation8_spill] sm:$0xff] %v2190_v2  ;;  %v2196_v60 = vsub.f32 %v3170_v49, %v1910_v59  ;;  %v3175_v49 = vld [vmem:[#allocation12_spill] sm:$0xff] }
 0x29f   :  { %v920_v16 = vadd.f32 %v919_v34, %v857_v12  ;;  %v861_v12 = vmul.f32 %v2172_v0, %v2172_v0  ;;  %3171 = vst [vmem:[#allocation10_spill] sm:$0xff] %v2196_v60  ;;  %v2202_v0 = vsub.f32 %v3172_v10, %v1910_v59  ;;  %v3176_v10 = vld [vmem:[#allocation14_spill] sm:$0xff] }
 0x2a1   :  { %v921_v14 = vadd.f32 %v920_v16, %v858_v22  ;;  %v862_v22 = vmul.f32 %v2178_v31, %v2178_v31  ;;  %v2208_v31 = vsub.f32 %v3173_v35, %v1910_v59  ;;  %v3177_v35 = vld [vmem:[#allocation2_spill] sm:$0xff] }
 0x2a3   :  { %v922_v8 = vadd.f32 %v921_v14, %v859_v26  ;;  %v863_v26 = vmul.f32 %v2184_v62, %v2184_v62  ;;  %3174 = vst [vmem:[#allocation13_spill] sm:$0xff] %v2208_v31  ;;  %v2214_v62 = vsub.f32 %v3175_v49, %v1910_v59 }
 0x2a5   :  { %v923_v34 = vadd.f32 %v922_v8, %v860_v20  ;;  %v864_v20 = vmul.f32 %v2190_v2, %v2190_v2  ;;  %v2220_v2 = vsub.f32 %v3176_v10, %v1910_v59 }
 0x2a7   :  { %v924_v16 = vadd.f32 %v923_v34, %v861_v12  ;;  %v865_v12 = vmul.f32 %v2196_v60, %v2196_v60  ;;  %v2226_v60 = vsub.f32 %v3177_v35, %v1910_v59  ;;  %v869_v49 = vmul.f32 %v2220_v2, %v2220_v2 }
 0x2a8   :  { %v872_v59 = vmul.f32 %v1918_v24, %v1918_v24  ;;  %v873_v35 = vmul.f32 %v1922_v43, %v1922_v43 }
 0x2a9   :  { %v925_v14 = vadd.f32 %v924_v16, %v862_v22  ;;  %v866_v22 = vmul.f32 %v2202_v0, %v2202_v0 }
 0x2ab   :  { %v926_v8 = vadd.f32 %v925_v14, %v863_v26  ;;  %v867_v26 = vmul.f32 %v2208_v31, %v2208_v31  ;;  %v871_v31 = vmul.f32 %v1914_v36, %v1914_v36 }
 0x2ad   :  { %v927_v34 = vadd.f32 %v926_v8, %v864_v20  ;;  %v868_v20 = vmul.f32 %v2214_v62, %v2214_v62 }
 0x2af   :  { %v928_v16 = vadd.f32 %v927_v34, %v865_v12  ;;  %v870_v34 = vmul.f32 %v2226_v60, %v2226_v60 }
 0x2b1   :  { %v929_v14 = vadd.f32 %v928_v16, %v866_v22 }
 0x2b3   :  { %v930_v8 = vadd.f32 %v929_v14, %v867_v26  ;;  %v874_v14 = vmul.f32 %v1926_v33, %v1926_v33 }
 0x2b5   :  { %v931_v12 = vadd.f32 %v930_v8, %v868_v20  ;;  %v875_v8 = vmul.f32 %v1930_v63, %v1930_v63 }
 0x2b7   :  { %v932_v10 = vadd.f32 %v931_v12, %v869_v49  ;;  %v876_v12 = vmul.f32 %v1934_v46, %v1934_v46 }
 0x2b9   :  { %v933_v22 = vadd.f32 %v932_v10, %v870_v34  ;;  %v877_v10 = vmul.f32 %v1938_v41, %v1938_v41 }
 0x2bb   :  { %v934_v16 = vadd.f32 %v933_v22, %v871_v31  ;;  %v878_v22 = vmul.f32 %v1942_v45, %v1942_v45 }
 0x2bd   :  { %v935_v26 = vadd.f32 %v934_v16, %v872_v59  ;;  %v879_v16 = vmul.f32 %v1946_v55, %v1946_v55 }
 0x2bf   :  { %v936_v20 = vadd.f32 %v935_v26, %v873_v35  ;;  %v880_v26 = vmul.f32 %v1950_v58, %v1950_v58 }
 0x2c1   :  { %v937_v49 = vadd.f32 %v936_v20, %v874_v14  ;;  %v881_v20 = vmul.f32 %v1954_v53, %v1954_v53 }
 0x2c3   :  { %v938_v34 = vadd.f32 %v937_v49, %v875_v8  ;;  %v882_v49 = vmul.f32 %v1958_v57, %v1958_v57 }
 0x2c5   :  { %v939_v31 = vadd.f32 %v938_v34, %v876_v12  ;;  %v883_v34 = vmul.f32 %v1962_v3, %v1962_v3 }
 0x2c7   :  { %v940_v59 = vadd.f32 %v939_v31, %v877_v10  ;;  %v884_v31 = vmul.f32 %v1966_v6, %v1966_v6 }
 0x2c9   :  { %v941_v35 = vadd.f32 %v940_v59, %v878_v22  ;;  %v885_v59 = vmul.f32 %v1970_v1, %v1970_v1 }
 0x2cb   :  { %v942_v14 = vadd.f32 %v941_v35, %v879_v16  ;;  %v886_v35 = vmul.f32 %v1974_v5, %v1974_v5 }
 0x2cd   :  { %v943_v8 = vadd.f32 %v942_v14, %v880_v26  ;;  %v887_v14 = vmul.f32 %v1978_v15, %v1978_v15 }
 0x2cf   :  { %v944_v12 = vadd.f32 %v943_v8, %v881_v20  ;;  %v888_v8 = vmul.f32 %v1982_v18, %v1982_v18 }
 0x2d1   :  { %v945_v10 = vadd.f32 %v944_v12, %v882_v49  ;;  %v889_v12 = vmul.f32 %v1986_v13, %v1986_v13 }
 0x2d3   :  { %v946_v22 = vadd.f32 %v945_v10, %v883_v34  ;;  %v890_v10 = vmul.f32 %v1990_v17, %v1990_v17 }
 0x2d5   :  { %v947_v16 = vadd.f32 %v946_v22, %v884_v31  ;;  %v891_v22 = vmul.f32 %v1994_v27, %v1994_v27 }
 0x2d7   :  { %v948_v26 = vadd.f32 %v947_v16, %v885_v59  ;;  %v892_v16 = vmul.f32 %v1998_v30, %v1998_v30 }
 0x2d9   :  { %v949_v20 = vadd.f32 %v948_v26, %v886_v35  ;;  %v893_v26 = vmul.f32 %v2002_v25, %v2002_v25 }
 0x2db   :  { %v950_v49 = vadd.f32 %v949_v20, %v887_v14  ;;  %v894_v20 = vmul.f32 %v2006_v29, %v2006_v29 }
 0x2dd   :  { %v951_v34 = vadd.f32 %v950_v49, %v888_v8  ;;  %v895_v49 = vmul.f32 %v2010_v47, %v2010_v47 }
 0x2df   :  { %v952_v31 = vadd.f32 %v951_v34, %v889_v12  ;;  %v896_v34 = vmul.f32 %v2014_v56, %v2014_v56 }
 0x2e1   :  { %v953_v59 = vadd.f32 %v952_v31, %v890_v10  ;;  %v897_v31 = vmul.f32 %v2018_v37, %v2018_v37 }
 0x2e3   :  { %v954_v35 = vadd.f32 %v953_v59, %v891_v22  ;;  %v898_v59 = vmul.f32 %v2022_v51, %v2022_v51 }
 0x2e5   :  { %v955_v14 = vadd.f32 %v954_v35, %v892_v16  ;;  %v899_v35 = vmul.f32 %v2026_v19, %v2026_v19 }
 0x2e7   :  { %v956_v8 = vadd.f32 %v955_v14, %v893_v26  ;;  %v900_v14 = vmul.f32 %v2030_v28, %v2030_v28 }
 0x2e9   :  { %v957_v12 = vadd.f32 %v956_v8, %v894_v20  ;;  %v901_v8 = vmul.f32 %v2034_v11, %v2034_v11 }
 0x2eb   :  { %v958_v10 = vadd.f32 %v957_v12, %v895_v49 }
 0x2ed   :  { %v959_v22 = vadd.f32 %v958_v10, %v896_v34 }
 0x2ef   :  { %v960_v16 = vadd.f32 %v959_v22, %v897_v31  ;;  %v1007_v31 = vld [vmem:[%s3097_s3] sm:$0x1] }
 0x2f0   :  { %v1012_v22 = vrot.slane %v1007_v31, %v1906_v44 }
 0x2f1   :  { %v961_v26 = vadd.f32 %v960_v16, %v898_v59 }
 0x2f3   :  { %v962_v20 = vadd.f32 %v961_v26, %v899_v35 }
 0x2f5   :  { %v963_v49 = vadd.f32 %v962_v20, %v900_v14  ;;  %v985_v20 = vld [vmem:[%s3098_s2] sm:$0x1] }
 0x2f7   :  { %v964_v12 = vadd.f32 %v963_v49, %v901_v8 }
 0x2f9   :  { %v965_v56 = vrot.slane %v964_v12, 4 }
 0x2fb   :  { %v966_v37 = vadd.f32 %v965_v56, %v964_v12 }
 0x2fd   :  { %v967_v34 = vrot.slane %v966_v37, 2 }
 0x2ff   :  { %v968_v10 = vadd.f32 %v967_v34, %v966_v37 }
 0x301   :  { %v969_v47 = vrot.slane %v968_v10, 1 }
 0x303   :  { %v970_v51 = vadd.f32 %v969_v47, %v968_v10 }
 0x305   :  { %976 = vrot.lane.b32.xlu1 %v970_v51, %s1533_s9  ;;  %972 = vrot.lane.b32.xlu0 %v970_v51, %s1532_s8 }
 0x309   :  { %980 = vrot.lane.b32.xlu0 %v970_v51, %s1531_s0 }
 0x30d   :  { %1013 = vrot.lane.b32.xlu0 %v1012_v22, %s1535_s11 }
 0x377   :  { %v973_v59 = vpop.permute.xlu0 %972  ;;  %v977_v16 = vpop.permute.xlu1 %976 }
 0x378   :  { %v975_v56 = vadd.f32 %v973_v59, %v970_v51 }
 0x37a   :  { %v979_v37 = vadd.f32 %v977_v16, %v975_v56 }
 0x37b   :  { %v981_v35 = vpop.permute.xlu0 %980 }
 0x37c   :  { %v983_v47 = vadd.f32 %v981_v35, %v979_v37 }
 0x37e   :  { %v984_v26 = vmul.f32 0.00048828125, %v983_v47 }
 0x37f   :  { %v1014_v51 = vpop.permute.xlu0 %1013 }
 0x380   :  { %v986_v14 = vadd.f32 1e-05, %v984_v26  ;;  %v1022_v26 = vsel %vm762_vm2, %v1007_v31, %v1014_v51  ;;  %v3178_v31 = vld [vmem:[#allocation20_spill] sm:$0xff]  ;;  %v3180_v51 = vld [vmem:[#allocation22_spill] sm:$0xff] }
 0x382   :  { %1529 = vrsqrt.f32 %v986_v14 }
 0x38c   :  { %v1530_v8 = vpop.eup %1529 }
 0x38d   :  { %v988_v49 = vmul.f32 %v1530_v8, %v985_v20 }
 0x38f   :  { %v993_v12 = vrot.slane %v988_v49, %v1906_v44 }
 0x391   :  { %997 = vrot.lane.b32.xlu0 %v993_v12, %s1534_s10  ;;  %994 = vrot.lane.b32.xlu1 %v993_v12, %s1535_s11 }
 0x395   :  { %1000 = vrot.lane.b32.xlu1 %v993_v12, %s1536_s12  ;;  %1019 = vrot.lane.b32.xlu0 %v1012_v22, %s1536_s12  ;;  %v3179_v12 = vld [vmem:[#allocation21_spill] sm:$0xff] }
 0x399   :  { %1016 = vrot.lane.b32.xlu1 %v1012_v22, %s1534_s10 }
 0x403   :  { %v995_v34 = vpop.permute.xlu1 %994  ;;  %v998_v59 = vpop.permute.xlu0 %997 }
 0x404   :  { %v1003_v10 = vsel %vm762_vm2, %v988_v49, %v995_v34  ;;  %v3181_v34 = vld [vmem:[#allocation23_spill] sm:$0xff] }
 0x405   :  { %v1004_v56 = vsel %vm764_vm3, %v1003_v10, %v998_v59  ;;  %v3182_v10 = vld [vmem:[#allocation3_spill] sm:$0xff]  ;;  %v3184_v59 = vld [vmem:[#allocation5_spill] sm:$0xff] }
 0x407   :  { %v1001_v16 = vpop.permute.xlu1 %1000 }
 0x408   :  { %v1005_v37 = vsel %vm766_vm4, %v1004_v56, %v1001_v16  ;;  %v3186_v16 = vld [vmem:[#allocation7_spill] sm:$0xff] }
 0x409   :  { %v1006_v35 = vsel %vm768_vm5, %v1005_v37, 0.0 }
 0x40a   :  { %v2318_v47 = vrot.slane %v1006_v35, %v1906_v44  ;;  %v3188_v35 = vld [vmem:[#allocation4_spill] sm:$0xff] }
 0x40c   :  { %v2323_v22 = vmul.f32 %v2318_v47, %v2038_v23  ;;  %v2327_v14 = vmul.f32 %v2318_v47, %v2042_v7  ;;  %v2331_v20 = vmul.f32 %v2318_v47, %v2046_v21  ;;  %v2335_v8 = vmul.f32 %v2318_v47, %v2054_v32 }
 0x40d   :  { %v2339_v49 = vmul.f32 %v2318_v47, %v2058_v39  ;;  %v2343_v23 = vmul.f32 %v2318_v47, %v2064_v38  ;;  %v2347_v7 = vmul.f32 %v2318_v47, %v2070_v40  ;;  %v2351_v21 = vmul.f32 %v2318_v47, %v2076_v61 }
 0x40e   :  { %v2355_v32 = vmul.f32 %v2318_v47, %v2082_v4  ;;  %v2359_v39 = vmul.f32 %v2318_v47, %v2088_v42  ;;  %v2363_v38 = vmul.f32 %v2318_v47, %v2094_v9  ;;  %v2367_v40 = vmul.f32 %v2318_v47, %v2100_v50 }
 0x40f   :  { %v2371_v61 = vmul.f32 %v2318_v47, %v2106_v54  ;;  %v2375_v4 = vmul.f32 %v2318_v47, %v2112_v48  ;;  %v2379_v42 = vmul.f32 %v2318_v47, %v2118_v52  ;;  %v2383_v9 = vmul.f32 %v2318_v47, %v3178_v31 }
 0x410   :  { %v2387_v50 = vmul.f32 %v2318_v47, %v3179_v12  ;;  %v2391_v54 = vmul.f32 %v2318_v47, %v3180_v51  ;;  %v2395_v48 = vmul.f32 %v2318_v47, %v3181_v34  ;;  %v2399_v52 = vmul.f32 %v2318_v47, %v3182_v10  ;;  %v3189_v12 = vld [vmem:[#allocation6_spill] sm:$0xff]  ;;  %v3191_v34 = vld [vmem:[#allocation9_spill] sm:$0xff] }
 0x411   :  { %v2403_v56 = vmul.f32 %v2318_v47, %v3184_v59  ;;  %v2407_v37 = vmul.f32 %v2318_v47, %v3186_v16  ;;  %v2411_v31 = vmul.f32 %v2318_v47, %v3188_v35  ;;  %v2415_v51 = vmul.f32 %v2318_v47, %v3189_v12 }
 0x412   :  { %3183 = vst [vmem:[#allocation15_spill] sm:$0xff] %v2399_v52  ;;  %v2419_v10 = vmul.f32 %v2318_v47, %v3191_v34  ;;  %v3192_v52 = vld [vmem:[#allocation11_spill] sm:$0xff]  ;;  %v2435_v12 = vmul.f32 %v2318_v47, %v2202_v0  ;;  %v2455_v0 = vmul.f32 %v2318_v47, %v1914_v36  ;;  %v2475_v36 = vmul.f32 %v2318_v47, %v1934_v46 }
 0x413   :  { %3185 = vst [vmem:[#allocation12_spill] sm:$0xff] %v2403_v56  ;;  %3187 = vst [vmem:[#allocation14_spill] sm:$0xff] %v2407_v37  ;;  %v2423_v59 = vmul.f32 %v2318_v47, %v3192_v52  ;;  %v3193_v56 = vld [vmem:[#allocation8_spill] sm:$0xff]  ;;  %v3194_v37 = vld [vmem:[#allocation10_spill] sm:$0xff]  ;;  %v2443_v52 = vmul.f32 %v2318_v47, %v2214_v62  ;;  %v2463_v62 = vmul.f32 %v2318_v47, %v1922_v43 }
 0x414   :  { %3190 = vst [vmem:[#allocation2_spill] sm:$0xff] %v2415_v51  ;;  %v2427_v16 = vmul.f32 %v2318_v47, %v3193_v56  ;;  %v2431_v35 = vmul.f32 %v2318_v47, %v3194_v37  ;;  %v3195_v51 = vld [vmem:[#allocation13_spill] sm:$0xff]  ;;  %v2447_v56 = vmul.f32 %v2318_v47, %v2220_v2  ;;  %v2451_v37 = vmul.f32 %v2318_v47, %v2226_v60 }
 0x415   :  { %v2439_v34 = vmul.f32 %v2318_v47, %v3195_v51  ;;  %v2459_v51 = vmul.f32 %v2318_v47, %v1918_v24  ;;  %v2467_v2 = vmul.f32 %v2318_v47, %v1926_v33  ;;  %v2471_v60 = vmul.f32 %v2318_v47, %v1930_v63  ;;  %3197 = vst [vmem:[#allocation21_spill] sm:$0xff] %v2475_v36  ;;  %v1020_v36 = vpop.permute.xlu0 %1019 }
 0x416   :  { %v2479_v24 = vmul.f32 %v2318_v47, %v1938_v41  ;;  %v2483_v43 = vmul.f32 %v2318_v47, %v1942_v45  ;;  %v2487_v33 = vmul.f32 %v2318_v47, %v1946_v55  ;;  %v2491_v63 = vmul.f32 %v2318_v47, %v1950_v58 }
 0x417   :  { %3196 = vst [vmem:[#allocation20_spill] sm:$0xff] %v2459_v51  ;;  %v1017_v51 = vpop.permute.xlu1 %1016  ;;  %v2495_v46 = vmul.f32 %v2318_v47, %v1954_v53  ;;  %v2499_v41 = vmul.f32 %v2318_v47, %v1958_v57  ;;  %v2503_v45 = vmul.f32 %v2318_v47, %v1962_v3  ;;  %v2507_v55 = vmul.f32 %v2318_v47, %v1966_v6 }
 0x418   :  { %v2511_v58 = vmul.f32 %v2318_v47, %v1970_v1  ;;  %v2515_v53 = vmul.f32 %v2318_v47, %v1974_v5  ;;  %v2519_v57 = vmul.f32 %v2318_v47, %v1978_v15  ;;  %v2523_v3 = vmul.f32 %v2318_v47, %v1982_v18 }
 0x419   :  { %3198 = vst [vmem:[#allocation22_spill] sm:$0xff] %v2503_v45  ;;  %v1023_v45 = vsel %vm764_vm3, %v1022_v26, %v1017_v51  ;;  %v2528_v6 = vmul.f32 %v2318_v47, %v1986_v13  ;;  %v2532_v1 = vmul.f32 %v2318_v47, %v1990_v17  ;;  %v2536_v5 = vmul.f32 %v2318_v47, %v1994_v27  ;;  %v3201_v51 = vld [vmem:[#allocation16_spill] sm:$0xff] }
 0x41a   :  { %v1024_v15 = vsel %vm766_vm4, %v1023_v45, %v1020_v36  ;;  %v2541_v18 = vmul.f32 %v2318_v47, %v1998_v30  ;;  %v2545_v26 = vmul.f32 %v2318_v47, %v2002_v25  ;;  %v2549_v13 = vmul.f32 %v2318_v47, %v2006_v29  ;;  %v3203_v30 = vld [vmem:[#allocation18_spill] sm:$0xff] }
 0x41b   :  { %3199 = vst [vmem:[#allocation23_spill] sm:$0xff] %v2536_v5  ;;  %v1025_v17 = vsel %vm768_vm5, %v1024_v15, 0.0  ;;  %v2554_v27 = vmul.f32 %v2318_v47, %v3201_v51  ;;  %v3202_v5 = vld [vmem:[#allocation17_spill] sm:$0xff]  ;;  %v2562_v45 = vmul.f32 %v2318_v47, %v3203_v30  ;;  %v2573_v15 = vmul.f32 %v2318_v47, %v2026_v19  ;;  %v3208_v30 = vld [vmem:[#allocation14_spill] sm:$0xff] }
 0x41c   :  { %3200 = vst [vmem:[#allocation3_spill] sm:$0xff] %v2545_v26  ;;  %v2558_v36 = vmul.f32 %v2318_v47, %v3202_v5  ;;  %v2565_v25 = vrot.slane %v1025_v17, %v1906_v44  ;;  %v3204_v26 = vld [vmem:[#allocation19_spill] sm:$0xff]  ;;  %v2577_v51 = vmul.f32 %v2318_v47, %v2030_v28  ;;  %v2581_v5 = vmul.f32 %v2318_v47, %v2034_v11  ;;  %v3207_v17 = vld [vmem:[#allocation12_spill] sm:$0xff] }
 0x41d   :  { %v2569_v29 = vmul.f32 %v2318_v47, %v3204_v26 }
 0x41e   :  { %v2585_v44 = vadd.f32 %v2565_v25, %v2323_v22  ;;  %v2589_v26 = vadd.f32 %v2565_v25, %v2327_v14  ;;  %v2593_v19 = vadd.f32 %v2565_v25, %v2331_v20  ;;  %v2597_v28 = vadd.f32 %v2565_v25, %v2335_v8 }
 0x41f   :  { %v2601_v11 = vadd.f32 %v2565_v25, %v2339_v49  ;;  %v2605_v47 = vadd.f32 %v2565_v25, %v2343_v23  ;;  %v2609_v22 = vadd.f32 %v2565_v25, %v2347_v7  ;;  %v2613_v14 = vadd.f32 %v2565_v25, %v2351_v21 }
 0x420   :  { %v2617_v20 = vadd.f32 %v2565_v25, %v2355_v32  ;;  %v2621_v8 = vadd.f32 %v2565_v25, %v2359_v39  ;;  %v2625_v49 = vadd.f32 %v2565_v25, %v2363_v38  ;;  %v2629_v23 = vadd.f32 %v2565_v25, %v2367_v40 }
 0x421   :  { %v2633_v7 = vadd.f32 %v2565_v25, %v2371_v61  ;;  %v2637_v21 = vadd.f32 %v2565_v25, %v2375_v4  ;;  %v2641_v32 = vadd.f32 %v2565_v25, %v2379_v42  ;;  %v2645_v39 = vadd.f32 %v2565_v25, %v2383_v9  ;;  %v3206_v4 = vld [vmem:[#allocation15_spill] sm:$0xff] }
 0x422   :  { %v2649_v38 = vadd.f32 %v2565_v25, %v2387_v50  ;;  %v2653_v40 = vadd.f32 %v2565_v25, %v2391_v54  ;;  %v2657_v61 = vadd.f32 %v2565_v25, %v2395_v48  ;;  %v2661_v42 = vadd.f32 %v2565_v25, %v3206_v4 }
 0x423   :  { %v2665_v9 = vadd.f32 %v2565_v25, %v3207_v17  ;;  %v2669_v50 = vadd.f32 %v2565_v25, %v3208_v30  ;;  %v2673_v54 = vadd.f32 %v2565_v25, %v2411_v31  ;;  %v2681_v4 = vadd.f32 %v2565_v25, %v2419_v10 }
 0x424   :  { %3205 = vst [vmem:[#allocation5_spill] sm:$0xff] %v2653_v40  ;;  %v3209_v40 = vld [vmem:[#allocation2_spill] sm:$0xff]  ;;  %v2685_v17 = vadd.f32 %v2565_v25, %v2423_v59  ;;  %v2689_v30 = vadd.f32 %v2565_v25, %v2427_v16  ;;  %v2693_v31 = vadd.f32 %v2565_v25, %v2431_v35  ;;  %v2701_v10 = vadd.f32 %v2565_v25, %v2439_v34 }
 0x425   :  { %v2677_v48 = vadd.f32 %v2565_v25, %v3209_v40  ;;  %v2697_v40 = vadd.f32 %v2565_v25, %v2435_v12  ;;  %v2705_v59 = vadd.f32 %v2565_v25, %v2443_v52  ;;  %v2709_v16 = vadd.f32 %v2565_v25, %v2447_v56 }
 0x426   :  { %v2713_v35 = vadd.f32 %v2565_v25, %v2451_v37  ;;  %v2717_v12 = vadd.f32 %v2565_v25, %v2455_v0  ;;  %v2725_v52 = vadd.f32 %v2565_v25, %v2463_v62  ;;  %v2729_v56 = vadd.f32 %v2565_v25, %v2467_v2 }
 0x427   :  { %3210 = vst [vmem:[#allocation7_spill] sm:$0xff] %v2697_v40  ;;  %v3212_v40 = vld [vmem:[#allocation20_spill] sm:$0xff]  ;;  %v2733_v37 = vadd.f32 %v2565_v25, %v2471_v60  ;;  %v2745_v62 = vadd.f32 %v2565_v25, %v2483_v43  ;;  %v2749_v2 = vadd.f32 %v2565_v25, %v2487_v33  ;;  %v2753_v60 = vadd.f32 %v2565_v25, %v2491_v63 }
 0x428   :  { %3211 = vst [vmem:[#allocation4_spill] sm:$0xff] %v2713_v35  ;;  %v2721_v34 = vadd.f32 %v2565_v25, %v3212_v40  ;;  %v3213_v35 = vld [vmem:[#allocation21_spill] sm:$0xff]  ;;  %v2741_v40 = vadd.f32 %v2565_v25, %v2479_v24  ;;  %v2761_v24 = vadd.f32 %v2565_v25, %v2499_v41  ;;  %v2769_v33 = vadd.f32 %v2565_v25, %v2507_v55 }
 0x429   :  { %v2737_v0 = vadd.f32 %v2565_v25, %v3213_v35  ;;  %v2757_v35 = vadd.f32 %v2565_v25, %v2495_v46  ;;  %v2773_v63 = vadd.f32 %v2565_v25, %v2511_v58  ;;  %v2777_v46 = vadd.f32 %v2565_v25, %v2515_v53 }
 0x42a   :  { %3214 = vst [vmem:[#allocation6_spill] sm:$0xff] %v2741_v40  ;;  %v3215_v40 = vld [vmem:[#allocation22_spill] sm:$0xff]  ;;  %v2781_v41 = vadd.f32 %v2565_v25, %v2519_v57  ;;  %v2789_v55 = vadd.f32 %v2565_v25, %v2528_v6  ;;  %v2793_v58 = vadd.f32 %v2565_v25, %v2532_v1  ;;  %v2801_v57 = vadd.f32 %v2565_v25, %v2541_v18 }
 0x42b   :  { %v2765_v43 = vadd.f32 %v2565_v25, %v3215_v40  ;;  %3216 = vst [vmem:[#allocation9_spill] sm:$0xff] %v2773_v63  ;;  %v2785_v40 = vadd.f32 %v2565_v25, %v2523_v3  ;;  %v3218_v63 = vld [vmem:[#allocation23_spill] sm:$0xff]  ;;  %v2809_v6 = vadd.f32 %v2565_v25, %v2549_v13  ;;  %v2813_v1 = vadd.f32 %v2565_v25, %v2554_v27 }
 0x42c   :  { %3217 = vst [vmem:[#allocation11_spill] sm:$0xff] %v2781_v41  ;;  %v2797_v53 = vadd.f32 %v2565_v25, %v3218_v63  ;;  %v3219_v41 = vld [vmem:[#allocation3_spill] sm:$0xff]  ;;  %v2817_v63 = vadd.f32 %v2565_v25, %v2558_v36  ;;  %v2821_v18 = vadd.f32 %v2565_v25, %v2562_v45  ;;  %v2829_v13 = vadd.f32 %v2565_v25, %v2573_v15 }
 0x42d   :  { %v2805_v3 = vadd.f32 %v2565_v25, %v3219_v41  ;;  %v2825_v41 = vadd.f32 %v2565_v25, %v2569_v29  ;;  %v2833_v27 = vadd.f32 %v2565_v25, %v2577_v51  ;;  %v2837_v36 = vadd.f32 %v2565_v25, %v2581_v5 }
 0x42e   :  { %3220 = vst [vmem:[#allocation8_spill] sm:$0xff] %v2817_v63  ;;  %3221 = vst [vmem:[#allocation10_spill] sm:$0xff] %v2821_v18  ;;  %v1162_v63 = vmax.f32 %v2585_v44, 0.0  ;;  %v1163_v45 = vmax.f32 %v2589_v26, 0.0  ;;  %v1164_v18 = vmax.f32 %v2593_v19, 0.0  ;;  %v1165_v29 = vmax.f32 %v2597_v28, 0.0 }
 0x42f   :  { %3222 = vst [vmem:[#allocation13_spill] sm:$0xff] %v2825_v41  ;;  %3223 = vst [vmem:[#allocation16_spill] sm:$0xff] %v2829_v13  ;;  %v1166_v41 = vmax.f32 %v2601_v11, 0.0  ;;  %v1167_v15 = vmax.f32 %v2605_v47, 0.0  ;;  %v1168_v13 = vmax.f32 %v2609_v22, 0.0  ;;  %v1169_v51 = vmax.f32 %v2613_v14, 0.0 }
 0x430   :  { %3224 = vst [vmem:[#allocation17_spill] sm:$0xff] %v2833_v27  ;;  %v1170_v27 = vmax.f32 %v2617_v20, 0.0  ;;  %v1171_v25 = vmax.f32 %v2621_v8, 0.0  ;;  %v1172_v5 = vmax.f32 %v2625_v49, 0.0  ;;  %v1173_v44 = vmax.f32 %v2629_v23, 0.0  ;;  %1226 = vst [vmem:[%s3099_s4] sm:$0xff] %v1162_v63  ;;  %v3225_v22 = vld [vmem:[#allocation5_spill] sm:$0xff] }
 0x431   :  { %1227 = vst [vmem:[%s3099_s4 + $0x8] sm:$0xff] %v1163_v45  ;;  %1228 = vst [vmem:[%s3099_s4 + $0x10] sm:$0xff] %v1164_v18  ;;  %v1174_v26 = vmax.f32 %v2633_v7, 0.0  ;;  %v1175_v19 = vmax.f32 %v2637_v21, 0.0  ;;  %v1176_v28 = vmax.f32 %v2641_v32, 0.0  ;;  %v1177_v11 = vmax.f32 %v2645_v39, 0.0 }
 0x432   :  { %1229 = vst [vmem:[%s3099_s4 + $0x18] sm:$0xff] %v1165_v29  ;;  %1230 = vst [vmem:[%s3099_s4 + $0x20] sm:$0xff] %v1166_v41  ;;  %v1178_v47 = vmax.f32 %v2649_v38, 0.0  ;;  %v1179_v14 = vmax.f32 %v3225_v22, 0.0  ;;  %v1180_v20 = vmax.f32 %v2657_v61, 0.0  ;;  %v1181_v8 = vmax.f32 %v2661_v42, 0.0 }
 0x433   :  { %1231 = vst [vmem:[%s3099_s4 + $0x28] sm:$0xff] %v1167_v15  ;;  %1232 = vst [vmem:[%s3099_s4 + $0x30] sm:$0xff] %v1168_v13  ;;  %v1182_v49 = vmax.f32 %v2665_v9, 0.0  ;;  %v1183_v23 = vmax.f32 %v2669_v50, 0.0  ;;  %v1184_v7 = vmax.f32 %v2673_v54, 0.0  ;;  %v1185_v21 = vmax.f32 %v2677_v48, 0.0 }
 0x434   :  { %1233 = vst [vmem:[%s3099_s4 + $0x38] sm:$0xff] %v1169_v51  ;;  %1234 = vst [vmem:[%s3099_s4 + $0x40] sm:$0xff] %v1170_v27  ;;  %v1186_v32 = vmax.f32 %v2681_v4, 0.0  ;;  %v1187_v39 = vmax.f32 %v2685_v17, 0.0  ;;  %v1188_v38 = vmax.f32 %v2689_v30, 0.0  ;;  %v1189_v61 = vmax.f32 %v2693_v31, 0.0 }
 0x435   :  { %1235 = vst [vmem:[%s3099_s4 + $0x48] sm:$0xff] %v1171_v25  ;;  %1236 = vst [vmem:[%s3099_s4 + $0x50] sm:$0xff] %v1172_v5  ;;  %v3226_v42 = vld [vmem:[#allocation7_spill] sm:$0xff]  ;;  %v1191_v50 = vmax.f32 %v2701_v10, 0.0  ;;  %v1192_v54 = vmax.f32 %v2705_v59, 0.0  ;;  %v1193_v48 = vmax.f32 %v2709_v16, 0.0 }
 0x436   :  { %1237 = vst [vmem:[%s3099_s4 + $0x58] sm:$0xff] %v1173_v44  ;;  %1238 = vst [vmem:[%s3099_s4 + $0x60] sm:$0xff] %v1174_v26  ;;  %v1190_v9 = vmax.f32 %v3226_v42, 0.0  ;;  %v3227_v4 = vld [vmem:[#allocation4_spill] sm:$0xff]  ;;  %v1195_v30 = vmax.f32 %v2717_v12, 0.0  ;;  %v1196_v31 = vmax.f32 %v2721_v34, 0.0 }
 0x437   :  { %1239 = vst [vmem:[%s3099_s4 + $0x68] sm:$0xff] %v1175_v19  ;;  %1240 = vst [vmem:[%s3099_s4 + $0x70] sm:$0xff] %v1176_v28  ;;  %v1194_v17 = vmax.f32 %v3227_v4, 0.0  ;;  %v1197_v10 = vmax.f32 %v2725_v52, 0.0  ;;  %v1198_v59 = vmax.f32 %v2729_v56, 0.0  ;;  %v1199_v16 = vmax.f32 %v2733_v37, 0.0 }
 0x438   :  { %1241 = vst [vmem:[%s3099_s4 + $0x78] sm:$0xff] %v1177_v11  ;;  %1242 = vst [vmem:[%s3099_s4 + $0x80] sm:$0xff] %v1178_v47  ;;  %v1200_v12 = vmax.f32 %v2737_v0, 0.0  ;;  %v3228_v34 = vld [vmem:[#allocation6_spill] sm:$0xff]  ;;  %v1202_v56 = vmax.f32 %v2745_v62, 0.0  ;;  %v1203_v37 = vmax.f32 %v2749_v2, 0.0 }
 0x439   :  { %1243 = vst [vmem:[%s3099_s4 + $0x88] sm:$0xff] %v1179_v14  ;;  %1244 = vst [vmem:[%s3099_s4 + $0x90] sm:$0xff] %v1180_v20  ;;  %v1201_v52 = vmax.f32 %v3228_v34, 0.0  ;;  %v1204_v0 = vmax.f32 %v2753_v60, 0.0  ;;  %v1205_v63 = vmax.f32 %v2757_v35, 0.0  ;;  %v1206_v62 = vmax.f32 %v2761_v24, 0.0 }
 0x43a   :  { %1245 = vst [vmem:[%s3099_s4 + $0x98] sm:$0xff] %v1181_v8  ;;  %1246 = vst [vmem:[%s3099_s4 + $0xa0] sm:$0xff] %v1182_v49  ;;  %v1207_v2 = vmax.f32 %v2765_v43, 0.0  ;;  %v1208_v60 = vmax.f32 %v2769_v33, 0.0  ;;  %v3229_v35 = vld [vmem:[#allocation9_spill] sm:$0xff]  ;;  %v1210_v24 = vmax.f32 %v2777_v46, 0.0 }
 0x43b   :  { %1247 = vst [vmem:[%s3099_s4 + $0xa8] sm:$0xff] %v1183_v23  ;;  %1248 = vst [vmem:[%s3099_s4 + $0xb0] sm:$0xff] %v1184_v7  ;;  %v1209_v18 = vmax.f32 %v3229_v35, 0.0  ;;  %v3230_v43 = vld [vmem:[#allocation11_spill] sm:$0xff]  ;;  %v1212_v41 = vmax.f32 %v2785_v40, 0.0  ;;  %v1213_v13 = vmax.f32 %v2789_v55, 0.0 }
 0x43c   :  { %1249 = vst [vmem:[%s3099_s4 + $0xb8] sm:$0xff] %v1185_v21  ;;  %1250 = vst [vmem:[%s3099_s4 + $0xc0] sm:$0xff] %v1186_v32  ;;  %v1211_v33 = vmax.f32 %v3230_v43, 0.0  ;;  %v1214_v46 = vmax.f32 %v2793_v58, 0.0  ;;  %v1215_v40 = vmax.f32 %v2797_v53, 0.0  ;;  %v1216_v55 = vmax.f32 %v2801_v57, 0.0 }
 0x43d   :  { %1251 = vst [vmem:[%s3099_s4 + $0xc8] sm:$0xff] %v1187_v39  ;;  %1252 = vst [vmem:[%s3099_s4 + $0xd0] sm:$0xff] %v1188_v38  ;;  %v1217_v27 = vmax.f32 %v2805_v3, 0.0  ;;  %v1218_v58 = vmax.f32 %v2809_v6, 0.0  ;;  %v1219_v53 = vmax.f32 %v2813_v1, 0.0  ;;  %v3231_v57 = vld [vmem:[#allocation8_spill] sm:$0xff] }
 0x43e   :  { %1253 = vst [vmem:[%s3099_s4 + $0xd8] sm:$0xff] %v1189_v61  ;;  %1254 = vst [vmem:[%s3099_s4 + $0xe0] sm:$0xff] %v1190_v9  ;;  %v1220_v3 = vmax.f32 %v3231_v57, 0.0  ;;  %v3232_v45 = vld [vmem:[#allocation10_spill] sm:$0xff]  ;;  %v3233_v6 = vld [vmem:[#allocation13_spill] sm:$0xff]  ;;  %v1225_v44 = vmax.f32 %v2837_v36, 0.0 }
 0x43f   :  { %1255 = vst [vmem:[%s3099_s4 + $0xe8] sm:$0xff] %v1191_v50  ;;  %1256 = vst [vmem:[%s3099_s4 + $0xf0] sm:$0xff] %v1192_v54  ;;  %v1221_v29 = vmax.f32 %v3232_v45, 0.0  ;;  %v1222_v1 = vmax.f32 %v3233_v6, 0.0  ;;  %v3234_v15 = vld [vmem:[#allocation16_spill] sm:$0xff]  ;;  %v3235_v25 = vld [vmem:[#allocation17_spill] sm:$0xff] }
 0x440   :  { %1257 = vst [vmem:[%s3099_s4 + $0xf8] sm:$0xff] %v1193_v48  ;;  %1258 = vst [vmem:[%s3099_s4 + $0x100] sm:$0xff] %v1194_v17  ;;  %v1223_v51 = vmax.f32 %v3234_v15, 0.0  ;;  %v1224_v5 = vmax.f32 %v3235_v25, 0.0 }
 0x441   :  { %1259 = vst [vmem:[%s3099_s4 + $0x108] sm:$0xff] %v1195_v30  ;;  %1260 = vst [vmem:[%s3099_s4 + $0x110] sm:$0xff] %v1196_v31 }
 0x442   :  { %1261 = vst [vmem:[%s3099_s4 + $0x118] sm:$0xff] %v1197_v10  ;;  %1262 = vst [vmem:[%s3099_s4 + $0x120] sm:$0xff] %v1198_v59 }
 0x443   :  { %1263 = vst [vmem:[%s3099_s4 + $0x128] sm:$0xff] %v1199_v16  ;;  %1264 = vst [vmem:[%s3099_s4 + $0x130] sm:$0xff] %v1200_v12 }
 0x444   :  { %1265 = vst [vmem:[%s3099_s4 + $0x138] sm:$0xff] %v1201_v52  ;;  %1266 = vst [vmem:[%s3099_s4 + $0x140] sm:$0xff] %v1202_v56 }
 0x445   :  { %1267 = vst [vmem:[%s3099_s4 + $0x148] sm:$0xff] %v1203_v37  ;;  %1268 = vst [vmem:[%s3099_s4 + $0x150] sm:$0xff] %v1204_v0 }
 0x446   :  { %1269 = vst [vmem:[%s3099_s4 + $0x158] sm:$0xff] %v1205_v63  ;;  %1270 = vst [vmem:[%s3099_s4 + $0x160] sm:$0xff] %v1206_v62 }
 0x447   :  { %1271 = vst [vmem:[%s3099_s4 + $0x168] sm:$0xff] %v1207_v2  ;;  %1272 = vst [vmem:[%s3099_s4 + $0x170] sm:$0xff] %v1208_v60 }
 0x448   :  { %1273 = vst [vmem:[%s3099_s4 + $0x178] sm:$0xff] %v1209_v18  ;;  %1274 = vst [vmem:[%s3099_s4 + $0x180] sm:$0xff] %v1210_v24 }
 0x449   :  { %1275 = vst [vmem:[%s3099_s4 + $0x188] sm:$0xff] %v1211_v33  ;;  %1276 = vst [vmem:[%s3099_s4 + $0x190] sm:$0xff] %v1212_v41 }
 0x44a   :  { %1277 = vst [vmem:[%s3099_s4 + $0x198] sm:$0xff] %v1213_v13  ;;  %1278 = vst [vmem:[%s3099_s4 + $0x1a0] sm:$0xff] %v1214_v46 }
 0x44b   :  { %1279 = vst [vmem:[%s3099_s4 + $0x1a8] sm:$0xff] %v1215_v40  ;;  %1280 = vst [vmem:[%s3099_s4 + $0x1b0] sm:$0xff] %v1216_v55 }
 0x44c   :  { %1281 = vst [vmem:[%s3099_s4 + $0x1b8] sm:$0xff] %v1217_v27  ;;  %1282 = vst [vmem:[%s3099_s4 + $0x1c0] sm:$0xff] %v1218_v58 }
 0x44d   :  { %1283 = vst [vmem:[%s3099_s4 + $0x1c8] sm:$0xff] %v1219_v53  ;;  %1284 = vst [vmem:[%s3099_s4 + $0x1d0] sm:$0xff] %v1220_v3 }
 0x44e   :  { %1285 = vst [vmem:[%s3099_s4 + $0x1d8] sm:$0xff] %v1221_v29  ;;  %1286 = vst [vmem:[%s3099_s4 + $0x1e0] sm:$0xff] %v1222_v1 }
 0x44f   :  { %1287 = vst [vmem:[%s3099_s4 + $0x1e8] sm:$0xff] %v1223_v51  ;;  %1288 = vst [vmem:[%s3099_s4 + $0x1f0] sm:$0xff] %v1224_v5 }
 0x450   :  { %1289 = vst [vmem:[%s3099_s4 + $0x1f8] sm:$0xff] %v1225_v44 }

// kernel: _lambda_.9
= control target key start
LH: loop header
LB: loop body
LE: loop exit
PB: predicated region body
PF: predicated region fallthrough
CT: control target
= control target key end

     0   :  { %s2375_s9 = smov 0   ;;  %s2665_s0 = inlined_call_operand.vmem [shape: bf16[2048,36], index: 0, kind: input, shape index: {}]   ;;  %s2666_s1 = inlined_call_operand.vmem [shape: bf16[36,128], index: 1, kind: input, shape index: {}]   ;;  %s2667_s2 = inlined_call_operand.vmem [shape: f32[2048,128], index: 2, kind: output, shape index: {}]  }
   0x1 LB: > { %s1670_s10 = sadd.s32 4294967295, %s2358_s9   ;;  %p1674_p0 = scmp.ge.s32.totalorder %s2358_s9, 1  ;;  %s2358_s9 = sphi %s2375_s9, %s12_s9  }
   0x2   : > { %p113_p1 = scmp.lt.s32.totalorder %s2358_s9, 3 }
   0x4   : > { %p114_p2 = pnand %p1674_p0, %p113_p1 }
   0x5   : > { %v2029_v0 = vld [vmem:[%s2666_s1] sm:$0xff] (!%p114_p2)   ;;  %v2030_v1 = vld [vmem:[%s2666_s1 + $0x8] sm:$0xff] (!%p114_p2)   ;;  %s1675_s15 = sshll.u32 (!%p114_p2), %s1670_s10, 7  ;;  %v2031_v2 = vld [vmem:[%s2666_s1 + $0x10] ss:$0 sps:$4 sm:$0x33] (!%p114_p2)  }
   0x6   : > { %117 = sbr.rel (%p114_p2) target bundleno = 372 (0x174), region = 28  ;;  %1879 = vmatprep.subr.bf16.mxu0 (!%p114_p2), %v2029_v0  ;;  %2013 = vmatprep.subr.bf16.mxu1 (!%p114_p2), %v2029_v0  ;;  %p136_p3 = scmp.lt.s32.totalorder (!%p114_p2), %s1675_s15, 255  ;;  %vm809_vm0 = vcmask (!%p114_p2), 1041408   ;;  %vm616_vm1 = vcmask (!%p114_p2), 293888  }
   0x7   : > { %1880 = vmatpush3.bf16.msra.mxu0 (!%p114_p2), %v2029_v0  ;;  %2016 = vmatpush3.bf16.msra.mxu1 (!%p114_p2), %v2029_v0  ;;  %v811_v3 = vsel (!%p114_p2), %vm809_vm0, %v2031_v2, 0 }
   0x8   : > { %1881 = vmatprep.subr.bf16.mxu0 (!%p114_p2), %v2030_v1  ;;  %2014 = vmatprep.subr.bf16.mxu1 (!%p114_p2), %v2030_v1 }
   0xb   : > { %1882 = vmatpush3.bf16.msra.mxu0 (!%p114_p2), %v2030_v1  ;;  %2017 = vmatpush3.bf16.msra.mxu1 (!%p114_p2), %v2030_v1 }
   0xc   : > { %2019 = vmatprep.subr.msk.bf16.mxu0 (!%p114_p2), %vm809_vm0, %v2031_v2  ;;  %2020 = vmatprep.subr.msk.bf16.mxu1 (!%p114_p2), %vm809_vm0, %v2031_v2 }
   0xd   : > { %s2669_s15 = smov (!%p136_p3, %s1675_s15), 255 }
   0xe   : > { %s1676_s18 = sshll.u32 %s2669_s15, 2  ;;  %s1678_s22 = sshll.u32 %s2669_s15, 3 }
   0xf   : > { %s2398_s21 = scalar_lea.vmem %s2665_s0, %s1676_s18  ;;  %1884 = vmatpush3.bf16.msra.mxu0 %v811_v3  ;;  %2018 = vmatpush3.bf16.msra.mxu1 %v811_v3  ;;  %s2532_s25 = scalar_lea.vmem %s2667_s2, %s1678_s22 }
  0x10   : > { %v2032_v4 = vld [vmem:[%s2398_s21] sm:$0xff]   ;;  %v2034_v6 = vld [vmem:[%s2398_s21 + $0x8] sm:$0xff]   ;;  %v2036_v8 = vld [vmem:[%s2398_s21 + $0x10] sm:$0xff]  }
  0x11   : > { %v2033_v5 = vld [vmem:[%s2398_s21 + $0x100] sm:$0xff]   ;;  %1885 = vmatprep.mubr.msk.bf16.mxu0 %vm616_vm1, %v2032_v4  ;;  %v2035_v7 = vld [vmem:[%s2398_s21 + $0x108] sm:$0xff]   ;;  %v2037_v9 = vld [vmem:[%s2398_s21 + $0x110] sm:$0xff]  }
  0x12   : > { %1949 = vmatprep.mubr.msk.bf16.mxu1 %vm616_vm1, %v2033_v5  ;;  %1886 = vmatmul.mubr.msk.bf16.vlgmr.msra.gmra.mrb[0].mxu0 %vm616_vm1, %v2034_v6  ;;  %v2038_v10 = vld [vmem:[%s2398_s21 + $0x18] sm:$0xff]   ;;  %v2040_v12 = vld [vmem:[%s2398_s21 + $0x20] sm:$0xff]   ;;  %v2042_v14 = vld [vmem:[%s2398_s21 + $0x28] sm:$0xff]  }
  0x13   : > { %1950 = vmatmul.mubr.msk.bf16.vlgmr.msra.gmra.mrb[0].mxu1 %vm616_vm1, %v2035_v7  ;;  %1889 = vmatprep.mubr.msk.bf16.mxu0 %vm616_vm1, %v2036_v8  ;;  %v2039_v11 = vld [vmem:[%s2398_s21 + $0x118] sm:$0xff]   ;;  %v2041_v13 = vld [vmem:[%s2398_s21 + $0x120] sm:$0xff]   ;;  %v2043_v15 = vld [vmem:[%s2398_s21 + $0x128] sm:$0xff]  }
  0x14   : > { %1953 = vmatprep.mubr.msk.bf16.mxu1 %vm616_vm1, %v2037_v9  ;;  %v2044_v16 = vld [vmem:[%s2398_s21 + $0x30] sm:$0xff]   ;;  %v2046_v18 = vld [vmem:[%s2398_s21 + $0x38] sm:$0xff]   ;;  %v2048_v20 = vld [vmem:[%s2398_s21 + $0x40] sm:$0xff]  }
  0x15   : > { %v2045_v17 = vld [vmem:[%s2398_s21 + $0x130] sm:$0xff]   ;;  %v2047_v19 = vld [vmem:[%s2398_s21 + $0x138] sm:$0xff]   ;;  %v2049_v21 = vld [vmem:[%s2398_s21 + $0x140] sm:$0xff]  }
  0x16   : > { %v2050_v22 = vld [vmem:[%s2398_s21 + $0x48] sm:$0xff]   ;;  %v2052_v24 = vld [vmem:[%s2398_s21 + $0x50] sm:$0xff]   ;;  %v2054_v26 = vld [vmem:[%s2398_s21 + $0x58] sm:$0xff]  }
  0x17   : > { %v2051_v23 = vld [vmem:[%s2398_s21 + $0x148] sm:$0xff]   ;;  %v2053_v25 = vld [vmem:[%s2398_s21 + $0x150] sm:$0xff]   ;;  %v2055_v27 = vld [vmem:[%s2398_s21 + $0x158] sm:$0xff]  }
  0x18   : > { %v2056_v28 = vld [vmem:[%s2398_s21 + $0x60] sm:$0xff]   ;;  %v2058_v30 = vld [vmem:[%s2398_s21 + $0x68] sm:$0xff]   ;;  %v2060_v32 = vld [vmem:[%s2398_s21 + $0x70] sm:$0xff]  }
  0x19   : > { %v2057_v29 = vld [vmem:[%s2398_s21 + $0x160] sm:$0xff]   ;;  %v2059_v31 = vld [vmem:[%s2398_s21 + $0x168] sm:$0xff]   ;;  %v2061_v33 = vld [vmem:[%s2398_s21 + $0x170] sm:$0xff]  }
  0x1a   : > { %1890 = vmatmul.mubr.msk.bf16.gmra.mrb[4].mxu0 %vm616_vm1, %v2038_v10  ;;  %v2062_v34 = vld [vmem:[%s2398_s21 + $0x78] sm:$0xff]   ;;  %v2064_v36 = vld [vmem:[%s2398_s21 + $0x80] sm:$0xff]   ;;  %v2066_v38 = vld [vmem:[%s2398_s21 + $0x88] sm:$0xff]  }
  0x1b   : > { %1954 = vmatmul.mubr.msk.bf16.gmra.mrb[4].mxu1 %vm616_vm1, %v2039_v11  ;;  %1893 = vmatprep.mubr.msk.bf16.mxu0 %vm616_vm1, %v2040_v12  ;;  %v2063_v35 = vld [vmem:[%s2398_s21 + $0x178] sm:$0xff]   ;;  %v2065_v37 = vld [vmem:[%s2398_s21 + $0x180] sm:$0xff]   ;;  %v2067_v39 = vld [vmem:[%s2398_s21 + $0x188] sm:$0xff]  }
  0x1c   : > { %1957 = vmatprep.mubr.msk.bf16.mxu1 %vm616_vm1, %v2041_v13  ;;  %v2068_v40 = vld [vmem:[%s2398_s21 + $0x90] sm:$0xff]   ;;  %v2070_v42 = vld [vmem:[%s2398_s21 + $0x98] sm:$0xff]   ;;  %v2072_v44 = vld [vmem:[%s2398_s21 + $0xa0] sm:$0xff]  }
  0x1d   : > { %v2069_v41 = vld [vmem:[%s2398_s21 + $0x190] sm:$0xff]   ;;  %v2071_v43 = vld [vmem:[%s2398_s21 + $0x198] sm:$0xff]   ;;  %v2073_v45 = vld [vmem:[%s2398_s21 + $0x1a0] sm:$0xff]  }
  0x1e   : > { %v2074_v46 = vld [vmem:[%s2398_s21 + $0xa8] sm:$0xff]   ;;  %v2076_v48 = vld [vmem:[%s2398_s21 + $0xb0] sm:$0xff]   ;;  %v2078_v50 = vld [vmem:[%s2398_s21 + $0xb8] sm:$0xff]  }
  0x1f   : > { %v2075_v47 = vld [vmem:[%s2398_s21 + $0x1a8] sm:$0xff]   ;;  %v2077_v49 = vld [vmem:[%s2398_s21 + $0x1b0] sm:$0xff]   ;;  %v2079_v51 = vld [vmem:[%s2398_s21 + $0x1b8] sm:$0xff]  }
  0x20   : > { %v2080_v52 = vld [vmem:[%s2398_s21 + $0xc0] sm:$0xff]   ;;  %v2082_v54 = vld [vmem:[%s2398_s21 + $0xc8] sm:$0xff]   ;;  %v2084_v56 = vld [vmem:[%s2398_s21 + $0xd0] sm:$0xff]  }
  0x21   : > { %v2081_v53 = vld [vmem:[%s2398_s21 + $0x1c0] sm:$0xff]   ;;  %v2083_v55 = vld [vmem:[%s2398_s21 + $0x1c8] sm:$0xff]   ;;  %v2085_v57 = vld [vmem:[%s2398_s21 + $0x1d0] sm:$0xff]  }
  0x22   : > { %1894 = vmatmul.mubr.msk.bf16.gmra.mrb[8].mxu0 %vm616_vm1, %v2042_v14  ;;  %v2086_v58 = vld [vmem:[%s2398_s21 + $0xd8] sm:$0xff]   ;;  %v2088_v60 = vld [vmem:[%s2398_s21 + $0xe0] sm:$0xff]   ;;  %v2090_v62 = vld [vmem:[%s2398_s21 + $0xe8] sm:$0xff]  }
  0x23   : > { %1958 = vmatmul.mubr.msk.bf16.gmra.mrb[8].mxu1 %vm616_vm1, %v2043_v15  ;;  %1897 = vmatprep.mubr.msk.bf16.mxu0 %vm616_vm1, %v2044_v16  ;;  %v2087_v59 = vld [vmem:[%s2398_s21 + $0x1d8] sm:$0xff]   ;;  %v2089_v61 = vld [vmem:[%s2398_s21 + $0x1e0] sm:$0xff]   ;;  %v2091_v63 = vld [vmem:[%s2398_s21 + $0x1e8] sm:$0xff]  }
  0x24   : > { %1961 = vmatprep.mubr.msk.bf16.mxu1 %vm616_vm1, %v2045_v17  ;;  %v2092_v0 = vld [vmem:[%s2398_s21 + $0xf0] sm:$0xff]   ;;  %v2094_v2 = vld [vmem:[%s2398_s21 + $0xf8] sm:$0xff]  }
  0x25   : > { %v2093_v1 = vld [vmem:[%s2398_s21 + $0x1f0] sm:$0xff]   ;;  %v2095_v3 = vld [vmem:[%s2398_s21 + $0x1f8] sm:$0xff]  }
  0x2a   : > { %1898 = vmatmul.mubr.msk.bf16.gmra.mrb[12].mxu0 %vm616_vm1, %v2046_v18 }
  0x2b   : > { %1962 = vmatmul.mubr.msk.bf16.gmra.mrb[12].mxu1 %vm616_vm1, %v2047_v19  ;;  %1901 = vmatprep.mubr.msk.bf16.mxu0 %vm616_vm1, %v2048_v20 }
  0x2c   : > { %1965 = vmatprep.mubr.msk.bf16.mxu1 %vm616_vm1, %v2049_v21 }
  0x32   : > { %1902 = vmatmul.mubr.msk.bf16.gmra.mrb[16].mxu0 %vm616_vm1, %v2050_v22 }
  0x33   : > { %1966 = vmatmul.mubr.msk.bf16.gmra.mrb[16].mxu1 %vm616_vm1, %v2051_v23  ;;  %1905 = vmatprep.mubr.msk.bf16.mxu0 %vm616_vm1, %v2052_v24 }
  0x34   : > { %1969 = vmatprep.mubr.msk.bf16.mxu1 %vm616_vm1, %v2053_v25 }
  0x3a   : > { %1906 = vmatmul.mubr.msk.bf16.gmra.mrb[20].mxu0 %vm616_vm1, %v2054_v26 }
  0x3b   : > { %1970 = vmatmul.mubr.msk.bf16.gmra.mrb[20].mxu1 %vm616_vm1, %v2055_v27  ;;  %1909 = vmatprep.mubr.msk.bf16.mxu0 %vm616_vm1, %v2056_v28 }
  0x3c   : > { %1973 = vmatprep.mubr.msk.bf16.mxu1 %vm616_vm1, %v2057_v29 }
  0x42   : > { %1910 = vmatmul.mubr.msk.bf16.gmra.mrb[24].mxu0 %vm616_vm1, %v2058_v30 }
  0x43   : > { %1974 = vmatmul.mubr.msk.bf16.gmra.mrb[24].mxu1 %vm616_vm1, %v2059_v31  ;;  %1913 = vmatprep.mubr.msk.bf16.mxu0 %vm616_vm1, %v2060_v32 }
  0x44   : > { %1977 = vmatprep.mubr.msk.bf16.mxu1 %vm616_vm1, %v2061_v33 }
  0x4a   : > { %1914 = vmatmul.mubr.msk.bf16.gmra.mrb[28].mxu0 %vm616_vm1, %v2062_v34 }
  0x4b   : > { %1978 = vmatmul.mubr.msk.bf16.gmra.mrb[28].mxu1 %vm616_vm1, %v2063_v35  ;;  %1917 = vmatprep.mubr.msk.bf16.mxu0 %vm616_vm1, %v2064_v36 }
  0x4c   : > { %1981 = vmatprep.mubr.msk.bf16.mxu1 %vm616_vm1, %v2065_v37 }
  0x52   : > { %1918 = vmatmul.mubr.msk.bf16.gmra.mrb[32].mxu0 %vm616_vm1, %v2066_v38 }
  0x53   : > { %1982 = vmatmul.mubr.msk.bf16.gmra.mrb[32].mxu1 %vm616_vm1, %v2067_v39  ;;  %1921 = vmatprep.mubr.msk.bf16.mxu0 %vm616_vm1, %v2068_v40 }
  0x54   : > { %1985 = vmatprep.mubr.msk.bf16.mxu1 %vm616_vm1, %v2069_v41 }
  0x5a   : > { %1922 = vmatmul.mubr.msk.bf16.gmra.mrb[36].mxu0 %vm616_vm1, %v2070_v42 }
  0x5b   : > { %1986 = vmatmul.mubr.msk.bf16.gmra.mrb[36].mxu1 %vm616_vm1, %v2071_v43  ;;  %1925 = vmatprep.mubr.msk.bf16.mxu0 %vm616_vm1, %v2072_v44 }
  0x5c   : > { %1989 = vmatprep.mubr.msk.bf16.mxu1 %vm616_vm1, %v2073_v45 }
  0x62   : > { %1926 = vmatmul.mubr.msk.bf16.gmra.mrb[40].mxu0 %vm616_vm1, %v2074_v46 }
  0x63   : > { %1990 = vmatmul.mubr.msk.bf16.gmra.mrb[40].mxu1 %vm616_vm1, %v2075_v47  ;;  %1929 = vmatprep.mubr.msk.bf16.mxu0 %vm616_vm1, %v2076_v48 }
  0x64   : > { %1993 = vmatprep.mubr.msk.bf16.mxu1 %vm616_vm1, %v2077_v49 }
  0x6a   : > { %1930 = vmatmul.mubr.msk.bf16.gmra.mrb[44].mxu0 %vm616_vm1, %v2078_v50 }
  0x6b   : > { %1994 = vmatmul.mubr.msk.bf16.gmra.mrb[44].mxu1 %vm616_vm1, %v2079_v51  ;;  %1933 = vmatprep.mubr.msk.bf16.mxu0 %vm616_vm1, %v2080_v52 }
  0x6c   : > { %1997 = vmatprep.mubr.msk.bf16.mxu1 %vm616_vm1, %v2081_v53 }
  0x72   : > { %1934 = vmatmul.mubr.msk.bf16.gmra.mrb[48].mxu0 %vm616_vm1, %v2082_v54 }
  0x73   : > { %1998 = vmatmul.mubr.msk.bf16.gmra.mrb[48].mxu1 %vm616_vm1, %v2083_v55  ;;  %1937 = vmatprep.mubr.msk.bf16.mxu0 %vm616_vm1, %v2084_v56 }
  0x74   : > { %2001 = vmatprep.mubr.msk.bf16.mxu1 %vm616_vm1, %v2085_v57 }
  0x7a   : > { %1938 = vmatmul.mubr.msk.bf16.gmra.mrb[52].mxu0 %vm616_vm1, %v2086_v58 }
  0x7b   : > { %2002 = vmatmul.mubr.msk.bf16.gmra.mrb[52].mxu1 %vm616_vm1, %v2087_v59  ;;  %1941 = vmatprep.mubr.msk.bf16.mxu0 %vm616_vm1, %v2088_v60 }
  0x7c   : > { %2005 = vmatprep.mubr.msk.bf16.mxu1 %vm616_vm1, %v2089_v61 }
  0x82   : > { %1942 = vmatmul.mubr.msk.bf16.gmra.mrb[56].mxu0 %vm616_vm1, %v2090_v62 }
  0x83   : > { %2006 = vmatmul.mubr.msk.bf16.gmra.mrb[56].mxu1 %vm616_vm1, %v2091_v63  ;;  %1945 = vmatprep.mubr.msk.bf16.mxu0 %vm616_vm1, %v2092_v0 }
  0x84   : > { %2009 = vmatprep.mubr.msk.bf16.mxu1 %vm616_vm1, %v2093_v1 }
  0x8a   : > { %1946 = vmatmul.mubr.msk.bf16.gmra.mrb[60].mxu0 %vm616_vm1, %v2094_v2 }
  0x8b   : > { %2010 = vmatmul.mubr.msk.bf16.gmra.mrb[60].mxu1 %vm616_vm1, %v2095_v3 }
  0xe5   : > { %v1887_v4 = vpop.f32.mrb[0].mxu0 }
  0xe6   : > { %v1951_v5 = vpop.f32.mrb[0].mxu1  ;;  %2096 = vtanh.f32 %v1887_v4  ;;  %v847_v6 = vpop.f32.mrb[1].mxu0 }
  0xe7   : > { %v1103_v7 = vpop.f32.mrb[1].mxu1  ;;  %2098 = vtanh.f32 %v1951_v5  ;;  %v1888_v8 = vpop.f32.mrb[2].mxu0 }
  0xe8   : > { %v1952_v9 = vpop.f32.mrb[2].mxu1  ;;  %2100 = vtanh.f32 %v847_v6  ;;  %v850_v10 = vpop.f32.mrb[3].mxu0 }
  0xe9   : > { %v1106_v11 = vpop.f32.mrb[3].mxu1  ;;  %2102 = vtanh.f32 %v1103_v7 }
  0xea   : > { %2104 = vtanh.f32 %v1888_v8 }
  0xeb   : > { %2106 = vtanh.f32 %v1952_v9 }
  0xec   : > { %2108 = vtanh.f32 %v850_v10 }
  0xed   : > { %2110 = vtanh.f32 %v1106_v11  ;;  %v1891_v12 = vpop.f32.mrb[4].mxu0 }
  0xee   : > { %v1955_v13 = vpop.f32.mrb[4].mxu1  ;;  %2112 = vtanh.f32 %v1891_v12  ;;  %v863_v14 = vpop.f32.mrb[5].mxu0 }
  0xef   : > { %v1119_v15 = vpop.f32.mrb[5].mxu1  ;;  %2114 = vtanh.f32 %v1955_v13  ;;  %v1892_v16 = vpop.f32.mrb[6].mxu0 }
  0xf0   : > { %v1956_v17 = vpop.f32.mrb[6].mxu1  ;;  %v2097_v18 = vpop.eup %2096  ;;  %2116 = vtanh.f32 %v863_v14 }
  0xf1   : > { %v866_v19 = vpop.f32.mrb[7].mxu0  ;;  %v1122_v20 = vpop.f32.mrb[7].mxu1  ;;  %1488 = vst [vmem:[%s2532_s25 + $0x10] sm:$0xff] %v2097_v18  ;;  %2118 = vtanh.f32 %v1119_v15 }
  0xf2   : > { %v2099_v21 = vpop.eup %2098  ;;  %2120 = vtanh.f32 %v1892_v16 }
  0xf3   : > { %v2101_v22 = vpop.eup %2100  ;;  %1552 = vst [vmem:[%s2532_s25 + $0x210] sm:$0xff] %v2099_v21  ;;  %2122 = vtanh.f32 %v1956_v17 }
  0xf4   : > { %v2103_v23 = vpop.eup %2102  ;;  %1486 = vst [vmem:[%s2532_s25] sm:$0xff] %v2101_v22  ;;  %2124 = vtanh.f32 %v866_v19 }
  0xf5   : > { %v2105_v24 = vpop.eup %2104  ;;  %1550 = vst [vmem:[%s2532_s25 + $0x200] sm:$0xff] %v2103_v23  ;;  %2126 = vtanh.f32 %v1122_v20  ;;  %v1895_v26 = vpop.f32.mrb[8].mxu0 }
  0xf6   : > { %v2107_v25 = vpop.eup %2106  ;;  %1489 = vst [vmem:[%s2532_s25 + $0x18] sm:$0xff] %v2105_v24  ;;  %v1959_v27 = vpop.f32.mrb[8].mxu1  ;;  %2128 = vtanh.f32 %v1895_v26 }
  0xf7   : > { %v2109_v28 = vpop.eup %2108  ;;  %1553 = vst [vmem:[%s2532_s25 + $0x218] sm:$0xff] %v2107_v25  ;;  %v879_v29 = vpop.f32.mrb[9].mxu0  ;;  %2130 = vtanh.f32 %v1959_v27 }
  0xf8   : > { %v1135_v30 = vpop.f32.mrb[9].mxu1  ;;  %v2111_v31 = vpop.eup %2110  ;;  %1487 = vst [vmem:[%s2532_s25 + $0x8] sm:$0xff] %v2109_v28  ;;  %2132 = vtanh.f32 %v879_v29 }
  0xf9   : > { %v1896_v32 = vpop.f32.mrb[10].mxu0  ;;  %v1960_v33 = vpop.f32.mrb[10].mxu1  ;;  %1551 = vst [vmem:[%s2532_s25 + $0x208] sm:$0xff] %v2111_v31  ;;  %2134 = vtanh.f32 %v1135_v30 }
  0xfa   : > { %v2113_v34 = vpop.eup %2112  ;;  %v882_v35 = vpop.f32.mrb[11].mxu0  ;;  %2136 = vtanh.f32 %v1896_v32 }
  0xfb   : > { %v1138_v36 = vpop.f32.mrb[11].mxu1  ;;  %v2115_v37 = vpop.eup %2114  ;;  %1492 = vst [vmem:[%s2532_s25 + $0x30] sm:$0xff] %v2113_v34  ;;  %2138 = vtanh.f32 %v1960_v33 }
  0xfc   : > { %v2117_v38 = vpop.eup %2116  ;;  %1556 = vst [vmem:[%s2532_s25 + $0x230] sm:$0xff] %v2115_v37  ;;  %2140 = vtanh.f32 %v882_v35 }
  0xfd   : > { %v2119_v39 = vpop.eup %2118  ;;  %1490 = vst [vmem:[%s2532_s25 + $0x20] sm:$0xff] %v2117_v38  ;;  %2142 = vtanh.f32 %v1138_v36  ;;  %v1899_v42 = vpop.f32.mrb[12].mxu0 }
  0xfe   : > { %v2121_v40 = vpop.eup %2120  ;;  %1554 = vst [vmem:[%s2532_s25 + $0x220] sm:$0xff] %v2119_v39  ;;  %v1963_v43 = vpop.f32.mrb[12].mxu1  ;;  %2144 = vtanh.f32 %v1899_v42 }
  0xff   : > { %v2123_v41 = vpop.eup %2122  ;;  %1493 = vst [vmem:[%s2532_s25 + $0x38] sm:$0xff] %v2121_v40  ;;  %v895_v45 = vpop.f32.mrb[13].mxu0  ;;  %2146 = vtanh.f32 %v1963_v43 }
 0x100   : > { %v2125_v44 = vpop.eup %2124  ;;  %1557 = vst [vmem:[%s2532_s25 + $0x238] sm:$0xff] %v2123_v41  ;;  %v1151_v46 = vpop.f32.mrb[13].mxu1  ;;  %2148 = vtanh.f32 %v895_v45 }
 0x101   : > { %v2127_v47 = vpop.eup %2126  ;;  %1491 = vst [vmem:[%s2532_s25 + $0x28] sm:$0xff] %v2125_v44  ;;  %v1900_v48 = vpop.f32.mrb[14].mxu0  ;;  %2150 = vtanh.f32 %v1151_v46 }
 0x102   : > { %v1964_v49 = vpop.f32.mrb[14].mxu1  ;;  %v2129_v50 = vpop.eup %2128  ;;  %1555 = vst [vmem:[%s2532_s25 + $0x228] sm:$0xff] %v2127_v47  ;;  %2152 = vtanh.f32 %v1900_v48 }
 0x103   : > { %v898_v51 = vpop.f32.mrb[15].mxu0  ;;  %v1154_v52 = vpop.f32.mrb[15].mxu1  ;;  %1496 = vst [vmem:[%s2532_s25 + $0x50] sm:$0xff] %v2129_v50  ;;  %2154 = vtanh.f32 %v1964_v49 }
 0x104   : > { %v2131_v53 = vpop.eup %2130  ;;  %2156 = vtanh.f32 %v898_v51 }
 0x105   : > { %v2133_v54 = vpop.eup %2132  ;;  %1560 = vst [vmem:[%s2532_s25 + $0x250] sm:$0xff] %v2131_v53  ;;  %2158 = vtanh.f32 %v1154_v52  ;;  %v1903_v58 = vpop.f32.mrb[16].mxu0 }
 0x106   : > { %v2135_v55 = vpop.eup %2134  ;;  %1494 = vst [vmem:[%s2532_s25 + $0x40] sm:$0xff] %v2133_v54  ;;  %v1967_v59 = vpop.f32.mrb[16].mxu1  ;;  %2160 = vtanh.f32 %v1903_v58 }
 0x107   : > { %v2137_v56 = vpop.eup %2136  ;;  %1558 = vst [vmem:[%s2532_s25 + $0x240] sm:$0xff] %v2135_v55  ;;  %v911_v61 = vpop.f32.mrb[17].mxu0  ;;  %2162 = vtanh.f32 %v1967_v59 }
 0x108   : > { %v2139_v57 = vpop.eup %2138  ;;  %1497 = vst [vmem:[%s2532_s25 + $0x58] sm:$0xff] %v2137_v56  ;;  %v1167_v62 = vpop.f32.mrb[17].mxu1  ;;  %2164 = vtanh.f32 %v911_v61 }
 0x109   : > { %v2141_v60 = vpop.eup %2140  ;;  %1561 = vst [vmem:[%s2532_s25 + $0x258] sm:$0xff] %v2139_v57  ;;  %v1904_v0 = vpop.f32.mrb[18].mxu0  ;;  %2166 = vtanh.f32 %v1167_v62 }
 0x10a   : > { %v2143_v63 = vpop.eup %2142  ;;  %1495 = vst [vmem:[%s2532_s25 + $0x48] sm:$0xff] %v2141_v60  ;;  %v1968_v1 = vpop.f32.mrb[18].mxu1  ;;  %2168 = vtanh.f32 %v1904_v0 }
 0x10b   : > { %v2145_v2 = vpop.eup %2144  ;;  %1559 = vst [vmem:[%s2532_s25 + $0x248] sm:$0xff] %v2143_v63  ;;  %v914_v3 = vpop.f32.mrb[19].mxu0  ;;  %2170 = vtanh.f32 %v1968_v1 }
 0x10c   : > { %v1170_v4 = vpop.f32.mrb[19].mxu1  ;;  %v2147_v5 = vpop.eup %2146  ;;  %1500 = vst [vmem:[%s2532_s25 + $0x70] sm:$0xff] %v2145_v2  ;;  %2172 = vtanh.f32 %v914_v3 }
 0x10d   : > { %v2149_v6 = vpop.eup %2148  ;;  %1564 = vst [vmem:[%s2532_s25 + $0x270] sm:$0xff] %v2147_v5  ;;  %2174 = vtanh.f32 %v1170_v4  ;;  %v1907_v10 = vpop.f32.mrb[20].mxu0 }
 0x10e   : > { %v2151_v7 = vpop.eup %2150  ;;  %1498 = vst [vmem:[%s2532_s25 + $0x60] sm:$0xff] %v2149_v6  ;;  %v1971_v11 = vpop.f32.mrb[20].mxu1  ;;  %2176 = vtanh.f32 %v1907_v10 }
 0x10f   : > { %v2153_v8 = vpop.eup %2152  ;;  %1562 = vst [vmem:[%s2532_s25 + $0x260] sm:$0xff] %v2151_v7  ;;  %v927_v13 = vpop.f32.mrb[21].mxu0  ;;  %2178 = vtanh.f32 %v1971_v11 }
 0x110   : > { %v2155_v9 = vpop.eup %2154  ;;  %1501 = vst [vmem:[%s2532_s25 + $0x78] sm:$0xff] %v2153_v8  ;;  %v1183_v14 = vpop.f32.mrb[21].mxu1  ;;  %2180 = vtanh.f32 %v927_v13 }
 0x111   : > { %v2157_v12 = vpop.eup %2156  ;;  %1565 = vst [vmem:[%s2532_s25 + $0x278] sm:$0xff] %v2155_v9  ;;  %v1908_v16 = vpop.f32.mrb[22].mxu0  ;;  %2182 = vtanh.f32 %v1183_v14 }
 0x112   : > { %v2159_v15 = vpop.eup %2158  ;;  %1499 = vst [vmem:[%s2532_s25 + $0x68] sm:$0xff] %v2157_v12  ;;  %v1972_v17 = vpop.f32.mrb[22].mxu1  ;;  %2184 = vtanh.f32 %v1908_v16 }
 0x113   : > { %v2161_v18 = vpop.eup %2160  ;;  %1563 = vst [vmem:[%s2532_s25 + $0x268] sm:$0xff] %v2159_v15  ;;  %v930_v19 = vpop.f32.mrb[23].mxu0  ;;  %2186 = vtanh.f32 %v1972_v17 }
 0x114   : > { %v1186_v20 = vpop.f32.mrb[23].mxu1  ;;  %v2163_v21 = vpop.eup %2162  ;;  %1504 = vst [vmem:[%s2532_s25 + $0x90] sm:$0xff] %v2161_v18  ;;  %2188 = vtanh.f32 %v930_v19 }
 0x115   : > { %v2165_v22 = vpop.eup %2164  ;;  %1568 = vst [vmem:[%s2532_s25 + $0x290] sm:$0xff] %v2163_v21  ;;  %2190 = vtanh.f32 %v1186_v20  ;;  %v1911_v26 = vpop.f32.mrb[24].mxu0 }
 0x116   : > { %v2167_v23 = vpop.eup %2166  ;;  %1502 = vst [vmem:[%s2532_s25 + $0x80] sm:$0xff] %v2165_v22  ;;  %v1975_v27 = vpop.f32.mrb[24].mxu1  ;;  %2192 = vtanh.f32 %v1911_v26 }
 0x117   : > { %v2169_v24 = vpop.eup %2168  ;;  %1566 = vst [vmem:[%s2532_s25 + $0x280] sm:$0xff] %v2167_v23  ;;  %v943_v29 = vpop.f32.mrb[25].mxu0  ;;  %2194 = vtanh.f32 %v1975_v27 }
 0x118   : > { %v2171_v25 = vpop.eup %2170  ;;  %1505 = vst [vmem:[%s2532_s25 + $0x98] sm:$0xff] %v2169_v24  ;;  %v1199_v30 = vpop.f32.mrb[25].mxu1  ;;  %2196 = vtanh.f32 %v943_v29 }
 0x119   : > { %v2173_v28 = vpop.eup %2172  ;;  %1569 = vst [vmem:[%s2532_s25 + $0x298] sm:$0xff] %v2171_v25  ;;  %v1912_v32 = vpop.f32.mrb[26].mxu0  ;;  %2198 = vtanh.f32 %v1199_v30 }
 0x11a   : > { %v2175_v31 = vpop.eup %2174  ;;  %1503 = vst [vmem:[%s2532_s25 + $0x88] sm:$0xff] %v2173_v28  ;;  %v1976_v33 = vpop.f32.mrb[26].mxu1  ;;  %2200 = vtanh.f32 %v1912_v32 }
 0x11b   : > { %v2177_v34 = vpop.eup %2176  ;;  %1567 = vst [vmem:[%s2532_s25 + $0x288] sm:$0xff] %v2175_v31  ;;  %v946_v35 = vpop.f32.mrb[27].mxu0  ;;  %2202 = vtanh.f32 %v1976_v33 }
 0x11c   : > { %v1202_v36 = vpop.f32.mrb[27].mxu1  ;;  %v2179_v37 = vpop.eup %2178  ;;  %1508 = vst [vmem:[%s2532_s25 + $0xb0] sm:$0xff] %v2177_v34  ;;  %2204 = vtanh.f32 %v946_v35 }
 0x11d   : > { %v2181_v38 = vpop.eup %2180  ;;  %1572 = vst [vmem:[%s2532_s25 + $0x2b0] sm:$0xff] %v2179_v37  ;;  %2206 = vtanh.f32 %v1202_v36  ;;  %v1915_v42 = vpop.f32.mrb[28].mxu0 }
 0x11e   : > { %v2183_v39 = vpop.eup %2182  ;;  %1506 = vst [vmem:[%s2532_s25 + $0xa0] sm:$0xff] %v2181_v38  ;;  %v1979_v43 = vpop.f32.mrb[28].mxu1  ;;  %2208 = vtanh.f32 %v1915_v42 }
 0x11f   : > { %v2185_v40 = vpop.eup %2184  ;;  %1570 = vst [vmem:[%s2532_s25 + $0x2a0] sm:$0xff] %v2183_v39  ;;  %v959_v45 = vpop.f32.mrb[29].mxu0  ;;  %2210 = vtanh.f32 %v1979_v43 }
 0x120   : > { %v2187_v41 = vpop.eup %2186  ;;  %1509 = vst [vmem:[%s2532_s25 + $0xb8] sm:$0xff] %v2185_v40  ;;  %v1215_v46 = vpop.f32.mrb[29].mxu1  ;;  %2212 = vtanh.f32 %v959_v45 }
 0x121   : > { %v2189_v44 = vpop.eup %2188  ;;  %1573 = vst [vmem:[%s2532_s25 + $0x2b8] sm:$0xff] %v2187_v41  ;;  %v1916_v48 = vpop.f32.mrb[30].mxu0  ;;  %2214 = vtanh.f32 %v1215_v46 }
 0x122   : > { %v2191_v47 = vpop.eup %2190  ;;  %1507 = vst [vmem:[%s2532_s25 + $0xa8] sm:$0xff] %v2189_v44  ;;  %v1980_v49 = vpop.f32.mrb[30].mxu1  ;;  %2216 = vtanh.f32 %v1916_v48 }
 0x123   : > { %v2193_v50 = vpop.eup %2192  ;;  %1571 = vst [vmem:[%s2532_s25 + $0x2a8] sm:$0xff] %v2191_v47  ;;  %v962_v51 = vpop.f32.mrb[31].mxu0  ;;  %2218 = vtanh.f32 %v1980_v49 }
 0x124   : > { %v1218_v52 = vpop.f32.mrb[31].mxu1  ;;  %v2195_v53 = vpop.eup %2194  ;;  %1512 = vst [vmem:[%s2532_s25 + $0xd0] sm:$0xff] %v2193_v50  ;;  %2220 = vtanh.f32 %v962_v51 }
 0x125   : > { %v2197_v54 = vpop.eup %2196  ;;  %1576 = vst [vmem:[%s2532_s25 + $0x2d0] sm:$0xff] %v2195_v53  ;;  %2222 = vtanh.f32 %v1218_v52  ;;  %v1919_v58 = vpop.f32.mrb[32].mxu0 }
 0x126   : > { %v2199_v55 = vpop.eup %2198  ;;  %1510 = vst [vmem:[%s2532_s25 + $0xc0] sm:$0xff] %v2197_v54  ;;  %v1983_v59 = vpop.f32.mrb[32].mxu1  ;;  %2224 = vtanh.f32 %v1919_v58 }
 0x127   : > { %v2201_v56 = vpop.eup %2200  ;;  %1574 = vst [vmem:[%s2532_s25 + $0x2c0] sm:$0xff] %v2199_v55  ;;  %v975_v61 = vpop.f32.mrb[33].mxu0  ;;  %2226 = vtanh.f32 %v1983_v59 }
 0x128   : > { %v2203_v57 = vpop.eup %2202  ;;  %1513 = vst [vmem:[%s2532_s25 + $0xd8] sm:$0xff] %v2201_v56  ;;  %v1231_v62 = vpop.f32.mrb[33].mxu1  ;;  %2228 = vtanh.f32 %v975_v61 }
 0x129   : > { %v2205_v60 = vpop.eup %2204  ;;  %1577 = vst [vmem:[%s2532_s25 + $0x2d8] sm:$0xff] %v2203_v57  ;;  %v1920_v0 = vpop.f32.mrb[34].mxu0  ;;  %2230 = vtanh.f32 %v1231_v62 }
 0x12a   : > { %v2207_v63 = vpop.eup %2206  ;;  %1511 = vst [vmem:[%s2532_s25 + $0xc8] sm:$0xff] %v2205_v60  ;;  %v1984_v1 = vpop.f32.mrb[34].mxu1  ;;  %2232 = vtanh.f32 %v1920_v0 }
 0x12b   : > { %v2209_v2 = vpop.eup %2208  ;;  %1575 = vst [vmem:[%s2532_s25 + $0x2c8] sm:$0xff] %v2207_v63  ;;  %v978_v3 = vpop.f32.mrb[35].mxu0  ;;  %2234 = vtanh.f32 %v1984_v1 }
 0x12c   : > { %v1234_v4 = vpop.f32.mrb[35].mxu1  ;;  %v2211_v5 = vpop.eup %2210  ;;  %1516 = vst [vmem:[%s2532_s25 + $0xf0] sm:$0xff] %v2209_v2  ;;  %2236 = vtanh.f32 %v978_v3 }
 0x12d   : > { %v2213_v6 = vpop.eup %2212  ;;  %1580 = vst [vmem:[%s2532_s25 + $0x2f0] sm:$0xff] %v2211_v5  ;;  %2238 = vtanh.f32 %v1234_v4  ;;  %v1923_v10 = vpop.f32.mrb[36].mxu0 }
 0x12e   : > { %v2215_v7 = vpop.eup %2214  ;;  %1514 = vst [vmem:[%s2532_s25 + $0xe0] sm:$0xff] %v2213_v6  ;;  %v1987_v11 = vpop.f32.mrb[36].mxu1  ;;  %2240 = vtanh.f32 %v1923_v10 }
 0x12f   : > { %v2217_v8 = vpop.eup %2216  ;;  %1578 = vst [vmem:[%s2532_s25 + $0x2e0] sm:$0xff] %v2215_v7  ;;  %v991_v13 = vpop.f32.mrb[37].mxu0  ;;  %2242 = vtanh.f32 %v1987_v11 }
 0x130   : > { %v2219_v9 = vpop.eup %2218  ;;  %1517 = vst [vmem:[%s2532_s25 + $0xf8] sm:$0xff] %v2217_v8  ;;  %v1247_v14 = vpop.f32.mrb[37].mxu1  ;;  %2244 = vtanh.f32 %v991_v13 }
 0x131   : > { %v2221_v12 = vpop.eup %2220  ;;  %1581 = vst [vmem:[%s2532_s25 + $0x2f8] sm:$0xff] %v2219_v9  ;;  %v1924_v16 = vpop.f32.mrb[38].mxu0  ;;  %2246 = vtanh.f32 %v1247_v14 }
 0x132   : > { %v2223_v15 = vpop.eup %2222  ;;  %1515 = vst [vmem:[%s2532_s25 + $0xe8] sm:$0xff] %v2221_v12  ;;  %v1988_v17 = vpop.f32.mrb[38].mxu1  ;;  %2248 = vtanh.f32 %v1924_v16 }
 0x133   : > { %v2225_v18 = vpop.eup %2224  ;;  %1579 = vst [vmem:[%s2532_s25 + $0x2e8] sm:$0xff] %v2223_v15  ;;  %v994_v19 = vpop.f32.mrb[39].mxu0  ;;  %2250 = vtanh.f32 %v1988_v17 }
 0x134   : > { %v1250_v20 = vpop.f32.mrb[39].mxu1  ;;  %v2227_v21 = vpop.eup %2226  ;;  %1520 = vst [vmem:[%s2532_s25 + $0x110] sm:$0xff] %v2225_v18  ;;  %2252 = vtanh.f32 %v994_v19 }
 0x135   : > { %v2229_v22 = vpop.eup %2228  ;;  %1584 = vst [vmem:[%s2532_s25 + $0x310] sm:$0xff] %v2227_v21  ;;  %2254 = vtanh.f32 %v1250_v20  ;;  %v1927_v26 = vpop.f32.mrb[40].mxu0 }
 0x136   : > { %v2231_v23 = vpop.eup %2230  ;;  %1518 = vst [vmem:[%s2532_s25 + $0x100] sm:$0xff] %v2229_v22  ;;  %v1991_v27 = vpop.f32.mrb[40].mxu1  ;;  %2256 = vtanh.f32 %v1927_v26 }
 0x137   : > { %v2233_v24 = vpop.eup %2232  ;;  %1582 = vst [vmem:[%s2532_s25 + $0x300] sm:$0xff] %v2231_v23  ;;  %v1007_v29 = vpop.f32.mrb[41].mxu0  ;;  %2258 = vtanh.f32 %v1991_v27 }
 0x138   : > { %v2235_v25 = vpop.eup %2234  ;;  %1521 = vst [vmem:[%s2532_s25 + $0x118] sm:$0xff] %v2233_v24  ;;  %v1263_v30 = vpop.f32.mrb[41].mxu1  ;;  %2260 = vtanh.f32 %v1007_v29 }
 0x139   : > { %v2237_v28 = vpop.eup %2236  ;;  %1585 = vst [vmem:[%s2532_s25 + $0x318] sm:$0xff] %v2235_v25  ;;  %v1928_v32 = vpop.f32.mrb[42].mxu0  ;;  %2262 = vtanh.f32 %v1263_v30 }
 0x13a   : > { %v2239_v31 = vpop.eup %2238  ;;  %1519 = vst [vmem:[%s2532_s25 + $0x108] sm:$0xff] %v2237_v28  ;;  %v1992_v33 = vpop.f32.mrb[42].mxu1  ;;  %2264 = vtanh.f32 %v1928_v32 }
 0x13b   : > { %v2241_v34 = vpop.eup %2240  ;;  %1583 = vst [vmem:[%s2532_s25 + $0x308] sm:$0xff] %v2239_v31  ;;  %v1010_v35 = vpop.f32.mrb[43].mxu0  ;;  %2266 = vtanh.f32 %v1992_v33 }
 0x13c   : > { %v1266_v36 = vpop.f32.mrb[43].mxu1  ;;  %v2243_v37 = vpop.eup %2242  ;;  %1524 = vst [vmem:[%s2532_s25 + $0x130] sm:$0xff] %v2241_v34  ;;  %2268 = vtanh.f32 %v1010_v35 }
 0x13d   : > { %v2245_v38 = vpop.eup %2244  ;;  %1588 = vst [vmem:[%s2532_s25 + $0x330] sm:$0xff] %v2243_v37  ;;  %2270 = vtanh.f32 %v1266_v36  ;;  %v1931_v42 = vpop.f32.mrb[44].mxu0 }
 0x13e   : > { %v2247_v39 = vpop.eup %2246  ;;  %1522 = vst [vmem:[%s2532_s25 + $0x120] sm:$0xff] %v2245_v38  ;;  %v1995_v43 = vpop.f32.mrb[44].mxu1  ;;  %2272 = vtanh.f32 %v1931_v42 }
 0x13f   : > { %v2249_v40 = vpop.eup %2248  ;;  %1586 = vst [vmem:[%s2532_s25 + $0x320] sm:$0xff] %v2247_v39  ;;  %v1023_v45 = vpop.f32.mrb[45].mxu0  ;;  %2274 = vtanh.f32 %v1995_v43 }
 0x140   : > { %v2251_v41 = vpop.eup %2250  ;;  %1525 = vst [vmem:[%s2532_s25 + $0x138] sm:$0xff] %v2249_v40  ;;  %v1279_v46 = vpop.f32.mrb[45].mxu1  ;;  %2276 = vtanh.f32 %v1023_v45 }
 0x141   : > { %v2253_v44 = vpop.eup %2252  ;;  %1589 = vst [vmem:[%s2532_s25 + $0x338] sm:$0xff] %v2251_v41  ;;  %v1932_v48 = vpop.f32.mrb[46].mxu0  ;;  %2278 = vtanh.f32 %v1279_v46 }
 0x142   : > { %v2255_v47 = vpop.eup %2254  ;;  %1523 = vst [vmem:[%s2532_s25 + $0x128] sm:$0xff] %v2253_v44  ;;  %v1996_v49 = vpop.f32.mrb[46].mxu1  ;;  %2280 = vtanh.f32 %v1932_v48 }
 0x143   : > { %v2257_v50 = vpop.eup %2256  ;;  %1587 = vst [vmem:[%s2532_s25 + $0x328] sm:$0xff] %v2255_v47  ;;  %v1026_v51 = vpop.f32.mrb[47].mxu0  ;;  %2282 = vtanh.f32 %v1996_v49 }
 0x144   : > { %v1282_v52 = vpop.f32.mrb[47].mxu1  ;;  %v2259_v53 = vpop.eup %2258  ;;  %1528 = vst [vmem:[%s2532_s25 + $0x150] sm:$0xff] %v2257_v50  ;;  %2284 = vtanh.f32 %v1026_v51 }
 0x145   : > { %v2261_v54 = vpop.eup %2260  ;;  %1592 = vst [vmem:[%s2532_s25 + $0x350] sm:$0xff] %v2259_v53  ;;  %2286 = vtanh.f32 %v1282_v52  ;;  %v1935_v58 = vpop.f32.mrb[48].mxu0 }
 0x146   : > { %v2263_v55 = vpop.eup %2262  ;;  %1526 = vst [vmem:[%s2532_s25 + $0x140] sm:$0xff] %v2261_v54  ;;  %v1999_v59 = vpop.f32.mrb[48].mxu1  ;;  %2288 = vtanh.f32 %v1935_v58 }
 0x147   : > { %v2265_v56 = vpop.eup %2264  ;;  %1590 = vst [vmem:[%s2532_s25 + $0x340] sm:$0xff] %v2263_v55  ;;  %v1039_v61 = vpop.f32.mrb[49].mxu0  ;;  %2290 = vtanh.f32 %v1999_v59 }
 0x148   : > { %v2267_v57 = vpop.eup %2266  ;;  %1529 = vst [vmem:[%s2532_s25 + $0x158] sm:$0xff] %v2265_v56  ;;  %v1295_v62 = vpop.f32.mrb[49].mxu1  ;;  %2292 = vtanh.f32 %v1039_v61 }
 0x149   : > { %v2269_v60 = vpop.eup %2268  ;;  %1593 = vst [vmem:[%s2532_s25 + $0x358] sm:$0xff] %v2267_v57  ;;  %v1936_v0 = vpop.f32.mrb[50].mxu0  ;;  %2294 = vtanh.f32 %v1295_v62 }
 0x14a   : > { %v2271_v63 = vpop.eup %2270  ;;  %1527 = vst [vmem:[%s2532_s25 + $0x148] sm:$0xff] %v2269_v60  ;;  %v2000_v1 = vpop.f32.mrb[50].mxu1  ;;  %2296 = vtanh.f32 %v1936_v0 }
 0x14b   : > { %v2273_v2 = vpop.eup %2272  ;;  %1591 = vst [vmem:[%s2532_s25 + $0x348] sm:$0xff] %v2271_v63  ;;  %v1042_v3 = vpop.f32.mrb[51].mxu0  ;;  %2298 = vtanh.f32 %v2000_v1 }
 0x14c   : > { %v1298_v4 = vpop.f32.mrb[51].mxu1  ;;  %v2275_v5 = vpop.eup %2274  ;;  %1532 = vst [vmem:[%s2532_s25 + $0x170] sm:$0xff] %v2273_v2  ;;  %2300 = vtanh.f32 %v1042_v3 }
 0x14d   : > { %v2277_v6 = vpop.eup %2276  ;;  %1596 = vst [vmem:[%s2532_s25 + $0x370] sm:$0xff] %v2275_v5  ;;  %2302 = vtanh.f32 %v1298_v4  ;;  %v1939_v10 = vpop.f32.mrb[52].mxu0 }
 0x14e   : > { %v2279_v7 = vpop.eup %2278  ;;  %1530 = vst [vmem:[%s2532_s25 + $0x160] sm:$0xff] %v2277_v6  ;;  %v2003_v11 = vpop.f32.mrb[52].mxu1  ;;  %2304 = vtanh.f32 %v1939_v10 }
 0x14f   : > { %v2281_v8 = vpop.eup %2280  ;;  %1594 = vst [vmem:[%s2532_s25 + $0x360] sm:$0xff] %v2279_v7  ;;  %v1055_v13 = vpop.f32.mrb[53].mxu0  ;;  %2306 = vtanh.f32 %v2003_v11 }
 0x150   : > { %v2283_v9 = vpop.eup %2282  ;;  %1533 = vst [vmem:[%s2532_s25 + $0x178] sm:$0xff] %v2281_v8  ;;  %v1311_v14 = vpop.f32.mrb[53].mxu1  ;;  %2308 = vtanh.f32 %v1055_v13 }
 0x151   : > { %v2285_v12 = vpop.eup %2284  ;;  %1597 = vst [vmem:[%s2532_s25 + $0x378] sm:$0xff] %v2283_v9  ;;  %v1940_v16 = vpop.f32.mrb[54].mxu0  ;;  %2310 = vtanh.f32 %v1311_v14 }
 0x152   : > { %v2287_v15 = vpop.eup %2286  ;;  %1531 = vst [vmem:[%s2532_s25 + $0x168] sm:$0xff] %v2285_v12  ;;  %v2004_v17 = vpop.f32.mrb[54].mxu1  ;;  %2312 = vtanh.f32 %v1940_v16 }
 0x153   : > { %v2289_v18 = vpop.eup %2288  ;;  %1595 = vst [vmem:[%s2532_s25 + $0x368] sm:$0xff] %v2287_v15  ;;  %v1058_v19 = vpop.f32.mrb[55].mxu0  ;;  %2314 = vtanh.f32 %v2004_v17 }
 0x154   : > { %v1314_v20 = vpop.f32.mrb[55].mxu1  ;;  %v2291_v21 = vpop.eup %2290  ;;  %1536 = vst [vmem:[%s2532_s25 + $0x190] sm:$0xff] %v2289_v18  ;;  %2316 = vtanh.f32 %v1058_v19 }
 0x155   : > { %v2293_v22 = vpop.eup %2292  ;;  %1600 = vst [vmem:[%s2532_s25 + $0x390] sm:$0xff] %v2291_v21  ;;  %2318 = vtanh.f32 %v1314_v20  ;;  %v1943_v26 = vpop.f32.mrb[56].mxu0 }
 0x156   : > { %v2295_v23 = vpop.eup %2294  ;;  %1534 = vst [vmem:[%s2532_s25 + $0x180] sm:$0xff] %v2293_v22  ;;  %v2007_v27 = vpop.f32.mrb[56].mxu1  ;;  %2320 = vtanh.f32 %v1943_v26 }
 0x157   : > { %v2297_v24 = vpop.eup %2296  ;;  %1598 = vst [vmem:[%s2532_s25 + $0x380] sm:$0xff] %v2295_v23  ;;  %v1071_v29 = vpop.f32.mrb[57].mxu0  ;;  %2322 = vtanh.f32 %v2007_v27 }
 0x158   : > { %v2299_v25 = vpop.eup %2298  ;;  %1537 = vst [vmem:[%s2532_s25 + $0x198] sm:$0xff] %v2297_v24  ;;  %v1327_v30 = vpop.f32.mrb[57].mxu1  ;;  %2324 = vtanh.f32 %v1071_v29 }
 0x159   : > { %v2301_v28 = vpop.eup %2300  ;;  %1601 = vst [vmem:[%s2532_s25 + $0x398] sm:$0xff] %v2299_v25  ;;  %v1944_v32 = vpop.f32.mrb[58].mxu0  ;;  %2326 = vtanh.f32 %v1327_v30 }
 0x15a   : > { %v2303_v31 = vpop.eup %2302  ;;  %1535 = vst [vmem:[%s2532_s25 + $0x188] sm:$0xff] %v2301_v28  ;;  %v2008_v33 = vpop.f32.mrb[58].mxu1  ;;  %2328 = vtanh.f32 %v1944_v32 }
 0x15b   : > { %v2305_v34 = vpop.eup %2304  ;;  %1599 = vst [vmem:[%s2532_s25 + $0x388] sm:$0xff] %v2303_v31  ;;  %v1074_v35 = vpop.f32.mrb[59].mxu0  ;;  %2330 = vtanh.f32 %v2008_v33 }
 0x15c   : > { %v1330_v36 = vpop.f32.mrb[59].mxu1  ;;  %v2307_v37 = vpop.eup %2306  ;;  %1540 = vst [vmem:[%s2532_s25 + $0x1b0] sm:$0xff] %v2305_v34  ;;  %2332 = vtanh.f32 %v1074_v35 }
 0x15d   : > { %v2309_v38 = vpop.eup %2308  ;;  %1604 = vst [vmem:[%s2532_s25 + $0x3b0] sm:$0xff] %v2307_v37  ;;  %2334 = vtanh.f32 %v1330_v36  ;;  %v1947_v42 = vpop.f32.mrb[60].mxu0 }
 0x15e   : > { %v2311_v39 = vpop.eup %2310  ;;  %1538 = vst [vmem:[%s2532_s25 + $0x1a0] sm:$0xff] %v2309_v38  ;;  %v2011_v43 = vpop.f32.mrb[60].mxu1  ;;  %2336 = vtanh.f32 %v1947_v42 }
 0x15f   : > { %v2313_v40 = vpop.eup %2312  ;;  %1602 = vst [vmem:[%s2532_s25 + $0x3a0] sm:$0xff] %v2311_v39  ;;  %v1087_v45 = vpop.f32.mrb[61].mxu0  ;;  %2338 = vtanh.f32 %v2011_v43 }
 0x160   : > { %v2315_v41 = vpop.eup %2314  ;;  %1541 = vst [vmem:[%s2532_s25 + $0x1b8] sm:$0xff] %v2313_v40  ;;  %v1343_v46 = vpop.f32.mrb[61].mxu1  ;;  %2340 = vtanh.f32 %v1087_v45 }
 0x161   : > { %v2317_v44 = vpop.eup %2316  ;;  %1605 = vst [vmem:[%s2532_s25 + $0x3b8] sm:$0xff] %v2315_v41  ;;  %v1948_v48 = vpop.f32.mrb[62].mxu0  ;;  %2342 = vtanh.f32 %v1343_v46 }
 0x162   : > { %v2319_v47 = vpop.eup %2318  ;;  %1539 = vst [vmem:[%s2532_s25 + $0x1a8] sm:$0xff] %v2317_v44  ;;  %v2012_v49 = vpop.f32.mrb[62].mxu1  ;;  %2344 = vtanh.f32 %v1948_v48 }
 0x163   : > { %v2321_v50 = vpop.eup %2320  ;;  %1603 = vst [vmem:[%s2532_s25 + $0x3a8] sm:$0xff] %v2319_v47  ;;  %v1090_v51 = vpop.f32.mrb[63].mxu0  ;;  %2346 = vtanh.f32 %v2012_v49 }
 0x164   : > { %v1346_v52 = vpop.f32.mrb[63].mxu1  ;;  %v2323_v53 = vpop.eup %2322  ;;  %1544 = vst [vmem:[%s2532_s25 + $0x1d0] sm:$0xff] %v2321_v50  ;;  %2348 = vtanh.f32 %v1090_v51 }
 0x165   : > { %v2325_v54 = vpop.eup %2324  ;;  %1608 = vst [vmem:[%s2532_s25 + $0x3d0] sm:$0xff] %v2323_v53  ;;  %2350 = vtanh.f32 %v1346_v52 }
 0x166   : > { %v2327_v55 = vpop.eup %2326  ;;  %1542 = vst [vmem:[%s2532_s25 + $0x1c0] sm:$0xff] %v2325_v54 }
 0x167   : > { %v2329_v56 = vpop.eup %2328  ;;  %1606 = vst [vmem:[%s2532_s25 + $0x3c0] sm:$0xff] %v2327_v55 }
 0x168   : > { %v2331_v57 = vpop.eup %2330  ;;  %1545 = vst [vmem:[%s2532_s25 + $0x1d8] sm:$0xff] %v2329_v56 }
 0x169   : > { %v2333_v58 = vpop.eup %2332  ;;  %1609 = vst [vmem:[%s2532_s25 + $0x3d8] sm:$0xff] %v2331_v57 }
 0x16a   : > { %v2335_v59 = vpop.eup %2334  ;;  %1543 = vst [vmem:[%s2532_s25 + $0x1c8] sm:$0xff] %v2333_v58 }
 0x16b   : > { %v2337_v60 = vpop.eup %2336  ;;  %1607 = vst [vmem:[%s2532_s25 + $0x3c8] sm:$0xff] %v2335_v59 }
 0x16c   : > { %v2339_v61 = vpop.eup %2338  ;;  %1548 = vst [vmem:[%s2532_s25 + $0x1f0] sm:$0xff] %v2337_v60 }
 0x16d   : > { %v2341_v62 = vpop.eup %2340  ;;  %1612 = vst [vmem:[%s2532_s25 + $0x3f0] sm:$0xff] %v2339_v61 }
 0x16e   : > { %v2343_v63 = vpop.eup %2342  ;;  %1546 = vst [vmem:[%s2532_s25 + $0x1e0] sm:$0xff] %v2341_v62 }
 0x16f   : > { %v2345_v0 = vpop.eup %2344  ;;  %1610 = vst [vmem:[%s2532_s25 + $0x3e0] sm:$0xff] %v2343_v63 }
 0x170   : > { %v2347_v1 = vpop.eup %2346  ;;  %1549 = vst [vmem:[%s2532_s25 + $0x1f8] sm:$0xff] %v2345_v0 }
 0x171   : > { %v2349_v2 = vpop.eup %2348  ;;  %1613 = vst [vmem:[%s2532_s25 + $0x3f8] sm:$0xff] %v2347_v1 }
 0x172   : > { %v2351_v3 = vpop.eup %2350  ;;  %1547 = vst [vmem:[%s2532_s25 + $0x1e8] sm:$0xff] %v2349_v2 }
 0x173   : > { %1611 = vst [vmem:[%s2532_s25 + $0x3e8] sm:$0xff] %v2351_v3 }
 0x174 PF: > { %s12_s9 = sadd.s32 1, %s2358_s9  }
 0x175   : > { %p9_p4 = scmp.ge.s32.totalorder %s12_s9, 4  }
 0x177   :  { %11 = sbr.rel (!%p9_p4) target bundleno = 1 (0x1), region = 58 }

</bundles_post_ra>
